<compile_context>
chip_gen: v6e
topology: v6e:2x2x1
jax: 0.10.0
libtpu: 0.0.40
codegen_flags: <defaults>
</compile_context>

<pallas_src>
import functools

import jax
import jax.numpy as jnp
from jax.experimental import pallas as pl
from jax.experimental.pallas import tpu as pltpu


def _local_disc_kernel(x_ref, w0_ref, w1_ref, w2_ref, o_ref, *, chunk):
    # x_ref : (NB, Cin, TILE)  f32/bf16  pixel tile, channels-first (NCHW native)
    # w0_ref: (Ci, Cin)        bf16      conv0 weight (out, in)
    # w1_ref: (Ci, Ci)         bf16      conv1 weight (out, in)
    # w2_ref: (Ci, 1)          f32       conv2 weight as a column (VPU/XLU path)
    # o_ref : (NB, 1, TILE)    f32       lane-dense per-pixel scores
    nb, _, tile = x_ref.shape
    w0 = w0_ref[...]
    w1 = w1_ref[...]
    w2 = w2_ref[...]

    # Static (fully unrolled) loops: per-image, per-lane-chunk. Chunking keeps
    # the f32 (Ci, chunk) intermediates fixed-size regardless of TILE.
    for b in range(nb):
        for s in range(0, tile, chunk):
            cw = min(chunk, tile - s)                      # static, multiple of 128
            x = x_ref[b, :, s:s + cw]                      # (Cin, cw)
            if x.dtype != jnp.bfloat16:
                x = x.astype(jnp.bfloat16)

            h = jnp.dot(w0, x, preferred_element_type=jnp.float32)   # (Ci, cw) f32
            h = jnp.maximum(h.astype(jnp.bfloat16), 0)               # ReLU in bf16

            h = jnp.dot(w1, h, preferred_element_type=jnp.float32)   # (Ci, cw) f32
            h = jnp.maximum(h, 0.0)                                  # ReLU in f32

            # Layer 3 (Ci -> 1): VPU multiply + sublane (XLU) reduce, keeping
            # the MXU free for the two big matmuls (MXU-bound on all gens).
            sc = jnp.sum(h * w2, axis=0, keepdims=True)              # (1, cw) f32
            o_ref[b, :, s:s + cw] = sc


@functools.partial(jax.jit, static_argnames=("tile_hw_target", "chunk_target"))
def local_discriminator(x_nchw, w0, w1, w2, *, tile_hw_target=2048, chunk_target=512):
    """Fused LocalDiscriminator forward.

    x_nchw: (N, Cin, H, W) float32 or bfloat16 (NCHW, as in PyTorch).
    w0:     (Ci, Cin)  = Conv2d c0 weight with the 1x1 kernel dims squeezed.
    w1:     (Ci, Ci)   = Conv2d c1 weight squeezed.
    w2:     (1,  Ci)   = Conv2d c2 weight squeezed.
    Returns (N, 1, H, W) float32.  (Bias-free convs, matching the module.)
    """
    n, cin, h, w = x_nchw.shape
    ci = w0.shape[0]
    hw = h * w

    assert tile_hw_target >= 128 and tile_hw_target % 128 == 0
    # Lane-granular pixel count; used only for tile sizing (no data padding).
    hw128 = -(-hw // 128) * 128

    if hw128 >= tile_hw_target:
        # Large spatial: full-size pixel tiles, one image per grid step.
        tile = tile_hw_target
        nb = 1
    else:
        # Small spatial: one tile covers all pixels; block the batch dim so
        # several images share one grid step (amortizes per-step overhead).
        tile = hw128
        nb_cap = max(1, min(8, tile_hw_target // tile, n))
        nb = max(d for d in range(1, nb_cap + 1) if n % d == 0)  # divisor of N

    chunk = min(chunk_target, tile)          # compute-chunk (lane) width
    num_b = n // nb
    num_t = -(-hw // tile)                   # cdiv; partial last tile is OOB-masked

    # NCHW is already (N, Cin, H*W) contiguously -- a free reshape, no transpose.
    x3 = x_nchw.reshape(n, cin, hw)

    # Weights: bf16 for the MXU matmuls; tiny w2 stays f32 for the VPU/XLU path.
    w0b = w0.astype(jnp.bfloat16)                 # (Ci, Cin)
    w1b = w1.astype(jnp.bfloat16)                 # (Ci, Ci)
    w2c = w2.reshape(ci, 1).astype(jnp.float32)   # (Ci, 1)

    kernel = functools.partial(_local_disc_kernel, chunk=chunk)

    out = pl.pallas_call(
        kernel,
        out_shape=jax.ShapeDtypeStruct((n, 1, hw), jnp.float32),
        grid_spec=pltpu.PrefetchScalarGridSpec(
            num_scalar_prefetch=0,
            grid=(num_b, num_t),
            in_specs=[
                pl.BlockSpec((nb, cin, tile), lambda i, t: (i, 0, t)),  # pixel tile
                pl.BlockSpec((ci, cin), lambda i, t: (0, 0)),           # W0 (resident)
                pl.BlockSpec((ci, ci), lambda i, t: (0, 0)),            # W1 (resident)
                pl.BlockSpec((ci, 1), lambda i, t: (0, 0)),             # w2 column
            ],
            out_specs=pl.BlockSpec((nb, 1, tile), lambda i, t: (i, 0, t)),
        ),
        compiler_params=pltpu.CompilerParams(
            dimension_semantics=("parallel", "parallel"),
            vmem_limit_bytes=32 * 1024 * 1024,   # safe on v5e/v6e/v7x scoped VMEM
        ),
    )(x3, w0b, w1b, w2c)

    # (N, 1, HW) -> (N, 1, H, W); pure reshape, no transpose, no slice needed.
    return out.reshape(n, 1, h, w)


def _reference(x_nchw, w0, w1, w2):
    # f32 reference matching PyTorch Conv2d(1x1, bias=False) semantics.
    h = jnp.maximum(jnp.einsum("oc,nchw->nohw", w0, x_nchw), 0.0)
    h = jnp.maximum(jnp.einsum("oc,nchw->nohw", w1, h), 0.0)
    return jnp.einsum("oc,nchw->nohw", w2, h)


if __name__ == "__main__":
    # Module config (PyTorch defaults): in = M + V = 128 + 64 = 192, interm = 512
    M_channels, V_channels, interm = 128, 64, 512
    in_channels = M_channels + V_channels

    # Small input: batch=2, spatial 16x16 -> 256 pixels/image (one grid step).
    N, H, W = 2, 16, 16

    key = jax.random.PRNGKey(0)
    kx, k0, k1, k2 = jax.random.split(key, 4)

    x = jax.random.normal(kx, (N, in_channels, H, W), dtype=jnp.float32)

    # Weights in PyTorch Conv2d layout (out_channels, in_channels), 1x1 kernel squeezed.
    w0 = jax.random.normal(k0, (interm, in_channels), dtype=jnp.float32) * 0.05
    w1 = jax.random.normal(k1, (interm, interm), dtype=jnp.float32) * 0.05
    w2 = jax.random.normal(k2, (1, interm), dtype=jnp.float32) * 0.05

    out = local_discriminator(x, w0, w1, w2)
    jax.block_until_ready(out)

    ref = _reference(x, w0, w1, w2)
    assert out.shape == (N, 1, H, W), out.shape
    max_err = float(jnp.max(jnp.abs(out - ref)))
    # bf16 MXU operands (f32 accumulation) -> loosened tolerance vs the f32 reference.
    assert jnp.allclose(out, ref, rtol=5e-2, atol=5e-2), (
        f"mismatch vs reference (max abs err {max_err})")

    print("KERNEL_OK")
</pallas_src>

<mosaic_0001>
module attributes {stable_mosaic.version = 11 : i64} {
  func.func @_local_disc_kernel(%arg0: i32, %arg1: i32, %arg2: memref<2x192x256xf32, #tpu.memory_space<vmem>>, %arg3: memref<512x192xbf16, #tpu.memory_space<vmem>>, %arg4: memref<512x512xbf16, #tpu.memory_space<vmem>>, %arg5: memref<512x1xf32, #tpu.memory_space<vmem>>, %arg6: memref<2x1x256xf32, #tpu.memory_space<vmem>>) attributes {dimension_semantics = [#tpu.dimension_semantics<parallel>, #tpu.dimension_semantics<parallel>], iteration_bounds = array<i64: 1, 1>, scalar_prefetch = 0 : i64, scratch_operands = 0 : i64, tpu.core_type = #tpu.core_type<tc>, window_params = [{transform_indices = @transform_0, window_bounds = array<i64: 2, 192, 256>}, {pipeline_mode = #tpu.pipeline_mode<synchronous>, transform_indices = @transform_1, window_bounds = array<i64: 512, 192>}, {pipeline_mode = #tpu.pipeline_mode<synchronous>, transform_indices = @transform_2, window_bounds = array<i64: 512, 512>}, {pipeline_mode = #tpu.pipeline_mode<synchronous>, transform_indices = @transform_3, window_bounds = array<i64: 512, 1>}, {transform_indices = @transform_4, window_bounds = array<i64: 2, 1, 256>}]} {
    %c0 = arith.constant 0 : index
    %c0_0 = arith.constant 0 : index
    %0 = vector.load %arg3[%c0, %c0_0] : memref<512x192xbf16, #tpu.memory_space<vmem>>, vector<512x192xbf16>
    %c0_1 = arith.constant 0 : index
    %c0_2 = arith.constant 0 : index
    %1 = vector.load %arg4[%c0_1, %c0_2] : memref<512x512xbf16, #tpu.memory_space<vmem>>, vector<512x512xbf16>
    %c0_3 = arith.constant 0 : index
    %c0_4 = arith.constant 0 : index
    %2 = vector.load %arg5[%c0_3, %c0_4] : memref<512x1xf32, #tpu.memory_space<vmem>>, vector<512x1xf32>
    %c0_5 = arith.constant 0 : index
    %c0_6 = arith.constant 0 : index
    %c0_7 = arith.constant 0 : index
    %3 = vector.load %arg2[%c0_5, %c0_6, %c0_7] : memref<2x192x256xf32, #tpu.memory_space<vmem>>, vector<1x192x256xf32>
    %4 = vector.shape_cast %3 : vector<1x192x256xf32> to vector<192x256xf32>
    %5 = arith.truncf %4 : vector<192x256xf32> to vector<192x256xbf16>
    %cst = arith.constant dense<0.000000e+00> : vector<512x256xf32>
    %6 = tpu.matmul %0, %5, %cst {dimension_numbers = #tpu.dot_dimension_numbers<[1], [0], [0], [1], [0, 0, 1, 1], [], []>} : vector<512x192xbf16>, vector<192x256xbf16>, vector<512x256xf32> -> vector<512x256xf32>
    %7 = arith.truncf %6 : vector<512x256xf32> to vector<512x256xbf16>
    %cst_8 = arith.constant 0.000000e+00 : bf16
    %8 = vector.broadcast %cst_8 : bf16 to vector<512x256xbf16>
    %9 = arith.maximumf %7, %8 : vector<512x256xbf16>
    %cst_9 = arith.constant dense<0.000000e+00> : vector<512x256xf32>
    %10 = tpu.matmul %1, %9, %cst_9 {dimension_numbers = #tpu.dot_dimension_numbers<[1], [0], [0], [1], [0, 0, 1, 1], [], []>} : vector<512x512xbf16>, vector<512x256xbf16>, vector<512x256xf32> -> vector<512x256xf32>
    %cst_10 = arith.constant 0.000000e+00 : f32
    %11 = vector.broadcast %cst_10 : f32 to vector<512x256xf32>
    %12 = arith.maximumf %10, %11 : vector<512x256xf32>
    %13 = vector.broadcast %2 : vector<512x1xf32> to vector<512x256xf32>
    %14 = arith.mulf %12, %13 : vector<512x256xf32>
    %cst_11 = arith.constant dense<0.000000e+00> : vector<256xf32>
    %15 = vector.multi_reduction <add>, %14, %cst_11 [0] : vector<512x256xf32> to vector<256xf32>
    %16 = vector.shape_cast %15 : vector<256xf32> to vector<1x256xf32>
    %c0_12 = arith.constant 0 : index
    %c0_13 = arith.constant 0 : index
    %c0_14 = arith.constant 0 : index
    %17 = vector.load %arg6[%c0_12, %c0_13, %c0_14] : memref<2x1x256xf32, #tpu.memory_space<vmem>>, vector<1x1x256xf32>
    %18 = vector.shape_cast %17 : vector<1x1x256xf32> to vector<1x256xf32>
    %19 = vector.shape_cast %16 : vector<1x256xf32> to vector<1x1x256xf32>
    tpu.vector_store %arg6[%c0_12, %c0_13, %c0_14], %19 {strides = array<i32>} : memref<2x1x256xf32, #tpu.memory_space<vmem>>, vector<1x1x256xf32>,
    %c1 = arith.constant 1 : index
    %c0_15 = arith.constant 0 : index
    %c0_16 = arith.constant 0 : index
    %20 = vector.load %arg2[%c1, %c0_15, %c0_16] : memref<2x192x256xf32, #tpu.memory_space<vmem>>, vector<1x192x256xf32>
    %21 = vector.shape_cast %20 : vector<1x192x256xf32> to vector<192x256xf32>
    %22 = arith.truncf %21 : vector<192x256xf32> to vector<192x256xbf16>
    %cst_17 = arith.constant dense<0.000000e+00> : vector<512x256xf32>
    %23 = tpu.matmul %0, %22, %cst_17 {dimension_numbers = #tpu.dot_dimension_numbers<[1], [0], [0], [1], [0, 0, 1, 1], [], []>} : vector<512x192xbf16>, vector<192x256xbf16>, vector<512x256xf32> -> vector<512x256xf32>
    %24 = arith.truncf %23 : vector<512x256xf32> to vector<512x256xbf16>
    %cst_18 = arith.constant 0.000000e+00 : bf16
    %25 = vector.broadcast %cst_18 : bf16 to vector<512x256xbf16>
    %26 = arith.maximumf %24, %25 : vector<512x256xbf16>
    %cst_19 = arith.constant dense<0.000000e+00> : vector<512x256xf32>
    %27 = tpu.matmul %1, %26, %cst_19 {dimension_numbers = #tpu.dot_dimension_numbers<[1], [0], [0], [1], [0, 0, 1, 1], [], []>} : vector<512x512xbf16>, vector<512x256xbf16>, vector<512x256xf32> -> vector<512x256xf32>
    %cst_20 = arith.constant 0.000000e+00 : f32
    %28 = vector.broadcast %cst_20 : f32 to vector<512x256xf32>
    %29 = arith.maximumf %27, %28 : vector<512x256xf32>
    %30 = vector.broadcast %2 : vector<512x1xf32> to vector<512x256xf32>
    %31 = arith.mulf %29, %30 : vector<512x256xf32>
    %cst_21 = arith.constant dense<0.000000e+00> : vector<256xf32>
    %32 = vector.multi_reduction <add>, %31, %cst_21 [0] : vector<512x256xf32> to vector<256xf32>
    %33 = vector.shape_cast %32 : vector<256xf32> to vector<1x256xf32>
    %c1_22 = arith.constant 1 : index
    %c0_23 = arith.constant 0 : index
    %c0_24 = arith.constant 0 : index
    %34 = vector.load %arg6[%c1_22, %c0_23, %c0_24] : memref<2x1x256xf32, #tpu.memory_space<vmem>>, vector<1x1x256xf32>
    %35 = vector.shape_cast %34 : vector<1x1x256xf32> to vector<1x256xf32>
    %36 = vector.shape_cast %33 : vector<1x256xf32> to vector<1x1x256xf32>
    tpu.vector_store %arg6[%c1_22, %c0_23, %c0_24], %36 {strides = array<i32>} : memref<2x1x256xf32, #tpu.memory_space<vmem>>, vector<1x1x256xf32>,
    return
  }
  func.func @transform_0(%arg0: i32, %arg1: i32) -> (i32, i32, i32) {
    %c0_i32 = arith.constant 0 : i32
    %c0_i32_0 = arith.constant 0 : i32
    return %arg0, %c0_i32, %arg1 : i32, i32, i32
  }
  func.func @transform_1(%arg0: i32, %arg1: i32) -> (i32, i32) {
    %c0_i32 = arith.constant 0 : i32
    %c0_i32_0 = arith.constant 0 : i32
    %c0_i32_1 = arith.constant 0 : i32
    return %c0_i32, %c0_i32_0 : i32, i32
  }
  func.func @transform_2(%arg0: i32, %arg1: i32) -> (i32, i32) {
    %c0_i32 = arith.constant 0 : i32
    %c0_i32_0 = arith.constant 0 : i32
    %c0_i32_1 = arith.constant 0 : i32
    return %c0_i32, %c0_i32_0 : i32, i32
  }
  func.func @transform_3(%arg0: i32, %arg1: i32) -> (i32, i32) {
    %c0_i32 = arith.constant 0 : i32
    %c0_i32_0 = arith.constant 0 : i32
    %c0_i32_1 = arith.constant 0 : i32
    return %c0_i32, %c0_i32_0 : i32, i32
  }
  func.func @transform_4(%arg0: i32, %arg1: i32) -> (i32, i32, i32) {
    %c0_i32 = arith.constant 0 : i32
    %c0_i32_0 = arith.constant 0 : i32
    return %arg0, %c0_i32, %arg1 : i32, i32, i32
  }
}

</mosaic_0001>

<bundles_post_ra>
// kernel: local_discriminator.1
= control target key start
LH: loop header
LB: loop body
LE: loop exit
PB: predicated region body
PF: predicated region fallthrough
CT: control target
= control target key end

     0   :  { %vm634_vm0 = vcmask 523264   ;;  %s9890_s0 = inlined_call_operand.vmem [shape: f32[2,192,256], index: 0, kind: input, shape index: {}]   ;;  %s9891_s1 = inlined_call_operand.vmem [shape: bf16[512,192], index: 1, kind: input, shape index: {}]   ;;  %s9892_s2 = inlined_call_operand.vmem [shape: bf16[512,512], index: 2, kind: input, shape index: {}]   ;;  %s9893_s3 = inlined_call_operand.vmem [shape: f32[512,1], index: 3, kind: input, shape index: {}]   ;;  %s9894_s4 = inlined_call_operand.vmem [shape: f32[2,1,256], index: 4, kind: output, shape index: {}]  }
   0x1   :  { %v303_v0 = vld [vmem:[%s9890_s0 + $0xe8] sm:$0xff]  ;;  %v305_v1 = vld [vmem:[%s9890_s0 + $0xf8] sm:$0xff]  ;;  %v302_v2 = vld [vmem:[%s9890_s0 + $0xe0] sm:$0xff] }
   0x2   :  { %v337_v3 = vpack.c.bf16 %v305_v1, %v303_v0  ;;  %v304_v4 = vld [vmem:[%s9890_s0 + $0xf0] sm:$0xff]  ;;  %v299_v5 = vld [vmem:[%s9890_s0 + $0xc8] sm:$0xff]  ;;  %v301_v6 = vld [vmem:[%s9890_s0 + $0xd8] sm:$0xff] }
   0x3   :  { %v336_v7 = vpack.c.bf16 %v304_v4, %v302_v2  ;;  %v335_v8 = vpack.c.bf16 %v301_v6, %v299_v5  ;;  %v298_v9 = vld [vmem:[%s9890_s0 + $0xc0] sm:$0xff]  ;;  %v300_v10 = vld [vmem:[%s9890_s0 + $0xd0] sm:$0xff]  ;;  %v295_v11 = vld [vmem:[%s9890_s0 + $0xa8] sm:$0xff] }
   0x4   :  { %731 = vmatprep.subr.bf16.mxu0 %v337_v3  ;;  %v297_v12 = vld [vmem:[%s9890_s0 + $0xb8] sm:$0xff]  ;;  %v334_v13 = vpack.c.bf16 %v300_v10, %v298_v9  ;;  %v294_v15 = vld [vmem:[%s9890_s0 + $0xa0] sm:$0xff]  ;;  %v296_v16 = vld [vmem:[%s9890_s0 + $0xb0] sm:$0xff] }
   0x5   :  { %732 = vmatpush1.bf16.msra.mxu0 %v336_v7  ;;  %v333_v14 = vpack.c.bf16 %v297_v12, %v295_v11  ;;  %v291_v17 = vld [vmem:[%s9890_s0 + $0x88] sm:$0xff]  ;;  %v293_v18 = vld [vmem:[%s9890_s0 + $0x98] sm:$0xff]  ;;  %v332_v19 = vpack.c.bf16 %v296_v16, %v294_v15  ;;  %v290_v21 = vld [vmem:[%s9890_s0 + $0x80] sm:$0xff] }
   0x6   :  { %733 = vmatprep.subr.bf16.mxu0 %v335_v8  ;;  %v331_v20 = vpack.c.bf16 %v293_v18, %v291_v17  ;;  %v292_v22 = vld [vmem:[%s9890_s0 + $0x90] sm:$0xff]  ;;  %v287_v23 = vld [vmem:[%s9890_s0 + $0x68] sm:$0xff]  ;;  %v289_v24 = vld [vmem:[%s9890_s0 + $0x78] sm:$0xff] }
   0x7   :  { %v330_v25 = vpack.c.bf16 %v292_v22, %v290_v21  ;;  %v329_v26 = vpack.c.bf16 %v289_v24, %v287_v23  ;;  %v286_v27 = vld [vmem:[%s9890_s0 + $0x60] sm:$0xff]  ;;  %v288_v28 = vld [vmem:[%s9890_s0 + $0x70] sm:$0xff]  ;;  %v283_v29 = vld [vmem:[%s9890_s0 + $0x48] sm:$0xff] }
   0x8   :  { %v285_v30 = vld [vmem:[%s9890_s0 + $0x58] sm:$0xff]  ;;  %v282_v31 = vld [vmem:[%s9890_s0 + $0x40] sm:$0xff]  ;;  %v328_v32 = vpack.c.bf16 %v288_v28, %v286_v27  ;;  %v284_v33 = vld [vmem:[%s9890_s0 + $0x50] sm:$0xff] }
   0x9   :  { %734 = vmatpush1.bf16.msra.mxu0 %v334_v13  ;;  %v327_v34 = vpack.c.bf16 %v285_v30, %v283_v29  ;;  %v5316_v35 = vld [vmem:[%s9891_s1 + $0x4] ss:$8 sps:$4 sm:$0xff]   ;;  %v281_v37 = vld [vmem:[%s9890_s0 + $0x38] sm:$0xff]  ;;  %v326_v38 = vpack.c.bf16 %v284_v33, %v282_v31  ;;  %v280_v41 = vld [vmem:[%s9890_s0 + $0x30] sm:$0xff]  ;;  %v9895_v29 = vmov 0  }
   0xa   :  { %735 = vmatprep.subr.bf16.mxu0 %v333_v14  ;;  %v279_v36 = vld [vmem:[%s9890_s0 + $0x28] sm:$0xff]  ;;  %5037 = vmatprep.mubr.msk.bf16.mxu0 %vm634_vm0, %v5316_v35  ;;  %v278_v39 = vld [vmem:[%s9890_s0 + $0x20] sm:$0xff]  ;;  %v277_v43 = vld [vmem:[%s9890_s0 + $0x18] sm:$0xff] }
   0xb   :  { %v325_v40 = vpack.c.bf16 %v281_v37, %v279_v36  ;;  %v275_v42 = vld [vmem:[%s9890_s0 + $0x8] sm:$0xff]  ;;  %v324_v44 = vpack.c.bf16 %v280_v41, %v278_v39  ;;  %v274_v45 = vld [vmem:[%s9890_s0] sm:$0xff]  ;;  %v276_v47 = vld [vmem:[%s9890_s0 + $0x10] sm:$0xff]  ;;  %5312 = vset.pattern.permute.xlu0 %v9895_v29  ;;  %5313 = vset.pattern.permute.xlu1 %v9895_v29 }
   0xc   :  { %v323_v46 = vpack.c.bf16 %v277_v43, %v275_v42  ;;  %v319_v48 = vld [vmem:[%s9890_s0 + $0x168] sm:$0xff]  ;;  %v321_v49 = vld [vmem:[%s9890_s0 + $0x178] sm:$0xff]  ;;  %v322_v50 = vpack.c.bf16 %v276_v47, %v274_v45  ;;  %v318_v51 = vld [vmem:[%s9890_s0 + $0x160] sm:$0xff] }
   0xd   :  { %736 = vmatpush1.bf16.msra.mxu0 %v332_v19  ;;  %v345_v52 = vpack.c.bf16 %v321_v49, %v319_v48  ;;  %v320_v53 = vld [vmem:[%s9890_s0 + $0x170] sm:$0xff]  ;;  %v315_v54 = vld [vmem:[%s9890_s0 + $0x148] sm:$0xff]  ;;  %v317_v55 = vld [vmem:[%s9890_s0 + $0x158] sm:$0xff] }
   0xe   :  { %737 = vmatprep.subr.bf16.mxu0 %v331_v20  ;;  %v344_v56 = vpack.c.bf16 %v320_v53, %v318_v51  ;;  %v314_v57 = vld [vmem:[%s9890_s0 + $0x140] sm:$0xff]  ;;  %v343_v58 = vpack.c.bf16 %v317_v55, %v315_v54  ;;  %v316_v59 = vld [vmem:[%s9890_s0 + $0x150] sm:$0xff]  ;;  %v311_v60 = vld [vmem:[%s9890_s0 + $0x128] sm:$0xff] }
   0xf   :  { %v313_v61 = vld [vmem:[%s9890_s0 + $0x138] sm:$0xff]  ;;  %v310_v62 = vld [vmem:[%s9890_s0 + $0x120] sm:$0xff]  ;;  %v312_v63 = vld [vmem:[%s9890_s0 + $0x130] sm:$0xff]  ;;  %v342_v0 = vpack.c.bf16 %v316_v59, %v314_v57 }
  0x10   :  { %v307_v1 = vld [vmem:[%s9890_s0 + $0x108] sm:$0xff]  ;;  %v341_v2 = vpack.c.bf16 %v313_v61, %v311_v60  ;;  %v309_v3 = vld [vmem:[%s9890_s0 + $0x118] sm:$0xff]  ;;  %v306_v4 = vld [vmem:[%s9890_s0 + $0x100] sm:$0xff]  ;;  %v340_v6 = vpack.c.bf16 %v312_v63, %v310_v62 }
  0x11   :  { %738 = vmatpush1.bf16.msra.mxu0 %v330_v25  ;;  %v308_v5 = vld [vmem:[%s9890_s0 + $0x110] sm:$0xff]  ;;  %v339_v7 = vpack.c.bf16 %v309_v3, %v307_v1  ;;  %v5314_v9 = vld [vmem:[%s9891_s1] ss:$8 sps:$4 sm:$0xff]   ;;  %v5320_v12 = vld [vmem:[%s9891_s1 + $0x24] ss:$8 sps:$4 sm:$0xff]  }
  0x12   :  { %739 = vmatprep.subr.bf16.mxu0 %v329_v26  ;;  %v338_v8 = vpack.c.bf16 %v308_v5, %v306_v4  ;;  %v5317_v10 = vld [vmem:[%s9891_s1 + $0x14] ss:$8 sps:$4 sm:$0xff]   ;;  %v5319_v11 = vld [vmem:[%s9891_s1 + $0x10] ss:$8 sps:$4 sm:$0xff]   ;;  %v5322_v13 = vld [vmem:[%s9891_s1 + $0x20] ss:$8 sps:$4 sm:$0xff]  }
  0x13   :  { %v5323_v14 = vld [vmem:[%s9891_s1 + $0x34] ss:$8 sps:$4 sm:$0xff]   ;;  %v5325_v15 = vld [vmem:[%s9891_s1 + $0x30] ss:$8 sps:$4 sm:$0xff]   ;;  %v5326_v16 = vld [vmem:[%s9891_s1 + $0x44] ss:$8 sps:$4 sm:$0xff]  }
  0x14   :  { %v5328_v17 = vld [vmem:[%s9891_s1 + $0x40] ss:$8 sps:$4 sm:$0xff]   ;;  %v5329_v18 = vld [vmem:[%s9891_s1 + $0x54] ss:$8 sps:$4 sm:$0xff]   ;;  %v5331_v19 = vld [vmem:[%s9891_s1 + $0x50] ss:$8 sps:$4 sm:$0xff]  }
  0x15   :  { %740 = vmatpush1.bf16.msra.mxu0 %v328_v32  ;;  %v5332_v20 = vld [vmem:[%s9891_s1 + $0x64] ss:$8 sps:$4 sm:$0xff]   ;;  %v5334_v21 = vld [vmem:[%s9891_s1 + $0x60] ss:$8 sps:$4 sm:$0xff]   ;;  %v5335_v22 = vld [vmem:[%s9891_s1 + $0x74] ss:$8 sps:$4 sm:$0xff]  }
  0x16   :  { %741 = vmatprep.subr.bf16.mxu0 %v327_v34  ;;  %v5337_v23 = vld [vmem:[%s9891_s1 + $0x70] ss:$8 sps:$4 sm:$0xff]   ;;  %v5338_v24 = vld [vmem:[%s9891_s1 + $0x84] ss:$8 sps:$4 sm:$0xff]   ;;  %v5340_v25 = vld [vmem:[%s9891_s1 + $0x80] ss:$8 sps:$4 sm:$0xff]  }
  0x17   :  { %v5341_v26 = vld [vmem:[%s9891_s1 + $0x94] ss:$8 sps:$4 sm:$0xff]   ;;  %v5343_v27 = vld [vmem:[%s9891_s1 + $0x90] ss:$8 sps:$4 sm:$0xff]   ;;  %v5344_v28 = vld [vmem:[%s9891_s1 + $0xa4] ss:$8 sps:$4 sm:$0xff]  }
  0x18   :  { %v5346_v30 = vld [vmem:[%s9891_s1 + $0xa0] ss:$8 sps:$4 sm:$0xff]   ;;  %v5347_v31 = vld [vmem:[%s9891_s1 + $0xb4] ss:$8 sps:$4 sm:$0xff]   ;;  %v5349_v32 = vld [vmem:[%s9891_s1 + $0xb0] ss:$8 sps:$4 sm:$0xff]  }
  0x19   :  { %742 = vmatpush1.bf16.msra.mxu0 %v326_v38  ;;  %v5350_v33 = vld [vmem:[%s9891_s1 + $0xc4] ss:$8 sps:$4 sm:$0xff]   ;;  %v5352_v34 = vld [vmem:[%s9891_s1 + $0xc0] ss:$8 sps:$4 sm:$0xff]   ;;  %v5353_v35 = vld [vmem:[%s9891_s1 + $0xd4] ss:$8 sps:$4 sm:$0xff]  }
  0x1a   :  { %743 = vmatprep.subr.bf16.mxu0 %v325_v40  ;;  %v5355_v36 = vld [vmem:[%s9891_s1 + $0xd0] ss:$8 sps:$4 sm:$0xff]   ;;  %v5356_v37 = vld [vmem:[%s9891_s1 + $0xe4] ss:$8 sps:$4 sm:$0xff]   ;;  %v5358_v38 = vld [vmem:[%s9891_s1 + $0xe0] ss:$8 sps:$4 sm:$0xff]  }
  0x1b   :  { %v5359_v39 = vld [vmem:[%s9891_s1 + $0xf4] ss:$8 sps:$4 sm:$0xff]   ;;  %v5361_v40 = vld [vmem:[%s9891_s1 + $0xf0] ss:$8 sps:$4 sm:$0xff]   ;;  %v5362_v41 = vld [vmem:[%s9891_s1 + $0x104] ss:$8 sps:$4 sm:$0xff]  }
  0x1c   :  { %v5364_v42 = vld [vmem:[%s9891_s1 + $0x100] ss:$8 sps:$4 sm:$0xff]   ;;  %v5365_v43 = vld [vmem:[%s9891_s1 + $0x114] ss:$8 sps:$4 sm:$0xff]   ;;  %v5368_v45 = vld [vmem:[%s9891_s1 + $0x124] ss:$8 sps:$4 sm:$0xff]  }
  0x1d   :  { %744 = vmatpush1.bf16.msra.mxu0 %v324_v44  ;;  %v5367_v44 = vld [vmem:[%s9891_s1 + $0x110] ss:$8 sps:$4 sm:$0xff]   ;;  %v5371_v47 = vld [vmem:[%s9891_s1 + $0x134] ss:$8 sps:$4 sm:$0xff]   ;;  %v5374_v49 = vld [vmem:[%s9891_s1 + $0x144] ss:$8 sps:$4 sm:$0xff]  }
  0x1e   :  { %745 = vmatprep.subr.bf16.mxu0 %v323_v46  ;;  %v5370_v46 = vld [vmem:[%s9891_s1 + $0x120] ss:$8 sps:$4 sm:$0xff]   ;;  %v5373_v48 = vld [vmem:[%s9891_s1 + $0x130] ss:$8 sps:$4 sm:$0xff]   ;;  %v5377_v51 = vld [vmem:[%s9891_s1 + $0x154] ss:$8 sps:$4 sm:$0xff]  }
  0x1f   :  { %v5380_v53 = vld [vmem:[%s9891_s1 + $0x164] ss:$8 sps:$4 sm:$0xff]   ;;  %v5382_v54 = vld [vmem:[%s9891_s1 + $0x160] ss:$8 sps:$4 sm:$0xff]   ;;  %v5383_v55 = vld [vmem:[%s9891_s1 + $0x174] ss:$8 sps:$4 sm:$0xff]  }
  0x20   :  { %v5386_v57 = vld [vmem:[%s9891_s1 + $0x184] ss:$8 sps:$4 sm:$0xff]   ;;  %v5389_v59 = vld [vmem:[%s9891_s1 + $0x194] ss:$8 sps:$4 sm:$0xff]   ;;  %v5391_v63 = vld [vmem:[%s9891_s1 + $0x190] ss:$8 sps:$4 sm:$0xff]  }
  0x21   :  { %746 = vmatpush1.bf16.msra.mxu0 %v322_v50  ;;  %v5376_v50 = vld [vmem:[%s9891_s1 + $0x140] ss:$8 sps:$4 sm:$0xff]   ;;  %v5392_v1 = vld [vmem:[%s9891_s1 + $0x1a4] ss:$8 sps:$4 sm:$0xff]  }
  0x22   :  { %755 = vmatprep.subr.bf16.mxu0 %v345_v52  ;;  %v5379_v52 = vld [vmem:[%s9891_s1 + $0x150] ss:$8 sps:$4 sm:$0xff]  }
  0x25   :  { %756 = vmatpush2.bf16.msra.mxu0 %v344_v56  ;;  %v5385_v56 = vld [vmem:[%s9891_s1 + $0x170] ss:$8 sps:$4 sm:$0xff]  }
  0x26   :  { %757 = vmatprep.subr.bf16.mxu0 %v343_v58  ;;  %v5388_v58 = vld [vmem:[%s9891_s1 + $0x180] ss:$8 sps:$4 sm:$0xff]  }
  0x29   :  { %758 = vmatpush2.bf16.msra.mxu0 %v342_v0 }
  0x2a   :  { %759 = vmatprep.subr.bf16.mxu0 %v341_v2 }
  0x2d   :  { %760 = vmatpush2.bf16.msra.mxu0 %v340_v6 }
  0x2e   :  { %761 = vmatprep.subr.bf16.mxu0 %v339_v7  ;;  %v5394_v7 = vld [vmem:[%s9891_s1 + $0x1a0] ss:$8 sps:$4 sm:$0xff]  }
  0x31   :  { %762 = vmatpush2.bf16.msra.mxu0 %v338_v8 }
  0x34   :  { %764 = vmatmul.mubr.bf16.vlgmr.msra.gmra.mxu0 %v5314_v9  ;;  %v5395_v9 = vld [vmem:[%s9891_s1 + $0x1b4] ss:$8 sps:$4 sm:$0xff]  }
  0x35   :  { %5038 = vmatprep.mubr.msk.bf16.mxu0 %vm634_vm0, %v5317_v10 }
  0x3c   :  { %774 = vmatmul.mubr.bf16.gmra.mxu0 %v5319_v11 }
  0x3d   :  { %5039 = vmatprep.mubr.msk.bf16.mxu0 %vm634_vm0, %v5320_v12 }
  0x44   :  { %784 = vmatmul.mubr.bf16.gmra.mxu0 %v5322_v13 }
  0x45   :  { %5040 = vmatprep.mubr.msk.bf16.mxu0 %vm634_vm0, %v5323_v14 }
  0x4c   :  { %794 = vmatmul.mubr.bf16.gmra.mxu0 %v5325_v15  ;;  %v5397_v15 = vld [vmem:[%s9891_s1 + $0x1b0] ss:$8 sps:$4 sm:$0xff]  }
  0x4d   :  { %5041 = vmatprep.mubr.msk.bf16.mxu0 %vm634_vm0, %v5326_v16  ;;  %v5398_v16 = vld [vmem:[%s9891_s1 + $0x1c4] ss:$8 sps:$4 sm:$0xff]  }
  0x54   :  { %804 = vmatmul.mubr.bf16.gmra.mxu0 %v5328_v17 }
  0x55   :  { %5042 = vmatprep.mubr.msk.bf16.mxu0 %vm634_vm0, %v5329_v18 }
  0x5c   :  { %814 = vmatmul.mubr.bf16.gmra.mxu0 %v5331_v19 }
  0x5d   :  { %5043 = vmatprep.mubr.msk.bf16.mxu0 %vm634_vm0, %v5332_v20 }
  0x64   :  { %824 = vmatmul.mubr.bf16.gmra.mxu0 %v5334_v21  ;;  %v5400_v21 = vld [vmem:[%s9891_s1 + $0x1c0] ss:$8 sps:$4 sm:$0xff]  }
  0x65   :  { %5044 = vmatprep.mubr.msk.bf16.mxu0 %vm634_vm0, %v5335_v22  ;;  %v5401_v22 = vld [vmem:[%s9891_s1 + $0x1d4] ss:$8 sps:$4 sm:$0xff]  }
  0x6c   :  { %834 = vmatmul.mubr.bf16.gmra.mxu0 %v5337_v23 }
  0x6d   :  { %5045 = vmatprep.mubr.msk.bf16.mxu0 %vm634_vm0, %v5338_v24 }
  0x74   :  { %844 = vmatmul.mubr.bf16.gmra.mxu0 %v5340_v25  ;;  %v5412_v25 = vld [vmem:[%s9892_s2 + $0x4] ss:$16 sps:$4 sm:$0xff]  }
  0x75   :  { %5046 = vmatprep.mubr.msk.bf16.mxu0 %vm634_vm0, %v5341_v26  ;;  %1884 = vmatprep.mubr.bf16.mxu1 %v5412_v25 }
  0x7c   :  { %854 = vmatmul.mubr.bf16.gmra.mxu0 %v5343_v27  ;;  %v5403_v27 = vld [vmem:[%s9891_s1 + $0x1d0] ss:$8 sps:$4 sm:$0xff]  }
  0x7d   :  { %5047 = vmatprep.mubr.msk.bf16.mxu0 %vm634_vm0, %v5344_v28  ;;  %v5404_v28 = vld [vmem:[%s9891_s1 + $0x1e4] ss:$8 sps:$4 sm:$0xff]  }
  0x84   :  { %864 = vmatmul.mubr.bf16.gmra.mxu0 %v5346_v30 }
  0x85   :  { %5048 = vmatprep.mubr.msk.bf16.mxu0 %vm634_vm0, %v5347_v31 }
  0x8c   :  { %874 = vmatmul.mubr.bf16.gmra.mxu0 %v5349_v32 }
  0x8d   :  { %5049 = vmatprep.mubr.msk.bf16.mxu0 %vm634_vm0, %v5350_v33 }
  0x94   :  { %884 = vmatmul.mubr.bf16.gmra.mxu0 %v5352_v34  ;;  %v5406_v34 = vld [vmem:[%s9891_s1 + $0x1e0] ss:$8 sps:$4 sm:$0xff]  }
  0x95   :  { %5050 = vmatprep.mubr.msk.bf16.mxu0 %vm634_vm0, %v5353_v35  ;;  %v5407_v35 = vld [vmem:[%s9891_s1 + $0x1f4] ss:$8 sps:$4 sm:$0xff]  }
  0x9c   :  { %894 = vmatmul.mubr.bf16.gmra.mxu0 %v5355_v36 }
  0x9d   :  { %5051 = vmatprep.mubr.msk.bf16.mxu0 %vm634_vm0, %v5356_v37 }
  0xa4   :  { %904 = vmatmul.mubr.bf16.gmra.mxu0 %v5358_v38 }
  0xa5   :  { %5052 = vmatprep.mubr.msk.bf16.mxu0 %vm634_vm0, %v5359_v39 }
  0xac   :  { %914 = vmatmul.mubr.bf16.gmra.mxu0 %v5361_v40  ;;  %v5409_v40 = vld [vmem:[%s9891_s1 + $0x1f0] ss:$8 sps:$4 sm:$0xff]  }
  0xad   :  { %5053 = vmatprep.mubr.msk.bf16.mxu0 %vm634_vm0, %v5362_v41 }
  0xb4   :  { %924 = vmatmul.mubr.bf16.gmra.mxu0 %v5364_v42 }
  0xb5   :  { %5054 = vmatprep.mubr.msk.bf16.mxu0 %vm634_vm0, %v5365_v43 }
  0xbc   :  { %934 = vmatmul.mubr.bf16.gmra.mxu0 %v5367_v44 }
  0xbd   :  { %5055 = vmatprep.mubr.msk.bf16.mxu0 %vm634_vm0, %v5368_v45 }
  0xc4   :  { %944 = vmatmul.mubr.bf16.gmra.mxu0 %v5370_v46 }
  0xc5   :  { %5056 = vmatprep.mubr.msk.bf16.mxu0 %vm634_vm0, %v5371_v47 }
  0xcc   :  { %954 = vmatmul.mubr.bf16.gmra.mxu0 %v5373_v48 }
  0xcd   :  { %5057 = vmatprep.mubr.msk.bf16.mxu0 %vm634_vm0, %v5374_v49 }
  0xd4   :  { %964 = vmatmul.mubr.bf16.gmra.mxu0 %v5376_v50 }
  0xd5   :  { %5058 = vmatprep.mubr.msk.bf16.mxu0 %vm634_vm0, %v5377_v51 }
  0xdc   :  { %974 = vmatmul.mubr.bf16.gmra.mxu0 %v5379_v52 }
  0xdd   :  { %5059 = vmatprep.mubr.msk.bf16.mxu0 %vm634_vm0, %v5380_v53 }
  0xe4   :  { %984 = vmatmul.mubr.bf16.gmra.mxu0 %v5382_v54 }
  0xe5   :  { %5060 = vmatprep.mubr.msk.bf16.mxu0 %vm634_vm0, %v5383_v55 }
  0xec   :  { %994 = vmatmul.mubr.bf16.gmra.mxu0 %v5385_v56 }
  0xed   :  { %5061 = vmatprep.mubr.msk.bf16.mxu0 %vm634_vm0, %v5386_v57 }
  0xf4   :  { %v6145_v60 = vpop.f32.mrf.mxu0  ;;  %1004 = vmatmul.mubr.bf16.gmra.mxu0 %v5388_v58 }
  0xf5   :  { %5062 = vmatprep.mubr.msk.bf16.mxu0 %vm634_vm0, %v5389_v59 }
  0xf6   :  { %v6148_v61 = vpop.f32.mrf.mxu0 }
  0xf8   :  { %v6150_v62 = vpop.f32.mrf.mxu0 }
  0xf9   :  { %v1084_v0 = vpack.c.bf16 %v6150_v62, %v6145_v60 }
  0xfa   :  { %v6160_v2 = vpop.f32.mrf.mxu0 }
  0xfb   :  { %v1085_v3 = vpack.c.bf16 %v6160_v2, %v6148_v61 }
  0xfc   :  { %v6164_v4 = vpop.f32.mrf.mxu0  ;;  %1014 = vmatmul.mubr.bf16.gmra.mxu0 %v5391_v63 }
  0xfd   :  { %5063 = vmatprep.mubr.msk.bf16.mxu0 %vm634_vm0, %v5392_v1 }
  0xfe   :  { %v6167_v5 = vpop.f32.mrf.mxu0 }
 0x100   :  { %v6169_v6 = vpop.f32.mrf.mxu0 }
 0x101   :  { %v1086_v8 = vpack.c.bf16 %v6169_v6, %v6164_v4 }
 0x102   :  { %v6179_v10 = vpop.f32.mrf.mxu0 }
 0x103   :  { %v1087_v11 = vpack.c.bf16 %v6179_v10, %v6167_v5  ;;  %v1148_v5 = vmax.bf16 %v9895_v29, %v1084_v0 }
 0x104   :  { %v6183_v12 = vpop.f32.mrf.mxu0  ;;  %1024 = vmatmul.mubr.bf16.gmra.mxu0 %v5394_v7 }
 0x105   :  { %5064 = vmatprep.mubr.msk.bf16.mxu0 %vm634_vm0, %v5395_v9 }
 0x106   :  { %v6186_v13 = vpop.f32.mrf.mxu0 }
 0x108   :  { %v6188_v14 = vpop.f32.mrf.mxu0 }
 0x10a   :  { %v6196_v17 = vpop.f32.mrf.mxu0 }
 0x10c   :  { %v6198_v18 = vpop.f32.mrf.mxu0  ;;  %1034 = vmatmul.mubr.bf16.gmra.mxu0 %v5397_v15 }
 0x10d   :  { %5065 = vmatprep.mubr.msk.bf16.mxu0 %vm634_vm0, %v5398_v16 }
 0x10e   :  { %v6201_v19 = vpop.f32.mrf.mxu0 }
 0x110   :  { %v6203_v20 = vpop.f32.mrf.mxu0 }
 0x112   :  { %v6211_v23 = vpop.f32.mrf.mxu0 }
 0x113   :  { %v1091_v25 = vpack.c.bf16 %v6211_v23, %v6201_v19 }
 0x114   :  { %v6213_v24 = vpop.f32.mrf.mxu0  ;;  %1044 = vmatmul.mubr.bf16.gmra.mxu0 %v5400_v21 }
 0x115   :  { %5066 = vmatprep.mubr.msk.bf16.mxu0 %vm634_vm0, %v5401_v22  ;;  %v1155_v19 = vmax.bf16 %v9895_v29, %v1091_v25 }
 0x116   :  { %v807_v26 = vpop.f32.mrf.mxu0 }
 0x118   :  { %v809_v30 = vpop.f32.mrf.mxu0 }
 0x119   :  { %v1092_v16 = vpack.c.bf16 %v809_v30, %v6213_v24 }
 0x11a   :  { %v811_v31 = vpop.f32.mrf.mxu0 }
 0x11b   :  { %v1093_v7 = vpack.c.bf16 %v811_v31, %v807_v26  ;;  %v1090_v31 = vpack.c.bf16 %v6203_v20, %v6198_v18  ;;  %v1156_v24 = vmax.bf16 %v9895_v29, %v1092_v16 }
 0x11c   :  { %v815_v32 = vpop.f32.mrf.mxu0  ;;  %1054 = vmatmul.mubr.bf16.gmra.mxu0 %v5403_v27 }
 0x11d   :  { %5067 = vmatprep.mubr.msk.bf16.mxu0 %vm634_vm0, %v5404_v28  ;;  %v1157_v27 = vmax.bf16 %v9895_v29, %v1093_v7 }
 0x11e   :  { %v817_v33 = vpop.f32.mrf.mxu0 }
 0x120   :  { %v819_v36 = vpop.f32.mrf.mxu0 }
 0x121   :  { %v1094_v59 = vpack.c.bf16 %v819_v36, %v815_v32  ;;  %v1089_v32 = vpack.c.bf16 %v6196_v17, %v6186_v13  ;;  %v1151_v36 = vmax.bf16 %v9895_v29, %v1087_v11 }
 0x122   :  { %v821_v37 = vpop.f32.mrf.mxu0 }
 0x123   :  { %v1095_v55 = vpack.c.bf16 %v821_v37, %v817_v33  ;;  %v1158_v21 = vmax.bf16 %v9895_v29, %v1094_v59  ;;  %v1088_v33 = vpack.c.bf16 %v6188_v14, %v6183_v12  ;;  %v1153_v18 = vmax.bf16 %v9895_v29, %v1089_v32 }
 0x124   :  { %v825_v38 = vpop.f32.mrf.mxu0  ;;  %1064 = vmatmul.mubr.bf16.gmra.mxu0 %v5406_v34  ;;  %v1154_v34 = vmax.bf16 %v9895_v29, %v1090_v31  ;;  %v1150_v14 = vmax.bf16 %v9895_v29, %v1086_v8 }
 0x125   :  { %5068 = vmatprep.mubr.msk.bf16.mxu0 %vm634_vm0, %v5407_v35  ;;  %v1159_v9 = vmax.bf16 %v9895_v29, %v1095_v55  ;;  %v1152_v13 = vmax.bf16 %v9895_v29, %v1088_v33 }
 0x126   :  { %v827_v39 = vpop.f32.mrf.mxu0 }
 0x128   :  { %v829_v41 = vpop.f32.mrf.mxu0 }
 0x129   :  { %v1096_v52 = vpack.c.bf16 %v829_v41, %v825_v38  ;;  %v1149_v38 = vmax.bf16 %v9895_v29, %v1085_v3 }
 0x12a   :  { %v831_v42 = vpop.f32.mrf.mxu0 }
 0x12b   :  { %v1097_v48 = vpack.c.bf16 %v831_v42, %v827_v39  ;;  %v1160_v63 = vmax.bf16 %v9895_v29, %v1096_v52 }
 0x12c   :  { %v835_v43 = vpop.f32.mrf.mxu0  ;;  %1074 = vmatmul.mubr.bf16.gmra.mxu0 %v5409_v40 }
 0x12d   :  { %v1161_v56 = vmax.bf16 %v9895_v29, %v1097_v48 }
 0x12e   :  { %v837_v44 = vpop.f32.mrf.mxu0 }
 0x130   :  { %v839_v45 = vpop.f32.mrf.mxu0 }
 0x131   :  { %v1098_v46 = vpack.c.bf16 %v839_v45, %v835_v43 }
 0x132   :  { %v841_v47 = vpop.f32.mrf.mxu0 }
 0x133   :  { %v1099_v49 = vpack.c.bf16 %v841_v47, %v837_v44  ;;  %v1162_v54 = vmax.bf16 %v9895_v29, %v1098_v46 }
 0x134   :  { %v6236_v50 = vpop.f32.mrf.mxu0 }
 0x135   :  { %v1163_v51 = vmax.bf16 %v9895_v29, %v1099_v49 }
 0x136   :  { %v6239_v53 = vpop.f32.mrf.mxu0 }
 0x137   :  { %1852 = vmatprep.subr.bf16.mxu1 %v1163_v51 }
 0x138   :  { %v6243_v57 = vpop.f32.mrf.mxu0  ;;  %1853 = vmatpush1.bf16.msra.mxu1 %v1162_v54 }
 0x139   :  { %v1100_v58 = vpack.c.bf16 %v6243_v57, %v6236_v50  ;;  %1854 = vmatprep.subr.bf16.mxu1 %v1161_v56 }
 0x13a   :  { %v6248_v1 = vpop.f32.mrf.mxu0 }
 0x13c   :  { %v6251_v15 = vpop.f32.mrf.mxu0  ;;  %1855 = vmatpush1.bf16.msra.mxu1 %v1160_v63 }
 0x13d   :  { %1856 = vmatprep.subr.bf16.mxu1 %v1159_v9 }
 0x13e   :  { %v6255_v22 = vpop.f32.mrf.mxu0 }
 0x140   :  { %v6260_v28 = vpop.f32.mrf.mxu0  ;;  %1857 = vmatpush1.bf16.msra.mxu1 %v1158_v21 }
 0x141   :  { %v1102_v26 = vpack.c.bf16 %v6260_v28, %v6251_v15  ;;  %1858 = vmatprep.subr.bf16.mxu1 %v1157_v27  ;;  %v5410_v15 = vld [vmem:[%s9892_s2] ss:$16 sps:$4 sm:$0xff]  }
 0x142   :  { %v6267_v30 = vpop.f32.mrf.mxu0 }
 0x144   :  { %v6272_v23 = vpop.f32.mrf.mxu0  ;;  %1859 = vmatpush1.bf16.msra.mxu1 %v1156_v24 }
 0x145   :  { %1860 = vmatprep.subr.bf16.mxu1 %v1155_v19 }
 0x146   :  { %v6277_v35 = vpop.f32.mrf.mxu0 }
 0x148   :  { %v6280_v20 = vpop.f32.mrf.mxu0  ;;  %1861 = vmatpush1.bf16.msra.mxu1 %v1154_v34 }
 0x149   :  { %1862 = vmatprep.subr.bf16.mxu1 %v1153_v18 }
 0x14a   :  { %v6283_v17 = vpop.f32.mrf.mxu0 }
 0x14c   :  { %v6289_v12 = vpop.f32.mrf.mxu0  ;;  %1863 = vmatpush1.bf16.msra.mxu1 %v1152_v13 }
 0x14d   :  { %1864 = vmatprep.subr.bf16.mxu1 %v1151_v36 }
 0x14e   :  { %v877_v37 = vpop.f32.mrf.mxu0 }
 0x150   :  { %v6299_v39 = vpop.f32.mrf.mxu0  ;;  %1865 = vmatpush1.bf16.msra.mxu1 %v1150_v14 }
 0x151   :  { %1866 = vmatprep.subr.bf16.mxu1 %v1149_v38  ;;  %v1106_v36 = vpack.c.bf16 %v6299_v39, %v6289_v12  ;;  %v1103_v12 = vpack.c.bf16 %v6267_v30, %v6255_v22  ;;  %v1166_v22 = vmax.bf16 %v9895_v29, %v1102_v26  ;;  %v5413_v26 = vld [vmem:[%s9892_s2 + $0x24] ss:$16 sps:$4 sm:$0xff]  }
 0x152   :  { %v881_v10 = vpop.f32.mrf.mxu0 }
 0x153   :  { %v1107_v33 = vpack.c.bf16 %v881_v10, %v877_v37 }
 0x154   :  { %v885_v11 = vpop.f32.mrf.mxu0  ;;  %1867 = vmatpush1.bf16.msra.mxu1 %v1148_v5  ;;  %v1105_v5 = vpack.c.bf16 %v6283_v17, %v6277_v35 }
 0x155   :  { %v1171_v37 = vmax.bf16 %v9895_v29, %v1107_v33 }
 0x156   :  { %v887_v4 = vpop.f32.mrf.mxu0  ;;  %v1169_v39 = vmax.bf16 %v9895_v29, %v1105_v5 }
 0x158   :  { %v889_v6 = vpop.f32.mrf.mxu0 }
 0x159   :  { %v1108_v24 = vpack.c.bf16 %v889_v6, %v885_v11  ;;  %v1104_v11 = vpack.c.bf16 %v6280_v20, %v6272_v23  ;;  %v1101_v23 = vpack.c.bf16 %v6248_v1, %v6239_v53  ;;  %v1167_v20 = vmax.bf16 %v9895_v29, %v1103_v12  ;;  %v5226_v12 = vld [vmem:[%s9890_s0 + $0x268] sm:$0xff] }
 0x15a   :  { %v891_v8 = vpop.f32.mrf.mxu0  ;;  %v1164_v53 = vmax.bf16 %v9895_v29, %v1100_v58 }
 0x15b   :  { %v1109_v25 = vpack.c.bf16 %v891_v8, %v887_v4  ;;  %v1172_v14 = vmax.bf16 %v9895_v29, %v1108_v24  ;;  %v1170_v4 = vmax.bf16 %v9895_v29, %v1106_v36  ;;  %v1168_v35 = vmax.bf16 %v9895_v29, %v1104_v11 }
 0x15c   :  { %v895_v40 = vpop.f32.mrf.mxu0 }
 0x15d   :  { %v1173_v34 = vmax.bf16 %v9895_v29, %v1109_v25 }
 0x15e   :  { %v897_v41 = vpop.f32.mrf.mxu0 }
 0x160   :  { %v899_v61 = vpop.f32.mrf.mxu0 }
 0x161   :  { %v1110_v9 = vpack.c.bf16 %v899_v61, %v895_v40 }
 0x162   :  { %v901_v2 = vpop.f32.mrf.mxu0 }
 0x163   :  { %v1111_v56 = vpack.c.bf16 %v901_v2, %v897_v41  ;;  %v1174_v32 = vmax.bf16 %v9895_v29, %v1110_v9  ;;  %v1165_v41 = vmax.bf16 %v9895_v29, %v1101_v23  ;;  %v5462_v2 = vld [vmem:[%s9892_s2 + $0xc] ss:$16 sps:$4 sm:$0xff]  }
 0x164   :  { %v905_v3 = vpop.f32.mrf.mxu0  ;;  %2237 = vmatprep.mubr.bf16.mxu0 %v5462_v2 }
 0x165   :  { %v1175_v27 = vmax.bf16 %v9895_v29, %v1111_v56  ;;  %v5422_v56 = vld [vmem:[%s9892_s2 + $0x84] ss:$16 sps:$4 sm:$0xff]  }
 0x166   :  { %v907_v42 = vpop.f32.mrf.mxu0 }
 0x168   :  { %v909_v43 = vpop.f32.mrf.mxu0 }
 0x169   :  { %v1112_v52 = vpack.c.bf16 %v909_v43, %v905_v3  ;;  %v5415_v3 = vld [vmem:[%s9892_s2 + $0x20] ss:$16 sps:$4 sm:$0xff]   ;;  %v5416_v43 = vld [vmem:[%s9892_s2 + $0x44] ss:$16 sps:$4 sm:$0xff]  }
 0x16a   :  { %v911_v44 = vpop.f32.mrf.mxu0 }
 0x16b   :  { %v1113_v0 = vpack.c.bf16 %v911_v44, %v907_v42  ;;  %v1176_v16 = vmax.bf16 %v9895_v29, %v1112_v52  ;;  %v5421_v52 = vld [vmem:[%s9892_s2 + $0x60] ss:$16 sps:$4 sm:$0xff]  }
 0x16c   :  { %v915_v45 = vpop.f32.mrf.mxu0 }
 0x16d   :  { %v1177_v59 = vmax.bf16 %v9895_v29, %v1113_v0 }
 0x16e   :  { %v917_v46 = vpop.f32.mrf.mxu0 }
 0x170   :  { %v919_v47 = vpop.f32.mrf.mxu0 }
 0x171   :  { %v1114_v60 = vpack.c.bf16 %v919_v47, %v915_v45  ;;  %v5418_v47 = vld [vmem:[%s9892_s2 + $0x40] ss:$16 sps:$4 sm:$0xff]  }
 0x172   :  { %v921_v62 = vpop.f32.mrf.mxu0 }
 0x173   :  { %v1115_v48 = vpack.c.bf16 %v921_v62, %v917_v46  ;;  %v1178_v54 = vmax.bf16 %v9895_v29, %v1114_v60  ;;  %v5419_v62 = vld [vmem:[%s9892_s2 + $0x64] ss:$16 sps:$4 sm:$0xff]  }
 0x174   :  { %v6305_v49 = vpop.f32.mrf.mxu0 }
 0x175   :  { %v1179_v51 = vmax.bf16 %v9895_v29, %v1115_v48 }
 0x176   :  { %v6309_v55 = vpop.f32.mrf.mxu0 }
 0x177   :  { %1868 = vmatprep.subr.bf16.mxu1 %v1179_v51 }
 0x178   :  { %v6312_v63 = vpop.f32.mrf.mxu0  ;;  %1869 = vmatpush2.bf16.msra.mxu1 %v1178_v54 }
 0x179   :  { %v1116_v7 = vpack.c.bf16 %v6312_v63, %v6305_v49  ;;  %1870 = vmatprep.subr.bf16.mxu1 %v1177_v59 }
 0x17a   :  { %v6317_v21 = vpop.f32.mrf.mxu0 }
 0x17c   :  { %v6320_v31 = vpop.f32.mrf.mxu0  ;;  %1871 = vmatpush2.bf16.msra.mxu1 %v1176_v16 }
 0x17d   :  { %1872 = vmatprep.subr.bf16.mxu1 %v1175_v27 }
 0x17e   :  { %v6323_v19 = vpop.f32.mrf.mxu0 }
 0x180   :  { %v6326_v18 = vpop.f32.mrf.mxu0  ;;  %1873 = vmatpush2.bf16.msra.mxu1 %v1174_v32  ;;  %v5424_v32 = vld [vmem:[%s9892_s2 + $0x80] ss:$16 sps:$4 sm:$0xff]  }
 0x181   :  { %v1118_v13 = vpack.c.bf16 %v6326_v18, %v6320_v31  ;;  %1874 = vmatprep.subr.bf16.mxu1 %v1173_v34  ;;  %v1180_v31 = vmax.bf16 %v9895_v29, %v1116_v7 }
 0x182   :  { %v6333_v38 = vpop.f32.mrf.mxu0 }
 0x184   :  { %v6338_v10 = vpop.f32.mrf.mxu0  ;;  %1875 = vmatpush2.bf16.msra.mxu1 %v1172_v14  ;;  %v5425_v14 = vld [vmem:[%s9892_s2 + $0xa4] ss:$16 sps:$4 sm:$0xff]  }
 0x185   :  { %1876 = vmatprep.subr.bf16.mxu1 %v1171_v37 }
 0x186   :  { %v6343_v6 = vpop.f32.mrf.mxu0 }
 0x188   :  { %v6348_v8 = vpop.f32.mrf.mxu0  ;;  %1877 = vmatpush2.bf16.msra.mxu1 %v1170_v4 }
 0x189   :  { %1878 = vmatprep.subr.bf16.mxu1 %v1169_v39  ;;  %v5228_v39 = vld [vmem:[%s9890_s0 + $0x278] sm:$0xff] }
 0x18a   :  { %v6351_v17 = vpop.f32.mrf.mxu0 }
 0x18c   :  { %v6356_v40 = vpop.f32.mrf.mxu0  ;;  %1879 = vmatpush2.bf16.msra.mxu1 %v1168_v35  ;;  %v5225_v35 = vld [vmem:[%s9890_s0 + $0x260] sm:$0xff] }
 0x18d   :  { %1880 = vmatprep.subr.bf16.mxu1 %v1167_v20 }
 0x18e   :  { %v6362_v30 = vpop.f32.mrf.mxu0 }
 0x190   :  { %v6365_v61 = vpop.f32.mrf.mxu0  ;;  %1881 = vmatpush2.bf16.msra.mxu1 %v1166_v22 }
 0x191   :  { %1882 = vmatprep.subr.bf16.mxu1 %v1165_v41  ;;  %v3359_v41 = vpack.c.bf16 %v5228_v39, %v5226_v12  ;;  %v5437_v12 = vld [vmem:[%s9892_s2 + $0x124] ss:$16 sps:$4 sm:$0xff]   ;;  %v5439_v39 = vld [vmem:[%s9892_s2 + $0x120] ss:$16 sps:$4 sm:$0xff]  }
 0x192   :  { %v6371_v1 = vpop.f32.mrf.mxu0 }
 0x194   :  { %v6376_v28 = vpop.f32.mrf.mxu0  ;;  %1883 = vmatpush2.bf16.msra.mxu1 %v1164_v53  ;;  %v5227_v53 = vld [vmem:[%s9890_s0 + $0x270] sm:$0xff] }
 0x195   :  { %3368 = vmatprep.subr.bf16.mxu1 %v3359_v41  ;;  %v210_v41 = vld [vmem:[%s9893_s3] sm:$0xff] }
 0x196   :  { %v6384_v50 = vpop.f32.mrf.mxu0  ;;  %2688 = vperm.xlu0 %5312, %v210_v41   ;;  %v5210_v41 = vld [vmem:[%s9890_s0 + $0x1e8] sm:$0xff] }
 0x197   :  { %1885 = vmatmul.mubr.bf16.vlgmr.msra.gmra.mxu1 %v5410_v15 }
 0x198   :  { %v6386_v57 = vpop.f32.mrf.mxu0  ;;  %1894 = vmatprep.mubr.bf16.mxu1 %v5413_v26 }
 0x19a   :  { %v6388_v58 = vpop.f32.mrf.mxu0 }
 0x19b   :  { %v1125_v15 = vpack.c.bf16 %v6388_v58, %v6384_v50 }
 0x19c   :  { %v975_v42 = vpop.f32.mrf.mxu0 }
 0x19e   :  { %v977_v44 = vpop.f32.mrf.mxu0 }
 0x19f   :  { %1895 = vmatmul.mubr.bf16.gmra.mxu1 %v5415_v3  ;;  %v3358_v3 = vpack.c.bf16 %v5227_v53, %v5225_v35 }
 0x1a0   :  { %v979_v45 = vpop.f32.mrf.mxu0  ;;  %1904 = vmatprep.mubr.bf16.mxu1 %v5416_v43  ;;  %v5427_v43 = vld [vmem:[%s9892_s2 + $0xa0] ss:$16 sps:$4 sm:$0xff]  }
 0x1a1   :  { %v1126_v23 = vpack.c.bf16 %v979_v45, %v975_v42  ;;  %3369 = vmatpush1.bf16.msra.mxu1 %v3358_v3  ;;  %v5428_v45 = vld [vmem:[%s9892_s2 + $0xc4] ss:$16 sps:$4 sm:$0xff]  }
 0x1a2   :  { %v981_v46 = vpop.f32.mrf.mxu0 }
 0x1a3   :  { %v1127_v5 = vpack.c.bf16 %v981_v46, %v977_v44  ;;  %v1124_v44 = vpack.c.bf16 %v6386_v57, %v6376_v28  ;;  %v1190_v50 = vmax.bf16 %v9895_v29, %v1126_v23  ;;  %v1123_v46 = vpack.c.bf16 %v6371_v1, %v6362_v30  ;;  %v5440_v23 = vld [vmem:[%s9892_s2 + $0x144] ss:$16 sps:$4 sm:$0xff]  }
 0x1a4   :  { %v985_v60 = vpop.f32.mrf.mxu0  ;;  %v1122_v28 = vpack.c.bf16 %v6365_v61, %v6356_v40  ;;  %v5430_v40 = vld [vmem:[%s9892_s2 + $0xc0] ss:$16 sps:$4 sm:$0xff]   ;;  %v1120_v61 = vpack.c.bf16 %v6348_v8, %v6338_v10  ;;  %v5222_v10 = vld [vmem:[%s9890_s0 + $0x248] sm:$0xff]  ;;  %v5224_v8 = vld [vmem:[%s9890_s0 + $0x258] sm:$0xff] }
 0x1a5   :  { %v1191_v26 = vmax.bf16 %v9895_v29, %v1127_v5  ;;  %v1188_v57 = vmax.bf16 %v9895_v29, %v1124_v44  ;;  %v1187_v30 = vmax.bf16 %v9895_v29, %v1123_v46  ;;  %v211_v46 = vld [vmem:[%s9893_s3 + $0x8] sm:$0xff] }
 0x1a6   :  { %v987_v0 = vpop.f32.mrf.mxu0  ;;  %2693 = vperm.xlu0 %5312, %v211_v46   ;;  %v5211_v46 = vld [vmem:[%s9890_s0 + $0x1f0] sm:$0xff] }
 0x1a7   :  { %1905 = vmatmul.mubr.bf16.gmra.mxu1 %v5418_v47  ;;  %v1189_v47 = vmax.bf16 %v9895_v29, %v1125_v15  ;;  %v5218_v15 = vld [vmem:[%s9890_s0 + $0x228] sm:$0xff] }
 0x1a8   :  { %v989_v48 = vpop.f32.mrf.mxu0  ;;  %1914 = vmatprep.mubr.bf16.mxu1 %v5419_v62 }
 0x1a9   :  { %v1128_v33 = vpack.c.bf16 %v989_v48, %v985_v60 }
 0x1aa   :  { %v991_v51 = vpop.f32.mrf.mxu0 }
 0x1ab   :  { %v1129_v16 = vpack.c.bf16 %v991_v51, %v987_v0  ;;  %v1192_v20 = vmax.bf16 %v9895_v29, %v1128_v33  ;;  %v1121_v0 = vpack.c.bf16 %v6351_v17, %v6343_v6  ;;  %v1186_v51 = vmax.bf16 %v9895_v29, %v1122_v28  ;;  %v5431_v6 = vld [vmem:[%s9892_s2 + $0xe4] ss:$16 sps:$4 sm:$0xff]   ;;  %v5433_v33 = vld [vmem:[%s9892_s2 + $0xe0] ss:$16 sps:$4 sm:$0xff]  }
 0x1ac   :  { %v995_v54 = vpop.f32.mrf.mxu0  ;;  %v1119_v17 = vpack.c.bf16 %v6333_v38, %v6323_v19  ;;  %v3357_v19 = vpack.c.bf16 %v5224_v8, %v5222_v10  ;;  %v5221_v38 = vld [vmem:[%s9890_s0 + $0x240] sm:$0xff] }
 0x1ad   :  { %v1193_v37 = vmax.bf16 %v9895_v29, %v1129_v16  ;;  %v1117_v16 = vpack.c.bf16 %v6317_v21, %v6309_v55  ;;  %v1182_v55 = vmax.bf16 %v9895_v29, %v1118_v13  ;;  %v5443_v28 = vld [vmem:[%s9892_s2 + $0x164] ss:$16 sps:$4 sm:$0xff]  }
 0x1ae   :  { %v997_v59 = vpop.f32.mrf.mxu0  ;;  %3370 = vmatprep.subr.bf16.mxu1 %v3357_v19  ;;  %v214_v8 = vld [vmem:[%s9893_s3 + $0x20] sm:$0xff]  ;;  %v5214_v19 = vld [vmem:[%s9890_s0 + $0x208] sm:$0xff] }
 0x1af   :  { %1915 = vmatmul.mubr.bf16.gmra.mxu1 %v5421_v52  ;;  %2708 = vperm.xlu0 %5312, %v214_v8  }
 0x1b0   :  { %v999_v9 = vpop.f32.mrf.mxu0  ;;  %1924 = vmatprep.mubr.bf16.mxu1 %v5422_v56 }
 0x1b1   :  { %v1130_v25 = vpack.c.bf16 %v999_v9, %v995_v54  ;;  %v1185_v54 = vmax.bf16 %v9895_v29, %v1121_v0 }
 0x1b2   :  { %v1001_v27 = vpop.f32.mrf.mxu0 }
 0x1b3   :  { %v1131_v24 = vpack.c.bf16 %v1001_v27, %v997_v59  ;;  %v1194_v34 = vmax.bf16 %v9895_v29, %v1130_v25  ;;  %v1184_v59 = vmax.bf16 %v9895_v29, %v1120_v61  ;;  %v1183_v25 = vmax.bf16 %v9895_v29, %v1119_v17  ;;  %v5223_v27 = vld [vmem:[%s9890_s0 + $0x250] sm:$0xff] }
 0x1b4   :  { %v6412_v36 = vpop.f32.mrf.mxu0 }
 0x1b5   :  { %v1195_v11 = vmax.bf16 %v9895_v29, %v1131_v24 }
 0x1b6   :  { %v6419_v4 = vpop.f32.mrf.mxu0 }
 0x1b7   :  { %1925 = vmatmul.mubr.bf16.gmra.mxu1 %v5424_v32  ;;  %2205 = vmatprep.subr.bf16.mxu0 %v1195_v11  ;;  %v3356_v32 = vpack.c.bf16 %v5223_v27, %v5221_v38  ;;  %v5216_v38 = vld [vmem:[%s9890_s0 + $0x218] sm:$0xff] }
 0x1b8   :  { %v6431_v22 = vpop.f32.mrf.mxu0  ;;  %1934 = vmatprep.mubr.bf16.mxu1 %v5425_v14  ;;  %2206 = vmatpush1.bf16.msra.mxu0 %v1194_v34  ;;  %v5434_v34 = vld [vmem:[%s9892_s2 + $0x104] ss:$16 sps:$4 sm:$0xff]   ;;  %v1181_v14 = vmax.bf16 %v9895_v29, %v1117_v16  ;;  %v3353_v27 = vpack.c.bf16 %v5216_v38, %v5214_v19 }
 0x1b9   :  { %v1132_v2 = vpack.c.bf16 %v6431_v22, %v6412_v36  ;;  %2207 = vmatprep.subr.bf16.mxu0 %v1193_v37  ;;  %3371 = vmatpush1.bf16.msra.mxu1 %v3356_v32  ;;  %v5436_v37 = vld [vmem:[%s9892_s2 + $0x100] ss:$16 sps:$4 sm:$0xff]  }
 0x1ba   :  { %v6441_v42 = vpop.f32.mrf.mxu0  ;;  %v5213_v32 = vld [vmem:[%s9890_s0 + $0x200] sm:$0xff]  ;;  %v5203_v38 = vld [vmem:[%s9890_s0 + $0x1b0] sm:$0xff] }
 0x1bb   :  { %v5201_v19 = vld [vmem:[%s9890_s0 + $0x1a0] sm:$0xff]  ;;  %v5231_v36 = vld [vmem:[%s9890_s0 + $0x290] sm:$0xff] }
 0x1bc   :  { %v6449_v58 = vpop.f32.mrf.mxu0  ;;  %2208 = vmatpush1.bf16.msra.mxu0 %v1192_v20 }
 0x1bd   :  { %2209 = vmatprep.subr.bf16.mxu0 %v1191_v26  ;;  %v5220_v26 = vld [vmem:[%s9890_s0 + $0x238] sm:$0xff] }
 0x1be   :  { %v6457_v60 = vpop.f32.mrf.mxu0  ;;  %v3355_v44 = vpack.c.bf16 %v5220_v26, %v5218_v15 }
 0x1bf   :  { %1935 = vmatmul.mubr.bf16.gmra.mxu1 %v5427_v43  ;;  %v5442_v43 = vld [vmem:[%s9892_s2 + $0x140] ss:$16 sps:$4 sm:$0xff]  }
 0x1c0   :  { %v6462_v62 = vpop.f32.mrf.mxu0  ;;  %1944 = vmatprep.mubr.bf16.mxu1 %v5428_v45  ;;  %2210 = vmatpush1.bf16.msra.mxu0 %v1190_v50  ;;  %v5217_v50 = vld [vmem:[%s9890_s0 + $0x220] sm:$0xff]  ;;  %v5219_v45 = vld [vmem:[%s9890_s0 + $0x230] sm:$0xff] }
 0x1c1   :  { %v1134_v1 = vpack.c.bf16 %v6462_v62, %v6449_v58  ;;  %2211 = vmatprep.subr.bf16.mxu0 %v1189_v47  ;;  %3372 = vmatprep.subr.bf16.mxu1 %v3355_v44  ;;  %v5212_v44 = vld [vmem:[%s9890_s0 + $0x1f8] sm:$0xff]  ;;  %v5233_v62 = vld [vmem:[%s9890_s0 + $0x2a0] sm:$0xff] }
 0x1c2   :  { %v6469_v48 = vpop.f32.mrf.mxu0 }
 0x1c4   :  { %v6477_v52 = vpop.f32.mrf.mxu0  ;;  %2212 = vmatpush1.bf16.msra.mxu0 %v1188_v57  ;;  %v3354_v57 = vpack.c.bf16 %v5219_v45, %v5217_v50  ;;  %v3351_v50 = vpack.c.bf16 %v5212_v44, %v5210_v41  ;;  %v5209_v45 = vld [vmem:[%s9890_s0 + $0x1e0] sm:$0xff]  ;;  %v5238_v44 = vld [vmem:[%s9890_s0 + $0x2c8] sm:$0xff] }
 0x1c5   :  { %2213 = vmatprep.subr.bf16.mxu0 %v1187_v30  ;;  %v212_v30 = vld [vmem:[%s9893_s3 + $0x10] sm:$0xff] }
 0x1c6   :  { %v6485_v56 = vpop.f32.mrf.mxu0  ;;  %3373 = vmatpush1.bf16.msra.mxu1 %v3354_v57  ;;  %2698 = vperm.xlu1 %5313, %v212_v30   ;;  %v5206_v57 = vld [vmem:[%s9890_s0 + $0x1c8] sm:$0xff] }
 0x1c7   :  { %1945 = vmatmul.mubr.bf16.gmra.mxu1 %v5430_v40  ;;  %3374 = vmatprep.subr.bf16.mxu1 %v3353_v27  ;;  %v5198_v27 = vld [vmem:[%s9890_s0 + $0x188] sm:$0xff] }
 0x1c8   :  { %v6494_v9 = vpop.f32.mrf.mxu0  ;;  %1954 = vmatprep.mubr.bf16.mxu1 %v5431_v6  ;;  %2214 = vmatpush1.bf16.msra.mxu0 %v1186_v51  ;;  %v5445_v51 = vld [vmem:[%s9892_s2 + $0x160] ss:$16 sps:$4 sm:$0xff]   ;;  %v213_v6 = vld [vmem:[%s9893_s3 + $0x18] sm:$0xff] }
 0x1c9   :  { %2215 = vmatprep.subr.bf16.mxu0 %v1185_v54  ;;  %v5446_v54 = vld [vmem:[%s9892_s2 + $0x184] ss:$16 sps:$4 sm:$0xff]  }
 0x1ca   :  { %v6505_v24 = vpop.f32.mrf.mxu0  ;;  %2703 = vperm.xlu1 %5313, %v213_v6  }
 0x1cc   :  { %v6514_v21 = vpop.f32.mrf.mxu0  ;;  %2216 = vmatpush1.bf16.msra.mxu0 %v1184_v59 }
 0x1cd   :  { %2217 = vmatprep.subr.bf16.mxu0 %v1183_v25 }
 0x1ce   :  { %v6520_v5 = vpop.f32.mrf.mxu0 }
 0x1cf   :  { %1955 = vmatmul.mubr.bf16.gmra.mxu1 %v5433_v33  ;;  %v5215_v33 = vld [vmem:[%s9890_s0 + $0x210] sm:$0xff] }
 0x1d0   :  { %v6526_v18 = vpop.f32.mrf.mxu0  ;;  %1964 = vmatprep.mubr.bf16.mxu1 %v5434_v34  ;;  %2218 = vmatpush1.bf16.msra.mxu0 %v1182_v55  ;;  %v3352_v34 = vpack.c.bf16 %v5215_v33, %v5213_v32  ;;  %v5200_v32 = vld [vmem:[%s9890_s0 + $0x198] sm:$0xff]  ;;  %v1137_v33 = vpack.c.bf16 %v6505_v24, %v6485_v56  ;;  %v5454_v56 = vld [vmem:[%s9892_s2 + $0x1c0] ss:$16 sps:$4 sm:$0xff]   ;;  %v219_v24 = vld [vmem:[%s9893_s3 + $0x48] sm:$0xff] }
 0x1d1   :  { %2219 = vmatprep.subr.bf16.mxu0 %v1181_v14 }
 0x1d2   :  { %v6528_v13 = vpop.f32.mrf.mxu0  ;;  %3375 = vmatpush1.bf16.msra.mxu1 %v3352_v34  ;;  %v5199_v34 = vld [vmem:[%s9890_s0 + $0x190] sm:$0xff]  ;;  %v1201_v41 = vmax.bf16 %v9895_v29, %v1137_v33 }
 0x1d3   :  { %3376 = vmatprep.subr.bf16.mxu1 %v3351_v50  ;;  %v1139_v8 = vpack.c.bf16 %v6528_v13, %v6520_v5  ;;  %v218_v5 = vld [vmem:[%s9893_s3 + $0x40] sm:$0xff]  ;;  %v3346_v13 = vpack.c.bf16 %v5203_v38, %v5201_v19  ;;  %v5240_v50 = vld [vmem:[%s9890_s0 + $0x2d8] sm:$0xff] }
 0x1d4   :  { %v6533_v11 = vpop.f32.mrf.mxu0  ;;  %2220 = vmatpush1.bf16.msra.mxu0 %v1180_v31  ;;  %v5448_v31 = vld [vmem:[%s9892_s2 + $0x180] ss:$16 sps:$4 sm:$0xff]   ;;  %v225_v38 = vld [vmem:[%s9893_s3 + $0x78] sm:$0xff]  ;;  %v5476_v33 = vld [vmem:[%s9892_s2 + $0x264] ss:$16 sps:$4 sm:$0xff]  }
 0x1d5   :  { %v5469_v19 = vld [vmem:[%s9892_s2 + $0x220] ss:$16 sps:$4 sm:$0xff]  }
 0x1d6   :  { %v6538_v49 = vpop.f32.mrf.mxu0 }
 0x1d7   :  { %1965 = vmatmul.mubr.bf16.gmra.mxu1 %v5436_v37  ;;  %v215_v37 = vld [vmem:[%s9893_s3 + $0x28] sm:$0xff] }
 0x1d8   :  { %v6540_v63 = vpop.f32.mrf.mxu0  ;;  %1974 = vmatprep.mubr.bf16.mxu1 %v5437_v12  ;;  %2713 = vperm.xlu1 %5313, %v215_v37  }
 0x1d9   :  { %v1140_v6 = vpack.c.bf16 %v6540_v63, %v6533_v11  ;;  %v5204_v11 = vld [vmem:[%s9890_s0 + $0x1b8] sm:$0xff] }
 0x1da   :  { %v6542_v7 = vpop.f32.mrf.mxu0 }
 0x1db   :  { %v1141_v30 = vpack.c.bf16 %v6542_v7, %v6538_v49  ;;  %v5451_v49 = vld [vmem:[%s9892_s2 + $0x1a0] ss:$16 sps:$4 sm:$0xff]   ;;  %v217_v7 = vld [vmem:[%s9893_s3 + $0x38] sm:$0xff] }
 0x1dc   :  { %v6547_v35 = vpop.f32.mrf.mxu0  ;;  %2723 = vperm.xlu1 %5313, %v217_v7   ;;  %v5232_v7 = vld [vmem:[%s9890_s0 + $0x298] sm:$0xff] }
 0x1de   :  { %v6552_v20 = vpop.f32.mrf.mxu0 }
 0x1df   :  { %1975 = vmatmul.mubr.bf16.gmra.mxu1 %v5439_v39 }
 0x1e0   :  { %v6557_v53 = vpop.f32.mrf.mxu0  ;;  %1984 = vmatprep.mubr.bf16.mxu1 %v5440_v23  ;;  %v5449_v23 = vld [vmem:[%s9892_s2 + $0x1a4] ss:$16 sps:$4 sm:$0xff]   ;;  %2733 = vperm.xlu1 %5313, %v219_v24   ;;  %v5486_v24 = vld [vmem:[%s9892_s2 + $0x8c] ss:$16 sps:$4 sm:$0xff]  }
 0x1e2   :  { %v6565_v3 = vpop.f32.mrf.mxu0 }
 0x1e3   :  { %v1143_v15 = vpack.c.bf16 %v6565_v3, %v6552_v20  ;;  %v216_v20 = vld [vmem:[%s9893_s3 + $0x30] sm:$0xff]  ;;  %v3350_v3 = vpack.c.bf16 %v5211_v46, %v5209_v45  ;;  %v1133_v45 = vpack.c.bf16 %v6441_v42, %v6419_v4  ;;  %v221_v42 = vld [vmem:[%s9893_s3 + $0x58] sm:$0xff] }
 0x1e4   :  { %v1065_v47 = vpop.f32.mrf.mxu0  ;;  %2718 = vperm.xlu0 %5312, %v216_v20   ;;  %v3365_v20 = vpack.c.bf16 %v5240_v50, %v5238_v44  ;;  %v5457_v4 = vld [vmem:[%s9892_s2 + $0x1e0] ss:$16 sps:$4 sm:$0xff]   ;;  %2743 = vperm.xlu1 %5313, %v221_v42   ;;  %v5496_v44 = vld [vmem:[%s9892_s2 + $0xc8] ss:$16 sps:$4 sm:$0xff]   ;;  %v5506_v42 = vld [vmem:[%s9892_s2 + $0x304] ss:$16 sps:$4 sm:$0xff]  }
 0x1e5   :  { %3377 = vmatpush1.bf16.msra.mxu1 %v3350_v3  ;;  %v5237_v3 = vld [vmem:[%s9890_s0 + $0x2c0] sm:$0xff] }
 0x1e6   :  { %v1067_v0 = vpop.f32.mrf.mxu0  ;;  %v5499_v50 = vld [vmem:[%s9892_s2 + $0x2c0] ss:$16 sps:$4 sm:$0xff]  }
 0x1e7   :  { %1985 = vmatmul.mubr.bf16.gmra.mxu1 %v5442_v43 }
 0x1e8   :  { %v1069_v40 = vpop.f32.mrf.mxu0  ;;  %1994 = vmatprep.mubr.bf16.mxu1 %v5443_v28  ;;  %2728 = vperm.xlu0 %5312, %v218_v5   ;;  %v5470_v5 = vld [vmem:[%s9892_s2 + $0x244] ss:$16 sps:$4 sm:$0xff]  }
 0x1e9   :  { %v1144_v12 = vpack.c.bf16 %v1069_v40, %v1065_v47  ;;  %v1142_v47 = vpack.c.bf16 %v6557_v53, %v6547_v35  ;;  %v1207_v40 = vmax.bf16 %v9895_v29, %v1143_v15  ;;  %v5205_v53 = vld [vmem:[%s9890_s0 + $0x1c0] sm:$0xff] }
 0x1ea   :  { %v1071_v61 = vpop.f32.mrf.mxu0  ;;  %v5241_v15 = vld [vmem:[%s9890_s0 + $0x2e0] sm:$0xff] }
 0x1eb   :  { %v1145_v16 = vpack.c.bf16 %v1071_v61, %v1067_v0  ;;  %v1208_v28 = vmax.bf16 %v9895_v29, %v1144_v12  ;;  %v5208_v0 = vld [vmem:[%s9890_s0 + $0x1d8] sm:$0xff]  ;;  %v5207_v61 = vld [vmem:[%s9890_s0 + $0x1d0] sm:$0xff] }
 0x1ec   :  { %v1075_v17 = vpop.f32.mrf.mxu0  ;;  %v3349_v35 = vpack.c.bf16 %v5208_v0, %v5206_v57  ;;  %v5455_v12 = vld [vmem:[%s9892_s2 + $0x1e4] ss:$16 sps:$4 sm:$0xff]   ;;  %v1198_v57 = vmax.bf16 %v9895_v29, %v1134_v1 }
 0x1ed   :  { %v1209_v26 = vmax.bf16 %v9895_v29, %v1145_v16  ;;  %v1138_v16 = vpack.c.bf16 %v6526_v18, %v6514_v21  ;;  %v3345_v21 = vpack.c.bf16 %v5200_v32, %v5198_v27  ;;  %v5197_v18 = vld [vmem:[%s9890_s0 + $0x180] sm:$0xff]  ;;  %v5235_v1 = vld [vmem:[%s9890_s0 + $0x2b0] sm:$0xff]  ;;  %v227_v32 = vld [vmem:[%s9893_s3 + $0x88] sm:$0xff] }
 0x1ee   :  { %v1077_v10 = vpop.f32.mrf.mxu0  ;;  %3378 = vmatprep.subr.bf16.mxu1 %v3349_v35  ;;  %v5458_v0 = vld [vmem:[%s9892_s2 + $0x204] ss:$16 sps:$4 sm:$0xff]   ;;  %v5236_v35 = vld [vmem:[%s9890_s0 + $0x2b8] sm:$0xff]  ;;  %v5475_v27 = vld [vmem:[%s9892_s2 + $0x240] ss:$16 sps:$4 sm:$0xff]  }
 0x1ef   :  { %1995 = vmatmul.mubr.bf16.gmra.mxu1 %v5445_v51  ;;  %v3348_v51 = vpack.c.bf16 %v5207_v61, %v5205_v53  ;;  %v1202_v37 = vmax.bf16 %v9895_v29, %v1138_v16  ;;  %v222_v53 = vld [vmem:[%s9893_s3 + $0x60] sm:$0xff]  ;;  %v3362_v61 = vpack.c.bf16 %v5235_v1, %v5233_v62  ;;  %v5516_v62 = vld [vmem:[%s9892_s2 + $0x12c] ss:$16 sps:$4 sm:$0xff]  }
 0x1f0   :  { %v1079_v59 = vpop.f32.mrf.mxu0  ;;  %2004 = vmatprep.mubr.bf16.mxu1 %v5446_v54  ;;  %v5452_v54 = vld [vmem:[%s9892_s2 + $0x1c4] ss:$16 sps:$4 sm:$0xff]  }
 0x1f1   :  { %v1146_v25 = vpack.c.bf16 %v1079_v59, %v1075_v17  ;;  %v1206_v17 = vmax.bf16 %v9895_v29, %v1142_v47  ;;  %v1205_v59 = vmax.bf16 %v9895_v29, %v1141_v30  ;;  %3379 = vmatpush1.bf16.msra.mxu1 %v3348_v51  ;;  %v5239_v47 = vld [vmem:[%s9890_s0 + $0x2d0] sm:$0xff]  ;;  %v5234_v30 = vld [vmem:[%s9890_s0 + $0x2a8] sm:$0xff]  ;;  %v1196_v51 = vmax.bf16 %v9895_v29, %v1132_v2  ;;  %v226_v16 = vld [vmem:[%s9893_s3 + $0x80] sm:$0xff] }
 0x1f2   :  { %v1081_v55 = vpop.f32.mrf.mxu0  ;;  %v3363_v58 = vpack.c.bf16 %v5236_v35, %v5234_v30  ;;  %v5460_v2 = vld [vmem:[%s9892_s2 + $0x8] ss:$16 sps:$4 sm:$0xff]  }
 0x1f3   :  { %v1147_v14 = vpack.c.bf16 %v1081_v55, %v1077_v10  ;;  %v1210_v39 = vmax.bf16 %v9895_v29, %v1146_v25  ;;  %v5202_v10 = vld [vmem:[%s9890_s0 + $0x1a8] sm:$0xff]  ;;  %v1204_v25 = vmax.bf16 %v9895_v29, %v1140_v6  ;;  %v1203_v55 = vmax.bf16 %v9895_v29, %v1139_v8  ;;  %v5464_v8 = vld [vmem:[%s9892_s2 + $0x224] ss:$16 sps:$4 sm:$0xff]  }
 0x1f4   :  { %v3347_v63 = vpack.c.bf16 %v5204_v11, %v5202_v10  ;;  %v223_v10 = vld [vmem:[%s9893_s3 + $0x68] sm:$0xff]  ;;  %v224_v11 = vld [vmem:[%s9893_s3 + $0x70] sm:$0xff] }
 0x1f5   :  { %v1211_v43 = vmax.bf16 %v9895_v29, %v1147_v14  ;;  %v3344_v14 = vpack.c.bf16 %v5199_v34, %v5197_v18  ;;  %2753 = vperm.xlu1 %5313, %v223_v10   ;;  %v5478_v18 = vld [vmem:[%s9892_s2 + $0x68] ss:$16 sps:$4 sm:$0xff]   ;;  %v5481_v34 = vld [vmem:[%s9892_s2 + $0x260] ss:$16 sps:$4 sm:$0xff]  }
 0x1f6   :  { %3380 = vmatprep.subr.bf16.mxu1 %v3347_v63  ;;  %v5466_v63 = vld [vmem:[%s9892_s2 + $0x28] ss:$16 sps:$4 sm:$0xff]  }
 0x1f7   :  { %2005 = vmatmul.mubr.bf16.gmra.mxu1 %v5448_v31  ;;  %2221 = vmatprep.subr.bf16.mxu0 %v1211_v43  ;;  %v1136_v31 = vpack.c.bf16 %v6494_v9, %v6477_v52  ;;  %v5244_v52 = vld [vmem:[%s9890_s0 + $0x2f8] sm:$0xff]  ;;  %v239_v35 = vld [vmem:[%s9893_s3 + $0xe8] sm:$0xff] }
 0x1f8   :  { %2222 = vmatpush2.bf16.msra.mxu0 %v1210_v39  ;;  %2014 = vmatprep.mubr.bf16.mxu1 %v5449_v23  ;;  %v5242_v39 = vld [vmem:[%s9890_s0 + $0x2e8] sm:$0xff]  ;;  %v1135_v23 = vpack.c.bf16 %v6469_v48, %v6457_v60  ;;  %v220_v60 = vld [vmem:[%s9893_s3 + $0x50] sm:$0xff] }
 0x1f9   :  { %2223 = vmatprep.subr.bf16.mxu0 %v1209_v26  ;;  %3381 = vmatpush1.bf16.msra.mxu1 %v3346_v13  ;;  %v3367_v9 = vpack.c.bf16 %v5244_v52, %v5242_v39  ;;  %v5243_v26 = vld [vmem:[%s9890_s0 + $0x2f0] sm:$0xff]  ;;  %v1200_v43 = vmax.bf16 %v9895_v29, %v1136_v31  ;;  %v5474_v13 = vld [vmem:[%s9892_s2 + $0x4c] ss:$16 sps:$4 sm:$0xff]   ;;  %v230_v31 = vld [vmem:[%s9893_s3 + $0xa0] sm:$0xff] }
 0x1fa   :  { %3382 = vmatprep.subr.bf16.mxu1 %v3345_v21  ;;  %v3366_v48 = vpack.c.bf16 %v5243_v26, %v5241_v15  ;;  %v1199_v46 = vmax.bf16 %v9895_v29, %v1135_v23  ;;  %2738 = vperm.xlu0 %5312, %v220_v60   ;;  %v228_v21 = vld [vmem:[%s9893_s3 + $0x90] sm:$0xff]  ;;  %v231_v39 = vld [vmem:[%s9893_s3 + $0xa8] sm:$0xff]  ;;  %v233_v26 = vld [vmem:[%s9893_s3 + $0xb8] sm:$0xff] }
 0x1fb   :  { %2763 = vperm.xlu1 %5313, %v225_v38   ;;  %v5488_v23 = vld [vmem:[%s9892_s2 + $0x2a4] ss:$16 sps:$4 sm:$0xff]   ;;  %v5493_v15 = vld [vmem:[%s9892_s2 + $0x2a0] ss:$16 sps:$4 sm:$0xff]   ;;  %v5508_v30 = vld [vmem:[%s9892_s2 + $0x108] ss:$16 sps:$4 sm:$0xff]  }
 0x1fc   :  { %2224 = vmatpush2.bf16.msra.mxu0 %v1208_v28  ;;  %v3364_v28 = vpack.c.bf16 %v5239_v47, %v5237_v3  ;;  %v232_v52 = vld [vmem:[%s9893_s3 + $0xb0] sm:$0xff]  ;;  %v5502_v47 = vld [vmem:[%s9892_s2 + $0xe8] ss:$16 sps:$4 sm:$0xff]   ;;  %v5528_v38 = vld [vmem:[%s9892_s2 + $0x16c] ss:$16 sps:$4 sm:$0xff]  }
 0x1fd   :  { %2225 = vmatprep.subr.bf16.mxu0 %v1207_v40  ;;  %3383 = vmatpush1.bf16.msra.mxu1 %v3344_v14  ;;  %v1197_v40 = vmax.bf16 %v9895_v29, %v1133_v45  ;;  %v229_v14 = vld [vmem:[%s9893_s3 + $0x98] sm:$0xff]  ;;  %v5494_v60 = vld [vmem:[%s9892_s2 + $0x2c4] ss:$16 sps:$4 sm:$0xff]   ;;  %v235_v45 = vld [vmem:[%s9893_s3 + $0xc8] sm:$0xff] }
 0x1fe   :  { %3392 = vmatprep.subr.bf16.mxu1 %v3367_v9  ;;  %2748 = vperm.xlu0 %5312, %v222_v53   ;;  %v5490_v9 = vld [vmem:[%s9892_s2 + $0xa8] ss:$16 sps:$4 sm:$0xff]   ;;  %v236_v3 = vld [vmem:[%s9893_s3 + $0xd0] sm:$0xff] }
 0x1ff   :  { %2015 = vmatmul.mubr.bf16.gmra.mxu1 %v5451_v49  ;;  %v5230_v49 = vld [vmem:[%s9890_s0 + $0x288] sm:$0xff]  ;;  %2773 = vperm.xlu1 %5313, %v227_v32   ;;  %v240_v53 = vld [vmem:[%s9893_s3 + $0xf0] sm:$0xff]  ;;  %v269_v29 = vld [vmem:[%s9893_s3 + $0x1d8] sm:$0xff] }
 0x200   :  { %2226 = vmatpush2.bf16.msra.mxu0 %v1206_v17  ;;  %2024 = vmatprep.mubr.bf16.mxu1 %v5452_v54  ;;  %v3361_v6 = vpack.c.bf16 %v5232_v7, %v5230_v49  ;;  %v5229_v17 = vld [vmem:[%s9890_s0 + $0x280] sm:$0xff]  ;;  %v5514_v49 = vld [vmem:[%s9892_s2 + $0x128] ss:$16 sps:$4 sm:$0xff]  }
 0x201   :  { %2227 = vmatprep.subr.bf16.mxu0 %v1205_v59  ;;  %3393 = vmatpush2.bf16.msra.mxu1 %v3366_v48  ;;  %v3360_v22 = vpack.c.bf16 %v5231_v36, %v5229_v17  ;;  %v5463_v54 = vld [vmem:[%s9892_s2 + $0x200] ss:$16 sps:$4 sm:$0xff]   ;;  %v5468_v59 = vld [vmem:[%s9892_s2 + $0x2c] ss:$16 sps:$4 sm:$0xff]   ;;  %v5518_v17 = vld [vmem:[%s9892_s2 + $0x344] ss:$16 sps:$4 sm:$0xff]  }
 0x202   :  { %3394 = vmatprep.subr.bf16.mxu1 %v3365_v20  ;;  %2758 = vperm.xlu0 %5312, %v224_v11   ;;  %v5498_v48 = vld [vmem:[%s9892_s2 + $0xcc] ss:$16 sps:$4 sm:$0xff]   ;;  %v5517_v7 = vld [vmem:[%s9892_s2 + $0x320] ss:$16 sps:$4 sm:$0xff]   ;;  %v5526_v32 = vld [vmem:[%s9892_s2 + $0x168] ss:$16 sps:$4 sm:$0xff]  }
 0x203   :  { %2783 = vperm.xlu1 %5313, %v229_v14   ;;  %v5504_v20 = vld [vmem:[%s9892_s2 + $0xec] ss:$16 sps:$4 sm:$0xff]   ;;  %v5523_v11 = vld [vmem:[%s9892_s2 + $0x340] ss:$16 sps:$4 sm:$0xff]  }
 0x204   :  { %2228 = vmatpush2.bf16.msra.mxu0 %v1204_v25  ;;  %v5472_v25 = vld [vmem:[%s9892_s2 + $0x48] ss:$16 sps:$4 sm:$0xff]   ;;  %v5522_v36 = vld [vmem:[%s9892_s2 + $0x14c] ss:$16 sps:$4 sm:$0xff]  }
 0x205   :  { %2229 = vmatprep.subr.bf16.mxu0 %v1203_v55  ;;  %3395 = vmatpush2.bf16.msra.mxu1 %v3364_v28  ;;  %v5480_v55 = vld [vmem:[%s9892_s2 + $0x6c] ss:$16 sps:$4 sm:$0xff]   ;;  %v5505_v28 = vld [vmem:[%s9892_s2 + $0x2e0] ss:$16 sps:$4 sm:$0xff]  }
 0x206   :  { %3396 = vmatprep.subr.bf16.mxu1 %v3363_v58  ;;  %2768 = vperm.xlu0 %5312, %v226_v16   ;;  %v5512_v58 = vld [vmem:[%s9892_s2 + $0x324] ss:$16 sps:$4 sm:$0xff]  }
 0x207   :  { %2025 = vmatmul.mubr.bf16.gmra.mxu1 %v5454_v56  ;;  %v5482_v56 = vld [vmem:[%s9892_s2 + $0x284] ss:$16 sps:$4 sm:$0xff]   ;;  %2793 = vperm.xlu1 %5313, %v231_v39   ;;  %v247_v39 = vld [vmem:[%s9893_s3 + $0x128] sm:$0xff] }
 0x208   :  { %2230 = vmatpush2.bf16.msra.mxu0 %v1202_v37  ;;  %2034 = vmatprep.mubr.bf16.mxu1 %v5455_v12  ;;  %v5484_v37 = vld [vmem:[%s9892_s2 + $0x88] ss:$16 sps:$4 sm:$0xff]   ;;  %v5487_v12 = vld [vmem:[%s9892_s2 + $0x280] ss:$16 sps:$4 sm:$0xff]  }
 0x209   :  { %2231 = vmatprep.subr.bf16.mxu0 %v1201_v41  ;;  %3397 = vmatpush2.bf16.msra.mxu1 %v3362_v61  ;;  %v5492_v41 = vld [vmem:[%s9892_s2 + $0xac] ss:$16 sps:$4 sm:$0xff]   ;;  %v244_v16 = vld [vmem:[%s9893_s3 + $0x110] sm:$0xff] }
 0x20a   :  { %3398 = vmatprep.subr.bf16.mxu1 %v3361_v6  ;;  %2778 = vperm.xlu0 %5312, %v228_v21   ;;  %v241_v6 = vld [vmem:[%s9893_s3 + $0xf8] sm:$0xff]  ;;  %v5532_v21 = vld [vmem:[%s9892_s2 + $0x384] ss:$16 sps:$4 sm:$0xff]  }
 0x20b   :  { %2803 = vperm.xlu1 %5313, %v233_v26  }
 0x20c   :  { %2232 = vmatpush2.bf16.msra.mxu0 %v1200_v43  ;;  %v234_v43 = vld [vmem:[%s9893_s3 + $0xc0] sm:$0xff] }
 0x20d   :  { %2233 = vmatprep.subr.bf16.mxu0 %v1199_v46  ;;  %3399 = vmatpush2.bf16.msra.mxu1 %v3360_v22  ;;  %v5500_v46 = vld [vmem:[%s9892_s2 + $0x2e4] ss:$16 sps:$4 sm:$0xff]  }
 0x20e   :  { %2788 = vperm.xlu0 %5312, %v230_v31  }
 0x20f   :  { %2035 = vmatmul.mubr.bf16.gmra.mxu1 %v5457_v4  ;;  %2813 = vperm.xlu1 %5313, %v235_v45   ;;  %v237_v4 = vld [vmem:[%s9893_s3 + $0xd8] sm:$0xff] }
 0x210   :  { %2234 = vmatpush2.bf16.msra.mxu0 %v1198_v57  ;;  %2044 = vmatprep.mubr.bf16.mxu1 %v5458_v0  ;;  %v5510_v57 = vld [vmem:[%s9892_s2 + $0x10c] ss:$16 sps:$4 sm:$0xff]   ;;  %v238_v0 = vld [vmem:[%s9893_s3 + $0xe0] sm:$0xff] }
 0x211   :  { %2235 = vmatprep.subr.bf16.mxu0 %v1197_v40  ;;  %v5511_v40 = vld [vmem:[%s9892_s2 + $0x300] ss:$16 sps:$4 sm:$0xff]   ;;  %v5547_v45 = vld [vmem:[%s9892_s2 + $0x1cc] ss:$16 sps:$4 sm:$0xff]  }
 0x212   :  { %2798 = vperm.xlu0 %5312, %v232_v52  }
 0x213   :  { %2823 = vperm.xlu1 %5313, %v237_v4   ;;  %v5542_v4 = vld [vmem:[%s9892_s2 + $0x3c0] ss:$16 sps:$4 sm:$0xff]  }
 0x214   :  { %2236 = vmatpush2.bf16.msra.mxu0 %v1196_v51 }
 0x216   :  { %2808 = vperm.xlu0 %5312, %v234_v43   ;;  %v5539_v43 = vld [vmem:[%s9892_s2 + $0x1a8] ss:$16 sps:$4 sm:$0xff]  }
 0x217   :  { %2045 = vmatmul.mubr.bf16.gmra.mxu1 %v5463_v54  ;;  %2238 = vmatmul.mubr.bf16.vlgmr.msra.gmra.mxu0 %v5460_v2  ;;  %v242_v54 = vld [vmem:[%s9893_s3 + $0x100] sm:$0xff] }
 0x218   :  { %2054 = vmatprep.mubr.bf16.mxu1 %v5464_v8  ;;  %2247 = vmatprep.mubr.bf16.mxu0 %v5468_v59  ;;  %v5520_v59 = vld [vmem:[%s9892_s2 + $0x148] ss:$16 sps:$4 sm:$0xff]  }
 0x219   :  { %2833 = vperm.xlu1 %5313, %v239_v35  }
 0x21a   :  { %2818 = vperm.xlu0 %5312, %v236_v3   ;;  %v250_v3 = vld [vmem:[%s9893_s3 + $0x140] sm:$0xff] }
 0x21d   :  { %2843 = vperm.xlu1 %5313, %v241_v6   ;;  %v253_v6 = vld [vmem:[%s9893_s3 + $0x158] sm:$0xff] }
 0x21e   :  { %2828 = vperm.xlu0 %5312, %v238_v0   ;;  %v5550_v0 = vld [vmem:[%s9892_s2 + $0x3e4] ss:$16 sps:$4 sm:$0xff]  }
 0x21f   :  { %2055 = vmatmul.mubr.bf16.gmra.mxu1 %v5469_v19  ;;  %2248 = vmatmul.mubr.bf16.gmra.mxu0 %v5466_v63  ;;  %v243_v63 = vld [vmem:[%s9893_s3 + $0x108] sm:$0xff]  ;;  %v5524_v19 = vld [vmem:[%s9892_s2 + $0x364] ss:$16 sps:$4 sm:$0xff]  }
 0x220   :  { %2064 = vmatprep.mubr.bf16.mxu1 %v5470_v5  ;;  %2257 = vmatprep.mubr.bf16.mxu0 %v5474_v13 }
 0x221   :  { %2853 = vperm.xlu1 %5313, %v243_v63  }
 0x222   :  { %2838 = vperm.xlu0 %5312, %v240_v53  }
 0x226   :  { %2848 = vperm.xlu0 %5312, %v242_v54  }
 0x227   :  { %2065 = vmatmul.mubr.bf16.gmra.mxu1 %v5475_v27  ;;  %2258 = vmatmul.mubr.bf16.gmra.mxu0 %v5472_v25 }
 0x228   :  { %2074 = vmatprep.mubr.bf16.mxu1 %v5476_v33  ;;  %2267 = vmatprep.mubr.bf16.mxu0 %v5480_v55  ;;  %v5529_v33 = vld [vmem:[%s9892_s2 + $0x360] ss:$16 sps:$4 sm:$0xff]   ;;  %v245_v55 = vld [vmem:[%s9893_s3 + $0x118] sm:$0xff] }
 0x229   :  { %2863 = vperm.xlu1 %5313, %v245_v55  }
 0x22a   :  { %2858 = vperm.xlu0 %5312, %v244_v16   ;;  %v255_v16 = vld [vmem:[%s9893_s3 + $0x168] sm:$0xff] }
 0x22d   :  { %2873 = vperm.xlu1 %5313, %v247_v39   ;;  %v5557_v39 = vld [vmem:[%s9892_s2 + $0x228] ss:$16 sps:$4 sm:$0xff]  }
 0x22f   :  { %2075 = vmatmul.mubr.bf16.gmra.mxu1 %v5481_v34  ;;  %2268 = vmatmul.mubr.bf16.gmra.mxu0 %v5478_v18  ;;  %v5535_v18 = vld [vmem:[%s9892_s2 + $0x18c] ss:$16 sps:$4 sm:$0xff]  }
 0x230   :  { %2084 = vmatprep.mubr.bf16.mxu1 %v5482_v56  ;;  %2277 = vmatprep.mubr.bf16.mxu0 %v5486_v24  ;;  %v246_v56 = vld [vmem:[%s9893_s3 + $0x120] sm:$0xff] }
 0x231   :  { %2868 = vperm.xlu0 %5312, %v246_v56   ;;  %v5604_v56 = vld [vmem:[%s9891_s1 + $0x14] ss:$8 sps:$4 sm:$0xff]  }
 0x237   :  { %2085 = vmatmul.mubr.bf16.gmra.mxu1 %v5487_v12  ;;  %2278 = vmatmul.mubr.bf16.gmra.mxu0 %v5484_v37  ;;  %v5530_v37 = vld [vmem:[%s9892_s2 + $0x380] ss:$16 sps:$4 sm:$0xff]   ;;  %v5533_v12 = vld [vmem:[%s9892_s2 + $0x188] ss:$16 sps:$4 sm:$0xff]  }
 0x238   :  { %2094 = vmatprep.mubr.bf16.mxu1 %v5488_v23  ;;  %2287 = vmatprep.mubr.bf16.mxu0 %v5492_v41  ;;  %v5538_v23 = vld [vmem:[%s9892_s2 + $0x3a4] ss:$16 sps:$4 sm:$0xff]   ;;  %v5541_v41 = vld [vmem:[%s9892_s2 + $0x1ac] ss:$16 sps:$4 sm:$0xff]  }
 0x23f   :  { %2095 = vmatmul.mubr.bf16.gmra.mxu1 %v5493_v15  ;;  %2288 = vmatmul.mubr.bf16.gmra.mxu0 %v5490_v9  ;;  %v248_v15 = vld [vmem:[%s9893_s3 + $0x130] sm:$0xff] }
 0x240   :  { %2104 = vmatprep.mubr.bf16.mxu1 %v5494_v60  ;;  %2297 = vmatprep.mubr.bf16.mxu0 %v5498_v48  ;;  %v5536_v48 = vld [vmem:[%s9892_s2 + $0x3a0] ss:$16 sps:$4 sm:$0xff]  }
 0x241   :  { %2878 = vperm.xlu0 %5312, %v248_v15  }
 0x245   :  { %2888 = vperm.xlu0 %5312, %v250_v3  }
 0x247   :  { %2105 = vmatmul.mubr.bf16.gmra.mxu1 %v5499_v50  ;;  %2298 = vmatmul.mubr.bf16.gmra.mxu0 %v5496_v44  ;;  %v249_v44 = vld [vmem:[%s9893_s3 + $0x138] sm:$0xff]  ;;  %v5544_v50 = vld [vmem:[%s9892_s2 + $0x3c4] ss:$16 sps:$4 sm:$0xff]  }
 0x248   :  { %2114 = vmatprep.mubr.bf16.mxu1 %v5500_v46  ;;  %2307 = vmatprep.mubr.bf16.mxu0 %v5504_v20 }
 0x249   :  { %2883 = vperm.xlu1 %5313, %v249_v44   ;;  %v258_v44 = vld [vmem:[%s9893_s3 + $0x180] sm:$0xff] }
 0x24f   :  { %2115 = vmatmul.mubr.bf16.gmra.mxu1 %v5505_v28  ;;  %2308 = vmatmul.mubr.bf16.gmra.mxu0 %v5502_v47 }
 0x250   :  { %2124 = vmatprep.mubr.bf16.mxu1 %v5506_v42  ;;  %2317 = vmatprep.mubr.bf16.mxu0 %v5510_v57  ;;  %v5545_v42 = vld [vmem:[%s9892_s2 + $0x1c8] ss:$16 sps:$4 sm:$0xff]  }
 0x251   :  { %v251_v57 = vld [vmem:[%s9893_s3 + $0x148] sm:$0xff] }
 0x252   :  { %2893 = vperm.xlu1 %5313, %v251_v57   ;;  %v5565_v57 = vld [vmem:[%s9892_s2 + $0x26c] ss:$16 sps:$4 sm:$0xff]  }
 0x256   :  { %2903 = vperm.xlu1 %5313, %v253_v6  }
 0x257   :  { %v6954_v1 = vpop.f32.mrf.mxu1  ;;  %2125 = vmatmul.mubr.bf16.gmra.mxu1 %v5511_v40  ;;  %2318 = vmatmul.mubr.bf16.gmra.mxu0 %v5508_v30  ;;  %v5553_v30 = vld [vmem:[%s9892_s2 + $0x1ec] ss:$16 sps:$4 sm:$0xff]  }
 0x258   :  { %2134 = vmatprep.mubr.bf16.mxu1 %v5512_v58  ;;  %2327 = vmatprep.mubr.bf16.mxu0 %v5516_v62  ;;  %v252_v58 = vld [vmem:[%s9893_s3 + $0x150] sm:$0xff] }
 0x259   :  { %v6959_v61 = vpop.f32.mrf.mxu1  ;;  %2898 = vperm.xlu0 %5312, %v252_v58   ;;  %v5607_v58 = vld [vmem:[%s9891_s1 + $0x20] ss:$8 sps:$4 sm:$0xff]  }
 0x25a   :  { %2913 = vperm.xlu1 %5313, %v255_v16  }
 0x25b   :  { %v6961_v51 = vpop.f32.mrf.mxu1 }
 0x25d   :  { %v6978_v22 = vpop.f32.mrf.mxu1 }
 0x25f   :  { %v6980_v2 = vpop.f32.mrf.mxu1  ;;  %2135 = vmatmul.mubr.bf16.gmra.mxu1 %v5517_v7  ;;  %2328 = vmatmul.mubr.bf16.gmra.mxu0 %v5514_v49  ;;  %v5548_v49 = vld [vmem:[%s9892_s2 + $0x3e0] ss:$16 sps:$4 sm:$0xff]   ;;  %v5551_v7 = vld [vmem:[%s9892_s2 + $0x1e8] ss:$16 sps:$4 sm:$0xff]  }
 0x260   :  { %2144 = vmatprep.mubr.bf16.mxu1 %v5518_v17  ;;  %2337 = vmatprep.mubr.bf16.mxu0 %v5522_v36  ;;  %v5556_v17 = vld [vmem:[%s9892_s2 + $0x20c] ss:$16 sps:$4 sm:$0xff]  }
 0x261   :  { %v6985_v10 = vpop.f32.mrf.mxu1 }
 0x263   :  { %v6987_v8 = vpop.f32.mrf.mxu1 }
 0x265   :  { %v7004_v5 = vpop.f32.mrf.mxu1 }
 0x267   :  { %v7006_v13 = vpop.f32.mrf.mxu1  ;;  %2145 = vmatmul.mubr.bf16.gmra.mxu1 %v5523_v11  ;;  %2338 = vmatmul.mubr.bf16.gmra.mxu0 %v5520_v59  ;;  %v254_v59 = vld [vmem:[%s9893_s3 + $0x160] sm:$0xff] }
 0x268   :  { %2154 = vmatprep.mubr.bf16.mxu1 %v5524_v19  ;;  %2347 = vmatprep.mubr.bf16.mxu0 %v5528_v38  ;;  %v5602_v11 = vld [vmem:[%s9891_s1 + $0x4] ss:$8 sps:$4 sm:$0xff]   ;;  %v5554_v38 = vld [vmem:[%s9892_s2 + $0x208] ss:$16 sps:$4 sm:$0xff]  }
 0x269   :  { %v7011_v25 = vpop.f32.mrf.mxu1  ;;  %2908 = vperm.xlu0 %5312, %v254_v59   ;;  %v5563_v59 = vld [vmem:[%s9892_s2 + $0x268] ss:$16 sps:$4 sm:$0xff]  }
 0x26b   :  { %v7013_v27 = vpop.f32.mrf.mxu1 }
 0x26d   :  { %v7030_v34 = vpop.f32.mrf.mxu1 }
 0x26f   :  { %v7032_v14 = vpop.f32.mrf.mxu1  ;;  %2155 = vmatmul.mubr.bf16.gmra.mxu1 %v5529_v33  ;;  %2348 = vmatmul.mubr.bf16.gmra.mxu0 %v5526_v32  ;;  %v5559_v32 = vld [vmem:[%s9892_s2 + $0x22c] ss:$16 sps:$4 sm:$0xff]  }
 0x270   :  { %2164 = vmatprep.mubr.bf16.mxu1 %v5532_v21  ;;  %2357 = vmatprep.mubr.bf16.mxu0 %v5535_v18  ;;  %v5603_v21 = vld [vmem:[%s9891_s1] ss:$8 sps:$4 sm:$0xff]   ;;  %v256_v18 = vld [vmem:[%s9893_s3 + $0x170] sm:$0xff] }
 0x271   :  { %v7037_v24 = vpop.f32.mrf.mxu1  ;;  %2918 = vperm.xlu0 %5312, %v256_v18   ;;  %v262_v18 = vld [vmem:[%s9893_s3 + $0x1a0] sm:$0xff] }
 0x273   :  { %v7039_v31 = vpop.f32.mrf.mxu1 }
 0x275   :  { %v7056_v52 = vpop.f32.mrf.mxu1  ;;  %2928 = vperm.xlu0 %5312, %v258_v44   ;;  %v5571_v44 = vld [vmem:[%s9892_s2 + $0x2ac] ss:$16 sps:$4 sm:$0xff]  }
 0x277   :  { %v7058_v9 = vpop.f32.mrf.mxu1  ;;  %2165 = vmatmul.mubr.bf16.gmra.mxu1 %v5530_v37  ;;  %2358 = vmatmul.mubr.bf16.gmra.mxu0 %v5533_v12 }
 0x278   :  { %2174 = vmatprep.mubr.bf16.mxu1 %v5538_v23  ;;  %2367 = vmatprep.mubr.bf16.mxu0 %v5541_v41  ;;  %v257_v23 = vld [vmem:[%s9893_s3 + $0x178] sm:$0xff] }
 0x279   :  { %v7063_v26 = vpop.f32.mrf.mxu1  ;;  %v5562_v41 = vld [vmem:[%s9892_s2 + $0x24c] ss:$16 sps:$4 sm:$0xff]   ;;  %2923 = vperm.xlu1 %5313, %v257_v23  }
 0x27b   :  { %v7065_v60 = vpop.f32.mrf.mxu1 }
 0x27d   :  { %v7082_v46 = vpop.f32.mrf.mxu1 }
 0x27f   :  { %v7084_v20 = vpop.f32.mrf.mxu1  ;;  %2175 = vmatmul.mubr.bf16.gmra.mxu1 %v5536_v48  ;;  %2368 = vmatmul.mubr.bf16.gmra.mxu0 %v5539_v43  ;;  %v5605_v43 = vld [vmem:[%s9891_s1 + $0x10] ss:$8 sps:$4 sm:$0xff]  }
 0x280   :  { %2184 = vmatprep.mubr.bf16.mxu1 %v5544_v50  ;;  %2377 = vmatprep.mubr.bf16.mxu0 %v5547_v45  ;;  %v5606_v50 = vld [vmem:[%s9891_s1 + $0x24] ss:$8 sps:$4 sm:$0xff]  }
 0x281   :  { %v7089_v47 = vpop.f32.mrf.mxu1 }
 0x283   :  { %v7091_v28 = vpop.f32.mrf.mxu1 }
 0x285   :  { %v7108_v40 = vpop.f32.mrf.mxu1 }
 0x287   :  { %v7110_v35 = vpop.f32.mrf.mxu1  ;;  %2185 = vmatmul.mubr.bf16.gmra.mxu1 %v5542_v4  ;;  %2378 = vmatmul.mubr.bf16.gmra.mxu0 %v5545_v42  ;;  %v5560_v4 = vld [vmem:[%s9892_s2 + $0x248] ss:$16 sps:$4 sm:$0xff]  }
 0x288   :  { %2194 = vmatprep.mubr.bf16.mxu1 %v5550_v0  ;;  %2387 = vmatprep.mubr.bf16.mxu0 %v5553_v30  ;;  %v259_v42 = vld [vmem:[%s9893_s3 + $0x188] sm:$0xff] }
 0x289   :  { %v7115_v62 = vpop.f32.mrf.mxu1  ;;  %2933 = vperm.xlu1 %5313, %v259_v42   ;;  %v5611_v42 = vld [vmem:[%s9891_s1 + $0x40] ss:$8 sps:$4 sm:$0xff]  }
 0x28b   :  { %v7117_v53 = vpop.f32.mrf.mxu1 }
 0x28d   :  { %v7131_v36 = vpop.f32.mrf.mxu1 }
 0x28f   :  { %v7133_v54 = vpop.f32.mrf.mxu1  ;;  %2195 = vmatmul.mubr.bf16.gmra.mxu1 %v5548_v49  ;;  %2388 = vmatmul.mubr.bf16.gmra.mxu0 %v5551_v7  ;;  %v260_v49 = vld [vmem:[%s9893_s3 + $0x190] sm:$0xff] }
 0x290   :  { %2397 = vmatprep.mubr.bf16.mxu0 %v5556_v17  ;;  %5245 = vmatprep.mubr.msk.bf16.mxu1 %vm634_vm0, %v5602_v11  ;;  %v5608_v7 = vld [vmem:[%s9891_s1 + $0x34] ss:$8 sps:$4 sm:$0xff]  }
 0x291   :  { %v7142_v63 = vpop.f32.mrf.mxu1  ;;  %2938 = vperm.xlu0 %5312, %v260_v49   ;;  %v261_v11 = vld [vmem:[%s9893_s3 + $0x198] sm:$0xff] }
 0x292   :  { %2943 = vperm.xlu1 %5313, %v261_v11   ;;  %v265_v11 = vld [vmem:[%s9893_s3 + $0x1b8] sm:$0xff] }
 0x293   :  { %v7144_v19 = vpop.f32.mrf.mxu1 }
 0x295   :  { %v7155_v33 = vpop.f32.mrf.mxu1  ;;  %2948 = vperm.xlu0 %5312, %v262_v18  }
 0x297   :  { %v7157_v55 = vpop.f32.mrf.mxu1  ;;  %2398 = vmatmul.mubr.bf16.gmra.mxu0 %v5554_v38  ;;  %3401 = vmatmul.mubr.bf16.vlgmr.msra.gmra.mxu1 %v5603_v21  ;;  %v5568_v38 = vld [vmem:[%s9892_s2 + $0x28c] ss:$16 sps:$4 sm:$0xff]   ;;  %v5609_v21 = vld [vmem:[%s9891_s1 + $0x30] ss:$8 sps:$4 sm:$0xff]  }
 0x298   :  { %2407 = vmatprep.mubr.bf16.mxu0 %v5559_v32  ;;  %5246 = vmatprep.mubr.msk.bf16.mxu1 %vm634_vm0, %v5604_v56  ;;  %v5610_v56 = vld [vmem:[%s9891_s1 + $0x44] ss:$8 sps:$4 sm:$0xff]  }
 0x299   :  { %v7169_v37 = vpop.f32.mrf.mxu1 }
 0x29b   :  { %v7171_v12 = vpop.f32.mrf.mxu1 }
 0x29d   :  { %v7182_v15 = vpop.f32.mrf.mxu1 }
 0x29f   :  { %v7184_v48 = vpop.f32.mrf.mxu1  ;;  %2408 = vmatmul.mubr.bf16.gmra.mxu0 %v5557_v39  ;;  %3411 = vmatmul.mubr.bf16.gmra.mxu1 %v5605_v43  ;;  %v263_v43 = vld [vmem:[%s9893_s3 + $0x1a8] sm:$0xff] }
 0x2a0   :  { %2417 = vmatprep.mubr.bf16.mxu0 %v5562_v41  ;;  %5247 = vmatprep.mubr.msk.bf16.mxu1 %vm634_vm0, %v5606_v50  ;;  %v5566_v41 = vld [vmem:[%s9892_s2 + $0x288] ss:$16 sps:$4 sm:$0xff]  }
 0x2a1   :  { %v7196_v45 = vpop.f32.mrf.mxu1  ;;  %2953 = vperm.xlu1 %5313, %v263_v43   ;;  %v5614_v43 = vld [vmem:[%s9891_s1 + $0x64] ss:$8 sps:$4 sm:$0xff]  }
 0x2a3   :  { %v7198_v3 = vpop.f32.mrf.mxu1 }
 0x2a5   :  { %v7209_v0 = vpop.f32.mrf.mxu1  ;;  %2963 = vperm.xlu1 %5313, %v265_v11  }
 0x2a7   :  { %v7211_v30 = vpop.f32.mrf.mxu1  ;;  %2418 = vmatmul.mubr.bf16.gmra.mxu0 %v5560_v4  ;;  %3421 = vmatmul.mubr.bf16.gmra.mxu1 %v5607_v58  ;;  %v5612_v58 = vld [vmem:[%s9891_s1 + $0x54] ss:$8 sps:$4 sm:$0xff]  }
 0x2a8   :  { %2427 = vmatprep.mubr.bf16.mxu0 %v5565_v57  ;;  %5248 = vmatprep.mubr.msk.bf16.mxu1 %vm634_vm0, %v5608_v7  ;;  %v264_v57 = vld [vmem:[%s9893_s3 + $0x1b0] sm:$0xff] }
 0x2a9   :  { %v7223_v6 = vpop.f32.mrf.mxu1  ;;  %2958 = vperm.xlu0 %5312, %v264_v57   ;;  %v5572_v57 = vld [vmem:[%s9892_s2 + $0x2c8] ss:$16 sps:$4 sm:$0xff]  }
 0x2ab   :  { %v7225_v17 = vpop.f32.mrf.mxu1 }
 0x2ad   :  { %v7236_v16 = vpop.f32.mrf.mxu1 }
 0x2af   :  { %v7238_v32 = vpop.f32.mrf.mxu1  ;;  %2428 = vmatmul.mubr.bf16.gmra.mxu0 %v5563_v59  ;;  %3431 = vmatmul.mubr.bf16.gmra.mxu1 %v5609_v21  ;;  %v5569_v59 = vld [vmem:[%s9892_s2 + $0x2a8] ss:$16 sps:$4 sm:$0xff]  }
 0x2b0   :  { %2437 = vmatprep.mubr.bf16.mxu0 %v5568_v38  ;;  %5249 = vmatprep.mubr.msk.bf16.mxu1 %vm634_vm0, %v5610_v56  ;;  %v5574_v38 = vld [vmem:[%s9892_s2 + $0x2cc] ss:$16 sps:$4 sm:$0xff]   ;;  %v5613_v56 = vld [vmem:[%s9891_s1 + $0x50] ss:$8 sps:$4 sm:$0xff]  }
 0x2b1   :  { %v7250_v39 = vpop.f32.mrf.mxu1 }
 0x2b3   :  { %v7252_v23 = vpop.f32.mrf.mxu1 }
 0x2b5   :  { %v7263_v50 = vpop.f32.mrf.mxu1 }
 0x2b7   :  { %v7265_v4 = vpop.f32.mrf.mxu1  ;;  %2438 = vmatmul.mubr.bf16.gmra.mxu0 %v5566_v41  ;;  %3441 = vmatmul.mubr.bf16.gmra.mxu1 %v5611_v42  ;;  %v266_v41 = vld [vmem:[%s9893_s3 + $0x1c0] sm:$0xff] }
 0x2b8   :  { %2447 = vmatprep.mubr.bf16.mxu0 %v5571_v44  ;;  %5250 = vmatprep.mubr.msk.bf16.mxu1 %vm634_vm0, %v5612_v58  ;;  %v267_v58 = vld [vmem:[%s9893_s3 + $0x1c8] sm:$0xff] }
 0x2b9   :  { %v7277_v49 = vpop.f32.mrf.mxu1  ;;  %2968 = vperm.xlu0 %5312, %v266_v41   ;;  %2973 = vperm.xlu1 %5313, %v267_v58   ;;  %v268_v41 = vld [vmem:[%s9893_s3 + $0x1d0] sm:$0xff] }
 0x2ba   :  { %10036 = vst [vmem:[#allocation2_spill] sm:$0xff] %v7277_v49 }
 0x2bb   :  { %v7279_v7 = vpop.f32.mrf.mxu1 }
 0x2bc   :  { %10037 = vst [vmem:[#allocation3_spill] sm:$0xff] %v7279_v7  ;;  %v5621_v7 = vld [vmem:[%s9891_s1 + $0x90] ss:$8 sps:$4 sm:$0xff]  }
 0x2bd   :  { %v7290_v21 = vpop.f32.mrf.mxu1  ;;  %2978 = vperm.xlu0 %5312, %v268_v41   ;;  %2983 = vperm.xlu1 %5313, %v269_v29   ;;  %v5617_v41 = vld [vmem:[%s9891_s1 + $0x70] ss:$8 sps:$4 sm:$0xff]  }
 0x2be   :  { %10038 = vst [vmem:[#allocation4_spill] sm:$0xff] %v7290_v21  ;;  %v7408_v21 = vpop.permute.xlu1 %2698 }
 0x2bf   :  { %v7292_v18 = vpop.f32.mrf.mxu1  ;;  %2448 = vmatmul.mubr.bf16.gmra.mxu0 %v5569_v59  ;;  %3451 = vmatmul.mubr.bf16.gmra.mxu1 %v5613_v56  ;;  %v5577_v59 = vld [vmem:[%s9892_s2 + $0x2ec] ss:$16 sps:$4 sm:$0xff]   ;;  %v5615_v56 = vld [vmem:[%s9891_s1 + $0x60] ss:$8 sps:$4 sm:$0xff]   ;;  %10057 = vst [vmem:[#allocation23_spill] sm:$0xff] %v7408_v21 }
 0x2c0   :  { %10039 = vst [vmem:[#allocation5_spill] sm:$0xff] %v7292_v18  ;;  %2457 = vmatprep.mubr.bf16.mxu0 %v5574_v38  ;;  %5251 = vmatprep.mubr.msk.bf16.mxu1 %vm634_vm0, %v5614_v43  ;;  %v5616_v43 = vld [vmem:[%s9891_s1 + $0x74] ss:$8 sps:$4 sm:$0xff]  }
 0x2c1   :  { %v7304_v44 = vpop.f32.mrf.mxu1 }
 0x2c2   :  { %10040 = vst [vmem:[#allocation6_spill] sm:$0xff] %v7304_v44 }
 0x2c3   :  { %v7306_v42 = vpop.f32.mrf.mxu1 }
 0x2c4   :  { %10041 = vst [vmem:[#allocation7_spill] sm:$0xff] %v7306_v42 }
 0x2c5   :  { %v7317_v11 = vpop.f32.mrf.mxu1 }
 0x2c6   :  { %10042 = vst [vmem:[#allocation8_spill] sm:$0xff] %v7317_v11  ;;  %v272_v11 = vld [vmem:[%s9893_s3 + $0x1f0] sm:$0xff] }
 0x2c7   :  { %v7319_v38 = vpop.f32.mrf.mxu1  ;;  %2458 = vmatmul.mubr.bf16.gmra.mxu0 %v5572_v57  ;;  %3461 = vmatmul.mubr.bf16.gmra.mxu1 %v5615_v56  ;;  %v5575_v56 = vld [vmem:[%s9892_s2 + $0x2e8] ss:$16 sps:$4 sm:$0xff]  }
 0x2c8   :  { %10043 = vst [vmem:[#allocation9_spill] sm:$0xff] %v7319_v38  ;;  %2467 = vmatprep.mubr.bf16.mxu0 %v5577_v59  ;;  %5252 = vmatprep.mubr.msk.bf16.mxu1 %vm634_vm0, %v5616_v43  ;;  %v5580_v59 = vld [vmem:[%s9892_s2 + $0x30c] ss:$16 sps:$4 sm:$0xff]  }
 0x2c9   :  { %v7331_v58 = vpop.f32.mrf.mxu1 }
 0x2ca   :  { %10044 = vst [vmem:[#allocation10_spill] sm:$0xff] %v7331_v58  ;;  %v5618_v58 = vld [vmem:[%s9891_s1 + $0x84] ss:$8 sps:$4 sm:$0xff]  }
 0x2cb   :  { %v7333_v57 = vpop.f32.mrf.mxu1 }
 0x2cc   :  { %10045 = vst [vmem:[#allocation11_spill] sm:$0xff] %v7333_v57  ;;  %v270_v57 = vld [vmem:[%s9893_s3 + $0x1e0] sm:$0xff] }
 0x2cd   :  { %v7344_v38 = vpop.f32.mrf.mxu1  ;;  %2988 = vperm.xlu0 %5312, %v270_v57  }
 0x2ce   :  { %10046 = vst [vmem:[#allocation12_spill] sm:$0xff] %v7344_v38 }
 0x2cf   :  { %v7346_v43 = vpop.f32.mrf.mxu1  ;;  %2468 = vmatmul.mubr.bf16.gmra.mxu0 %v5575_v56  ;;  %3471 = vmatmul.mubr.bf16.gmra.mxu1 %v5617_v41  ;;  %v5578_v41 = vld [vmem:[%s9892_s2 + $0x308] ss:$16 sps:$4 sm:$0xff]  }
 0x2d0   :  { %10047 = vst [vmem:[#allocation13_spill] sm:$0xff] %v7346_v43  ;;  %2477 = vmatprep.mubr.bf16.mxu0 %v5580_v59  ;;  %5253 = vmatprep.mubr.msk.bf16.mxu1 %vm634_vm0, %v5618_v58  ;;  %v271_v43 = vld [vmem:[%s9893_s3 + $0x1e8] sm:$0xff]  ;;  %v7373_v58 = vpop.permute.xlu0 %2688 }
 0x2d1   :  { %v7358_v29 = vpop.f32.mrf.mxu1  ;;  %v5583_v59 = vld [vmem:[%s9892_s2 + $0x32c] ss:$16 sps:$4 sm:$0xff]   ;;  %2993 = vperm.xlu1 %5313, %v271_v43   ;;  %10051 = vst [vmem:[#allocation17_spill] sm:$0xff] %v7373_v58  ;;  %2998 = vperm.xlu0 %5312, %v272_v11  }
 0x2d2   :  { %10048 = vst [vmem:[#allocation14_spill] sm:$0xff] %v7358_v29  ;;  %v5619_v29 = vld [vmem:[%s9891_s1 + $0x80] ss:$8 sps:$4 sm:$0xff]   ;;  %v5620_v43 = vld [vmem:[%s9891_s1 + $0x94] ss:$8 sps:$4 sm:$0xff]  }
 0x2d3   :  { %v7360_v56 = vpop.f32.mrf.mxu1 }
 0x2d4   :  { %10049 = vst [vmem:[#allocation15_spill] sm:$0xff] %v7360_v56  ;;  %v7397_v18 = vpop.permute.xlu0 %2693 }
 0x2d5   :  { %v7371_v38 = vpop.f32.mrf.mxu1  ;;  %10055 = vst [vmem:[#allocation21_spill] sm:$0xff] %v7397_v18 }
 0x2d6   :  { %10050 = vst [vmem:[#allocation16_spill] sm:$0xff] %v7371_v38 }
 0x2d7   :  { %v7375_v57 = vpop.f32.mrf.mxu1  ;;  %v2239_v56 = vpop.f32.mrf.mxu0  ;;  %2478 = vmatmul.mubr.bf16.gmra.mxu0 %v5578_v41  ;;  %3481 = vmatmul.mubr.bf16.gmra.mxu1 %v5619_v29 }
 0x2d8   :  { %10052 = vst [vmem:[#allocation18_spill] sm:$0xff] %v7375_v57  ;;  %v2240_v42 = vadd.f32 %v2239_v56, %v6954_v1  ;;  %2487 = vmatprep.mubr.bf16.mxu0 %v5583_v59  ;;  %5254 = vmatprep.mubr.msk.bf16.mxu1 %vm634_vm0, %v5620_v43  ;;  %v5581_v1 = vld [vmem:[%s9892_s2 + $0x328] ss:$16 sps:$4 sm:$0xff]   ;;  %v5586_v43 = vld [vmem:[%s9892_s2 + $0x34c] ss:$16 sps:$4 sm:$0xff]  }
 0x2d9   :  { %v7388_v38 = vpop.f32.mrf.mxu1  ;;  %v2241_v41 = vpop.f32.mrf.mxu0 }
 0x2da   :  { %10053 = vst [vmem:[#allocation19_spill] sm:$0xff] %v7388_v38  ;;  %v2242_v57 = vadd.f32 %v2241_v41, %v6959_v61  ;;  %v2558_v56 = vmax.f32 %v2240_v42, 0.0  ;;  %v273_v61 = vld [vmem:[%s9893_s3 + $0x1f8] sm:$0xff] }
 0x2db   :  { %v7391_v29 = vpop.f32.mrf.mxu1  ;;  %v2243_v44 = vpop.f32.mrf.mxu0  ;;  %3003 = vperm.xlu1 %5313, %v273_v61  }
 0x2dc   :  { %10054 = vst [vmem:[#allocation20_spill] sm:$0xff] %v7391_v29  ;;  %v2244_v59 = vadd.f32 %v2243_v44, %v6961_v51  ;;  %v2559_v11 = vmax.f32 %v2242_v57, 0.0  ;;  %v3006_v57 = vmul.f32 %v7373_v58, %v2558_v56 }
 0x2dd   :  { %v7405_v41 = vpop.f32.mrf.mxu1  ;;  %v2245_v29 = vpop.f32.mrf.mxu0 }
 0x2de   :  { %10056 = vst [vmem:[#allocation22_spill] sm:$0xff] %v7405_v41  ;;  %v2560_v38 = vmax.f32 %v2244_v59, 0.0  ;;  %v2246_v42 = vadd.f32 %v2245_v29, %v6978_v22  ;;  %v5622_v22 = vld [vmem:[%s9891_s1 + $0xa4] ss:$8 sps:$4 sm:$0xff]   ;;  %v3007_v29 = vmul.f32 %v7373_v58, %v2559_v11 }
 0x2df   :  { %v7410_v51 = vpop.f32.mrf.mxu1  ;;  %v2249_v44 = vpop.f32.mrf.mxu0  ;;  %2488 = vmatmul.mubr.bf16.gmra.mxu0 %v5581_v1  ;;  %3491 = vmatmul.mubr.bf16.gmra.mxu1 %v5621_v7 }
 0x2e0   :  { %10058 = vst [vmem:[#allocation24_spill] sm:$0xff] %v7410_v51  ;;  %v2561_v49 = vmax.f32 %v2246_v42, 0.0  ;;  %v3008_v41 = vmul.f32 %v7397_v18, %v2560_v38  ;;  %v2250_v59 = vadd.f32 %v2249_v44, %v6980_v2  ;;  %2497 = vmatprep.mubr.bf16.mxu0 %v5586_v43  ;;  %5255 = vmatprep.mubr.msk.bf16.mxu1 %vm634_vm0, %v5622_v22  ;;  %v5584_v43 = vld [vmem:[%s9892_s2 + $0x348] ss:$16 sps:$4 sm:$0xff]  }
 0x2e1   :  { %v7423_v1 = vpop.f32.mrf.mxu1  ;;  %v2251_v61 = vpop.f32.mrf.mxu0 }
 0x2e2   :  { %10059 = vst [vmem:[#allocation25_spill] sm:$0xff] %v7423_v1  ;;  %v3009_v7 = vmul.f32 %v7397_v18, %v2561_v49  ;;  %v3134_v56 = vadd.f32 %v3008_v41, %v3006_v57  ;;  %v2562_v42 = vmax.f32 %v2250_v59, 0.0  ;;  %v2252_v38 = vadd.f32 %v2251_v61, %v6985_v10  ;;  %v7434_v1 = vpop.permute.xlu1 %2703  ;;  %v5589_v49 = vld [vmem:[%s9892_s2 + $0x36c] ss:$16 sps:$4 sm:$0xff]  }
 0x2e3   :  { %v7427_v51 = vpop.f32.mrf.mxu1  ;;  %v2253_v2 = vpop.f32.mrf.mxu0  ;;  %10060 = vst [vmem:[#allocation26_spill] sm:$0xff] %v7434_v1 }
 0x2e4   :  { %v3203_v44 = vadd.f32 %v3009_v7, %v3007_v29  ;;  %v2563_v22 = vmax.f32 %v2252_v38, 0.0  ;;  %v3010_v11 = vmul.f32 %v7408_v21, %v2562_v42  ;;  %v2254_v58 = vadd.f32 %v2253_v2, %v6987_v8  ;;  %v5623_v8 = vld [vmem:[%s9891_s1 + $0xa0] ss:$8 sps:$4 sm:$0xff]  }
 0x2e5   :  { %v7439_v10 = vpop.f32.mrf.mxu1  ;;  %v2255_v41 = vpop.f32.mrf.mxu0 }
 0x2e6   :  { %10061 = vst [vmem:[#allocation27_spill] sm:$0xff] %v7439_v10  ;;  %v3011_v57 = vmul.f32 %v7408_v21, %v2563_v22  ;;  %v3135_v59 = vadd.f32 %v3134_v56, %v3010_v11  ;;  %v2564_v61 = vmax.f32 %v2254_v58, 0.0  ;;  %v2256_v29 = vadd.f32 %v2255_v41, %v7004_v5  ;;  %v7450_v22 = vpop.permute.xlu0 %2708  ;;  %v5624_v5 = vld [vmem:[%s9891_s1 + $0xb4] ss:$8 sps:$4 sm:$0xff]  }
 0x2e7   :  { %v7443_v7 = vpop.f32.mrf.mxu1  ;;  %v2259_v42 = vpop.f32.mrf.mxu0  ;;  %2498 = vmatmul.mubr.bf16.gmra.mxu0 %v5584_v43  ;;  %3501 = vmatmul.mubr.bf16.gmra.mxu1 %v5623_v8  ;;  %10062 = vst [vmem:[#allocation28_spill] sm:$0xff] %v7450_v22 }
 0x2e8   :  { %v3204_v38 = vadd.f32 %v3203_v44, %v3011_v57  ;;  %v2565_v2 = vmax.f32 %v2256_v29, 0.0  ;;  %v3012_v18 = vmul.f32 %v7434_v1, %v2564_v61  ;;  %v2260_v10 = vadd.f32 %v2259_v42, %v7006_v13  ;;  %2507 = vmatprep.mubr.bf16.mxu0 %v5589_v49  ;;  %5256 = vmatprep.mubr.msk.bf16.mxu1 %vm634_vm0, %v5624_v5  ;;  %v5587_v49 = vld [vmem:[%s9892_s2 + $0x368] ss:$16 sps:$4 sm:$0xff]   ;;  %v7467_v5 = vpop.permute.xlu1 %2713 }
 0x2e9   :  { %v7456_v58 = vpop.f32.mrf.mxu1  ;;  %v2261_v56 = vpop.f32.mrf.mxu0  ;;  %10063 = vst [vmem:[#allocation29_spill] sm:$0xff] %v7467_v5 }
 0x2ea   :  { %v3013_v43 = vmul.f32 %v7434_v1, %v2565_v2  ;;  %v3136_v44 = vadd.f32 %v3135_v59, %v3012_v18  ;;  %v2566_v11 = vmax.f32 %v2260_v10, 0.0  ;;  %v2262_v41 = vadd.f32 %v2261_v56, %v7011_v25  ;;  %v5592_v18 = vld [vmem:[%s9892_s2 + $0x38c] ss:$16 sps:$4 sm:$0xff]  }
 0x2eb   :  { %v7460_v57 = vpop.f32.mrf.mxu1  ;;  %v2263_v13 = vpop.f32.mrf.mxu0 }
 0x2ec   :  { %v3205_v61 = vadd.f32 %v3204_v38, %v3013_v43  ;;  %v2567_v29 = vmax.f32 %v2262_v41, 0.0  ;;  %v3014_v42 = vmul.f32 %v7450_v22, %v2566_v11  ;;  %v2264_v8 = vadd.f32 %v2263_v13, %v7013_v27  ;;  %v5625_v27 = vld [vmem:[%s9891_s1 + $0xb0] ss:$8 sps:$4 sm:$0xff]  }
 0x2ed   :  { %v7472_v25 = vpop.f32.mrf.mxu1  ;;  %v2265_v10 = vpop.f32.mrf.mxu0 }
 0x2ee   :  { %v3015_v59 = vmul.f32 %v7450_v22, %v2567_v29  ;;  %v3137_v2 = vadd.f32 %v3136_v44, %v3014_v42  ;;  %v2568_v56 = vmax.f32 %v2264_v8, 0.0  ;;  %v2266_v38 = vadd.f32 %v2265_v10, %v7030_v34  ;;  %v7483_v29 = vpop.permute.xlu0 %2718  ;;  %v5626_v34 = vld [vmem:[%s9891_s1 + $0xc4] ss:$8 sps:$4 sm:$0xff]  }
 0x2ef   :  { %v7476_v43 = vpop.f32.mrf.mxu1  ;;  %v2269_v11 = vpop.f32.mrf.mxu0  ;;  %2508 = vmatmul.mubr.bf16.gmra.mxu0 %v5587_v49  ;;  %3511 = vmatmul.mubr.bf16.gmra.mxu1 %v5625_v27  ;;  %10064 = vst [vmem:[#allocation30_spill] sm:$0xff] %v7483_v29 }
 0x2f0   :  { %v3206_v41 = vadd.f32 %v3205_v61, %v3015_v59  ;;  %v2569_v13 = vmax.f32 %v2266_v38, 0.0  ;;  %v3016_v1 = vmul.f32 %v7467_v5, %v2568_v56  ;;  %v2270_v21 = vadd.f32 %v2269_v11, %v7032_v14  ;;  %2517 = vmatprep.mubr.bf16.mxu0 %v5592_v18  ;;  %5257 = vmatprep.mubr.msk.bf16.mxu1 %vm634_vm0, %v5626_v34  ;;  %v5590_v18 = vld [vmem:[%s9892_s2 + $0x388] ss:$16 sps:$4 sm:$0xff]   ;;  %v7500_v34 = vpop.permute.xlu1 %2723 }
 0x2f1   :  { %v7489_v44 = vpop.f32.mrf.mxu1  ;;  %v2271_v49 = vpop.f32.mrf.mxu0  ;;  %10065 = vst [vmem:[#allocation31_spill] sm:$0xff] %v7500_v34 }
 0x2f2   :  { %v3017_v42 = vmul.f32 %v7467_v5, %v2569_v13  ;;  %v3138_v61 = vadd.f32 %v3137_v2, %v3016_v1  ;;  %v2570_v8 = vmax.f32 %v2270_v21, 0.0  ;;  %v2272_v10 = vadd.f32 %v2271_v49, %v7037_v24  ;;  %v5595_v21 = vld [vmem:[%s9892_s2 + $0x3ac] ss:$16 sps:$4 sm:$0xff]  }
 0x2f3   :  { %v7493_v59 = vpop.f32.mrf.mxu1  ;;  %v2273_v14 = vpop.f32.mrf.mxu0 }
 0x2f4   :  { %v3207_v56 = vadd.f32 %v3206_v41, %v3017_v42  ;;  %v2571_v38 = vmax.f32 %v2272_v10, 0.0  ;;  %v3018_v11 = vmul.f32 %v7483_v29, %v2570_v8  ;;  %v2274_v27 = vadd.f32 %v2273_v14, %v7039_v31  ;;  %v5627_v31 = vld [vmem:[%s9891_s1 + $0xc0] ss:$8 sps:$4 sm:$0xff]  }
 0x2f5   :  { %v7505_v24 = vpop.f32.mrf.mxu1  ;;  %v2275_v1 = vpop.f32.mrf.mxu0 }
 0x2f6   :  { %v3019_v2 = vmul.f32 %v7483_v29, %v2571_v38  ;;  %v3139_v13 = vadd.f32 %v3138_v61, %v3018_v11  ;;  %v2572_v49 = vmax.f32 %v2274_v27, 0.0  ;;  %v2276_v41 = vadd.f32 %v2275_v1, %v7056_v52  ;;  %v7516_v38 = vpop.permute.xlu0 %2728  ;;  %v5628_v52 = vld [vmem:[%s9891_s1 + $0xd4] ss:$8 sps:$4 sm:$0xff]  }
 0x2f7   :  { %v7509_v42 = vpop.f32.mrf.mxu1  ;;  %v2279_v8 = vpop.f32.mrf.mxu0  ;;  %2518 = vmatmul.mubr.bf16.gmra.mxu0 %v5590_v18  ;;  %3521 = vmatmul.mubr.bf16.gmra.mxu1 %v5627_v31  ;;  %10066 = vst [vmem:[#allocation32_spill] sm:$0xff] %v7516_v38 }
 0x2f8   :  { %v3208_v10 = vadd.f32 %v3207_v56, %v3019_v2  ;;  %v2573_v14 = vmax.f32 %v2276_v41, 0.0  ;;  %v3020_v5 = vmul.f32 %v7500_v34, %v2572_v49  ;;  %v2280_v22 = vadd.f32 %v2279_v8, %v7058_v9  ;;  %2527 = vmatprep.mubr.bf16.mxu0 %v5595_v21  ;;  %5258 = vmatprep.mubr.msk.bf16.mxu1 %vm634_vm0, %v5628_v52  ;;  %v5593_v21 = vld [vmem:[%s9892_s2 + $0x3a8] ss:$16 sps:$4 sm:$0xff]   ;;  %v7533_v52 = vpop.permute.xlu1 %2733 }
 0x2f9   :  { %v7522_v61 = vpop.f32.mrf.mxu1  ;;  %v2281_v18 = vpop.f32.mrf.mxu0  ;;  %10067 = vst [vmem:[#allocation33_spill] sm:$0xff] %v7533_v52 }
 0x2fa   :  { %v3021_v11 = vmul.f32 %v7500_v34, %v2573_v14  ;;  %v3140_v56 = vadd.f32 %v3139_v13, %v3020_v5  ;;  %v2574_v27 = vmax.f32 %v2280_v22, 0.0  ;;  %v2282_v1 = vadd.f32 %v2281_v18, %v7063_v26  ;;  %v5598_v22 = vld [vmem:[%s9892_s2 + $0x3cc] ss:$16 sps:$4 sm:$0xff]  }
 0x2fb   :  { %v7526_v2 = vpop.f32.mrf.mxu1  ;;  %v2283_v9 = vpop.f32.mrf.mxu0 }
 0x2fc   :  { %v3209_v49 = vadd.f32 %v3208_v10, %v3021_v11  ;;  %v2575_v41 = vmax.f32 %v2282_v1, 0.0  ;;  %v3022_v8 = vmul.f32 %v7516_v38, %v2574_v27  ;;  %v2284_v31 = vadd.f32 %v2283_v9, %v7065_v60  ;;  %v5629_v60 = vld [vmem:[%s9891_s1 + $0xd0] ss:$8 sps:$4 sm:$0xff]  }
 0x2fd   :  { %v7538_v26 = vpop.f32.mrf.mxu1  ;;  %v2285_v5 = vpop.f32.mrf.mxu0 }
 0x2fe   :  { %v3023_v13 = vmul.f32 %v7516_v38, %v2575_v41  ;;  %v3141_v14 = vadd.f32 %v3140_v56, %v3022_v8  ;;  %v2576_v18 = vmax.f32 %v2284_v31, 0.0  ;;  %v2286_v10 = vadd.f32 %v2285_v5, %v7082_v46  ;;  %v7549_v41 = vpop.permute.xlu0 %2738  ;;  %v5630_v46 = vld [vmem:[%s9891_s1 + $0xe4] ss:$8 sps:$4 sm:$0xff]  }
 0x2ff   :  { %v7542_v11 = vpop.f32.mrf.mxu1  ;;  %v2289_v27 = vpop.f32.mrf.mxu0  ;;  %2528 = vmatmul.mubr.bf16.gmra.mxu0 %v5593_v21  ;;  %3531 = vmatmul.mubr.bf16.gmra.mxu1 %v5629_v60  ;;  %10068 = vst [vmem:[#allocation34_spill] sm:$0xff] %v7549_v41 }
 0x300   :  { %v3210_v1 = vadd.f32 %v3209_v49, %v3023_v13  ;;  %v2577_v9 = vmax.f32 %v2286_v10, 0.0  ;;  %v3024_v34 = vmul.f32 %v7533_v52, %v2576_v18  ;;  %v2290_v29 = vadd.f32 %v2289_v27, %v7084_v20  ;;  %2537 = vmatprep.mubr.bf16.mxu0 %v5598_v22  ;;  %5259 = vmatprep.mubr.msk.bf16.mxu1 %vm634_vm0, %v5630_v46  ;;  %v5596_v22 = vld [vmem:[%s9892_s2 + $0x3c8] ss:$16 sps:$4 sm:$0xff]   ;;  %v7566_v60 = vpop.permute.xlu1 %2743 }
 0x301   :  { %v7555_v56 = vpop.f32.mrf.mxu1  ;;  %v2291_v21 = vpop.f32.mrf.mxu0  ;;  %10071 = vst [vmem:[#allocation37_spill] sm:$0xff] %v7566_v60 }
 0x302   :  { %10069 = vst [vmem:[#allocation35_spill] sm:$0xff] %v7555_v56  ;;  %v3025_v8 = vmul.f32 %v7533_v52, %v2577_v9  ;;  %v3142_v49 = vadd.f32 %v3141_v14, %v3024_v34  ;;  %v2578_v31 = vmax.f32 %v2290_v29, 0.0  ;;  %v2292_v5 = vadd.f32 %v2291_v21, %v7089_v47  ;;  %v5601_v29 = vld [vmem:[%s9892_s2 + $0x3ec] ss:$16 sps:$4 sm:$0xff]  }
 0x303   :  { %v7559_v13 = vpop.f32.mrf.mxu1  ;;  %v2293_v20 = vpop.f32.mrf.mxu0 }
 0x304   :  { %10070 = vst [vmem:[#allocation36_spill] sm:$0xff] %v7559_v13  ;;  %v2579_v18 = vmax.f32 %v2292_v5, 0.0  ;;  %v3026_v10 = vmul.f32 %v7549_v41, %v2578_v31  ;;  %v2294_v27 = vadd.f32 %v2293_v20, %v7091_v28  ;;  %v3211_v34 = vadd.f32 %v3210_v1, %v3025_v8  ;;  %v5631_v28 = vld [vmem:[%s9891_s1 + $0xe0] ss:$8 sps:$4 sm:$0xff]  }
 0x305   :  { %v7571_v47 = vpop.f32.mrf.mxu1  ;;  %v2295_v14 = vpop.f32.mrf.mxu0 }
 0x306   :  { %10072 = vst [vmem:[#allocation38_spill] sm:$0xff] %v7571_v47  ;;  %v3027_v9 = vmul.f32 %v7549_v41, %v2579_v18  ;;  %v3143_v46 = vadd.f32 %v3142_v49, %v3026_v10  ;;  %v2580_v21 = vmax.f32 %v2294_v27, 0.0  ;;  %v2296_v5 = vadd.f32 %v2295_v14, %v7108_v40  ;;  %v7582_v18 = vpop.permute.xlu0 %2748  ;;  %v5632_v40 = vld [vmem:[%s9891_s1 + $0xf4] ss:$8 sps:$4 sm:$0xff]  }
 0x307   :  { %v7575_v52 = vpop.f32.mrf.mxu1  ;;  %v2299_v31 = vpop.f32.mrf.mxu0  ;;  %2538 = vmatmul.mubr.bf16.gmra.mxu0 %v5596_v22  ;;  %3541 = vmatmul.mubr.bf16.gmra.mxu1 %v5631_v28  ;;  %10074 = vst [vmem:[#allocation40_spill] sm:$0xff] %v7582_v18 }
 0x308   :  { %10073 = vst [vmem:[#allocation39_spill] sm:$0xff] %v7575_v52  ;;  %v3212_v20 = vadd.f32 %v3211_v34, %v3027_v9  ;;  %v2581_v1 = vmax.f32 %v2296_v5, 0.0  ;;  %v3028_v8 = vmul.f32 %v7566_v60, %v2580_v21  ;;  %v2300_v38 = vadd.f32 %v2299_v31, %v7110_v35  ;;  %2547 = vmatprep.mubr.bf16.mxu0 %v5601_v29  ;;  %v5599_v29 = vld [vmem:[%s9892_s2 + $0x3e8] ss:$16 sps:$4 sm:$0xff]   ;;  %v7599_v28 = vpop.permute.xlu1 %2753 }
 0x309   :  { %5260 = vmatprep.mubr.msk.bf16.mxu1 %vm634_vm0, %v5632_v40  ;;  %v7588_v49 = vpop.f32.mrf.mxu1  ;;  %v2301_v22 = vpop.f32.mrf.mxu0  ;;  %10077 = vst [vmem:[#allocation43_spill] sm:$0xff] %v7599_v28 }
 0x30a   :  { %10075 = vst [vmem:[#allocation41_spill] sm:$0xff] %v7588_v49  ;;  %v3029_v10 = vmul.f32 %v7566_v60, %v2581_v1  ;;  %v3144_v27 = vadd.f32 %v3143_v46, %v3028_v8  ;;  %v2582_v34 = vmax.f32 %v2300_v38, 0.0  ;;  %v2302_v14 = vadd.f32 %v2301_v22, %v7115_v62 }
 0x30b   :  { %v7592_v9 = vpop.f32.mrf.mxu1  ;;  %v2303_v35 = vpop.f32.mrf.mxu0 }
 0x30c   :  { %10076 = vst [vmem:[#allocation42_spill] sm:$0xff] %v7592_v9  ;;  %v2583_v21 = vmax.f32 %v2302_v14, 0.0  ;;  %v3030_v5 = vmul.f32 %v7582_v18, %v2582_v34  ;;  %v2304_v31 = vadd.f32 %v2303_v35, %v7117_v53  ;;  %v3213_v40 = vadd.f32 %v3212_v20, %v3029_v10  ;;  %v5633_v53 = vld [vmem:[%s9891_s1 + $0xf0] ss:$8 sps:$4 sm:$0xff]   ;;  %v7612_v35 = vpop.permute.xlu0 %2758  ;;  %v10163_v9 = vld [vmem:[#allocation19_spill] sm:$0xff] }
 0x30d   :  { %v7601_v1 = vpop.f32.mrf.mxu1  ;;  %v2305_v38 = vpop.f32.mrf.mxu0  ;;  %10080 = vst [vmem:[#allocation46_spill] sm:$0xff] %v7612_v35 }
 0x30e   :  { %10078 = vst [vmem:[#allocation44_spill] sm:$0xff] %v7601_v1  ;;  %v3031_v62 = vmul.f32 %v7582_v18, %v2583_v21  ;;  %v3145_v46 = vadd.f32 %v3144_v27, %v3030_v5  ;;  %v2584_v8 = vmax.f32 %v2304_v31, 0.0  ;;  %v2306_v22 = vadd.f32 %v2305_v38, %v7131_v36  ;;  %v5634_v36 = vld [vmem:[%s9891_s1 + $0x104] ss:$8 sps:$4 sm:$0xff]  }
 0x30f   :  { %v7605_v60 = vpop.f32.mrf.mxu1  ;;  %v2309_v41 = vpop.f32.mrf.mxu0  ;;  %2548 = vmatmul.mubr.bf16.gmra.mxu0 %v5599_v29  ;;  %3551 = vmatmul.mubr.bf16.gmra.mxu1 %v5633_v53  ;;  %v5635_v27 = vld [vmem:[%s9892_s2 + $0x4] ss:$16 sps:$4 sm:$0xff]  }
 0x310   :  { %10079 = vst [vmem:[#allocation45_spill] sm:$0xff] %v7605_v60  ;;  %v3214_v34 = vadd.f32 %v3213_v40, %v3031_v62  ;;  %v2585_v20 = vmax.f32 %v2306_v22, 0.0  ;;  %v3032_v10 = vmul.f32 %v7599_v28, %v2584_v8  ;;  %v2310_v14 = vadd.f32 %v2309_v41, %v7133_v54  ;;  %5261 = vmatprep.mubr.msk.bf16.mxu1 %vm634_vm0, %v5634_v36  ;;  %v7629_v53 = vpop.permute.xlu1 %2763 }
 0x311   :  { %3881 = vmatprep.mubr.bf16.mxu0 %v5635_v27  ;;  %v7621_v29 = vpop.f32.mrf.mxu1  ;;  %v2311_v21 = vpop.f32.mrf.mxu0  ;;  %10083 = vst [vmem:[#allocation49_spill] sm:$0xff] %v7629_v53 }
 0x312   :  { %10081 = vst [vmem:[#allocation47_spill] sm:$0xff] %v7621_v29  ;;  %v3033_v5 = vmul.f32 %v7599_v28, %v2585_v20  ;;  %v3146_v31 = vadd.f32 %v3145_v46, %v3032_v10  ;;  %v2586_v54 = vmax.f32 %v2310_v14, 0.0  ;;  %v2312_v41 = vadd.f32 %v2311_v21, %v7142_v63 }
 0x313   :  { %v7625_v40 = vpop.f32.mrf.mxu1  ;;  %v2313_v38 = vpop.f32.mrf.mxu0 }
 0x314   :  { %10082 = vst [vmem:[#allocation48_spill] sm:$0xff] %v7625_v40  ;;  %v2587_v62 = vmax.f32 %v2312_v41, 0.0  ;;  %v3034_v8 = vmul.f32 %v7612_v35, %v2586_v54  ;;  %v2314_v22 = vadd.f32 %v2313_v38, %v7144_v19  ;;  %v3215_v36 = vadd.f32 %v3214_v34, %v3033_v5  ;;  %v5636_v54 = vld [vmem:[%s9891_s1 + $0x100] ss:$8 sps:$4 sm:$0xff]   ;;  %v7642_v38 = vpop.permute.xlu0 %2768  ;;  %v10161_v40 = vld [vmem:[#allocation16_spill] sm:$0xff] }
 0x315   :  { %v7631_v27 = vpop.f32.mrf.mxu1  ;;  %v2315_v18 = vpop.f32.mrf.mxu0  ;;  %10086 = vst [vmem:[#allocation52_spill] sm:$0xff] %v7642_v38 }
 0x316   :  { %10084 = vst [vmem:[#allocation50_spill] sm:$0xff] %v7631_v27  ;;  %v3035_v20 = vmul.f32 %v7612_v35, %v2587_v62  ;;  %v3147_v46 = vadd.f32 %v3146_v31, %v3034_v8  ;;  %v2588_v10 = vmax.f32 %v2314_v22, 0.0  ;;  %v2316_v63 = vadd.f32 %v2315_v18, %v7155_v33  ;;  %v5637_v33 = vld [vmem:[%s9891_s1 + $0x114] ss:$8 sps:$4 sm:$0xff]   ;;  %v5663_v27 = vld [vmem:[%s9891_s1 + $0x1e4] ss:$8 sps:$4 sm:$0xff]  }
 0x317   :  { %v7635_v14 = vpop.f32.mrf.mxu1  ;;  %v2319_v21 = vpop.f32.mrf.mxu0  ;;  %3561 = vmatmul.mubr.bf16.gmra.mxu1 %v5636_v54 }
 0x318   :  { %10085 = vst [vmem:[#allocation51_spill] sm:$0xff] %v7635_v14  ;;  %v3216_v19 = vadd.f32 %v3215_v36, %v3035_v20  ;;  %v2589_v41 = vmax.f32 %v2316_v63, 0.0  ;;  %v3036_v34 = vmul.f32 %v7629_v53, %v2588_v10  ;;  %v2320_v5 = vadd.f32 %v2319_v21, %v7157_v55  ;;  %5262 = vmatprep.mubr.msk.bf16.mxu1 %vm634_vm0, %v5637_v33  ;;  %v7656_v54 = vpop.permute.xlu1 %2773 }
 0x319   :  { %v7648_v18 = vpop.f32.mrf.mxu1  ;;  %v2321_v31 = vpop.f32.mrf.mxu0  ;;  %10089 = vst [vmem:[#allocation55_spill] sm:$0xff] %v7656_v54 }
 0x31a   :  { %10087 = vst [vmem:[#allocation53_spill] sm:$0xff] %v7648_v18  ;;  %v3037_v62 = vmul.f32 %v7629_v53, %v2589_v41  ;;  %v3148_v8 = vadd.f32 %v3147_v46, %v3036_v34  ;;  %v2590_v22 = vmax.f32 %v2320_v5, 0.0  ;;  %v2322_v36 = vadd.f32 %v2321_v31, %v7169_v37 }
 0x31b   :  { %v7652_v20 = vpop.f32.mrf.mxu1  ;;  %v2323_v55 = vpop.f32.mrf.mxu0 }
 0x31c   :  { %10088 = vst [vmem:[#allocation54_spill] sm:$0xff] %v7652_v20  ;;  %v2591_v10 = vmax.f32 %v2322_v36, 0.0  ;;  %v3038_v63 = vmul.f32 %v7642_v38, %v2590_v22  ;;  %v2324_v21 = vadd.f32 %v2323_v55, %v7171_v12  ;;  %v3217_v33 = vadd.f32 %v3216_v19, %v3037_v62  ;;  %v5638_v22 = vld [vmem:[%s9891_s1 + $0x110] ss:$8 sps:$4 sm:$0xff]   ;;  %v7669_v55 = vpop.permute.xlu0 %2778 }
 0x31d   :  { %v7658_v35 = vpop.f32.mrf.mxu1  ;;  %v2325_v28 = vpop.f32.mrf.mxu0  ;;  %10092 = vst [vmem:[#allocation58_spill] sm:$0xff] %v7669_v55 }
 0x31e   :  { %10090 = vst [vmem:[#allocation56_spill] sm:$0xff] %v7658_v35  ;;  %v3039_v41 = vmul.f32 %v7642_v38, %v2591_v10  ;;  %v3149_v46 = vadd.f32 %v3148_v8, %v3038_v63  ;;  %v2592_v34 = vmax.f32 %v2324_v21, 0.0  ;;  %v2326_v37 = vadd.f32 %v2325_v28, %v7182_v15  ;;  %v5639_v15 = vld [vmem:[%s9891_s1 + $0x124] ss:$8 sps:$4 sm:$0xff]   ;;  %v5661_v35 = vld [vmem:[%s9891_s1 + $0x1d4] ss:$8 sps:$4 sm:$0xff]  }
 0x31f   :  { %v7662_v5 = vpop.f32.mrf.mxu1  ;;  %v2329_v31 = vpop.f32.mrf.mxu0  ;;  %3571 = vmatmul.mubr.bf16.gmra.mxu1 %v5638_v22 }
 0x320   :  { %10091 = vst [vmem:[#allocation57_spill] sm:$0xff] %v7662_v5  ;;  %v3218_v12 = vadd.f32 %v3217_v33, %v3039_v41  ;;  %v2593_v36 = vmax.f32 %v2326_v37, 0.0  ;;  %v3040_v19 = vmul.f32 %v7656_v54, %v2592_v34  ;;  %v2330_v62 = vadd.f32 %v2329_v31, %v7184_v48  ;;  %5263 = vmatprep.mubr.msk.bf16.mxu1 %vm634_vm0, %v5639_v15  ;;  %v7683_v22 = vpop.permute.xlu1 %2783 }
 0x321   :  { %v7675_v28 = vpop.f32.mrf.mxu1  ;;  %v2331_v8 = vpop.f32.mrf.mxu0  ;;  %10095 = vst [vmem:[#allocation61_spill] sm:$0xff] %v7683_v22 }
 0x322   :  { %10093 = vst [vmem:[#allocation59_spill] sm:$0xff] %v7675_v28  ;;  %v3041_v10 = vmul.f32 %v7656_v54, %v2593_v36  ;;  %v3150_v63 = vadd.f32 %v3149_v46, %v3040_v19  ;;  %v2594_v21 = vmax.f32 %v2330_v62, 0.0  ;;  %v2332_v33 = vadd.f32 %v2331_v8, %v7196_v45 }
 0x323   :  { %v7679_v41 = vpop.f32.mrf.mxu1  ;;  %v2333_v48 = vpop.f32.mrf.mxu0 }
 0x324   :  { %10094 = vst [vmem:[#allocation60_spill] sm:$0xff] %v7679_v41  ;;  %v2595_v34 = vmax.f32 %v2332_v33, 0.0  ;;  %v3042_v37 = vmul.f32 %v7669_v55, %v2594_v21  ;;  %v2334_v31 = vadd.f32 %v2333_v48, %v7198_v3  ;;  %v3219_v15 = vadd.f32 %v3218_v12, %v3041_v10  ;;  %v5640_v21 = vld [vmem:[%s9891_s1 + $0x120] ss:$8 sps:$4 sm:$0xff]   ;;  %v7696_v48 = vpop.permute.xlu0 %2788 }
 0x325   :  { %v7685_v38 = vpop.f32.mrf.mxu1  ;;  %v2335_v53 = vpop.f32.mrf.mxu0  ;;  %10098 = vst [vmem:[#allocation64_spill] sm:$0xff] %v7696_v48 }
 0x326   :  { %10096 = vst [vmem:[#allocation62_spill] sm:$0xff] %v7685_v38  ;;  %v3043_v36 = vmul.f32 %v7669_v55, %v2595_v34  ;;  %v3151_v46 = vadd.f32 %v3150_v63, %v3042_v37  ;;  %v2596_v19 = vmax.f32 %v2334_v31, 0.0  ;;  %v2336_v45 = vadd.f32 %v2335_v53, %v7209_v0  ;;  %v5641_v0 = vld [vmem:[%s9891_s1 + $0x134] ss:$8 sps:$4 sm:$0xff]  }
 0x327   :  { %v7689_v62 = vpop.f32.mrf.mxu1  ;;  %v2339_v8 = vpop.f32.mrf.mxu0  ;;  %3581 = vmatmul.mubr.bf16.gmra.mxu1 %v5640_v21 }
 0x328   :  { %10097 = vst [vmem:[#allocation63_spill] sm:$0xff] %v7689_v62  ;;  %v3220_v3 = vadd.f32 %v3219_v15, %v3043_v36  ;;  %v2597_v33 = vmax.f32 %v2336_v45, 0.0  ;;  %v3044_v12 = vmul.f32 %v7683_v22, %v2596_v19  ;;  %v2340_v10 = vadd.f32 %v2339_v8, %v7211_v30  ;;  %5264 = vmatprep.mubr.msk.bf16.mxu1 %vm634_vm0, %v5641_v0  ;;  %v7710_v21 = vpop.permute.xlu1 %2793  ;;  %v5659_v62 = vld [vmem:[%s9891_s1 + $0x1c4] ss:$8 sps:$4 sm:$0xff]  }
 0x329   :  { %v7702_v53 = vpop.f32.mrf.mxu1  ;;  %v2341_v63 = vpop.f32.mrf.mxu0  ;;  %10101 = vst [vmem:[#allocation67_spill] sm:$0xff] %v7710_v21 }
 0x32a   :  { %10099 = vst [vmem:[#allocation65_spill] sm:$0xff] %v7702_v53  ;;  %v3045_v34 = vmul.f32 %v7683_v22, %v2597_v33  ;;  %v3152_v37 = vadd.f32 %v3151_v46, %v3044_v12  ;;  %v2598_v31 = vmax.f32 %v2340_v10, 0.0  ;;  %v2342_v15 = vadd.f32 %v2341_v63, %v7223_v6 }
 0x32b   :  { %v7706_v36 = vpop.f32.mrf.mxu1  ;;  %v2343_v30 = vpop.f32.mrf.mxu0 }
 0x32c   :  { %10100 = vst [vmem:[#allocation66_spill] sm:$0xff] %v7706_v36  ;;  %v2599_v19 = vmax.f32 %v2342_v15, 0.0  ;;  %v3046_v45 = vmul.f32 %v7696_v48, %v2598_v31  ;;  %v2344_v8 = vadd.f32 %v2343_v30, %v7225_v17  ;;  %v3221_v0 = vadd.f32 %v3220_v3, %v3045_v34  ;;  %v5642_v31 = vld [vmem:[%s9891_s1 + $0x130] ss:$8 sps:$4 sm:$0xff]   ;;  %v7723_v30 = vpop.permute.xlu0 %2798 }
 0x32d   :  { %v7712_v55 = vpop.f32.mrf.mxu1  ;;  %v2345_v54 = vpop.f32.mrf.mxu0  ;;  %10104 = vst [vmem:[#allocation70_spill] sm:$0xff] %v7723_v30 }
 0x32e   :  { %10102 = vst [vmem:[#allocation68_spill] sm:$0xff] %v7712_v55  ;;  %v3047_v33 = vmul.f32 %v7696_v48, %v2599_v19  ;;  %v3153_v46 = vadd.f32 %v3152_v37, %v3046_v45  ;;  %v2600_v12 = vmax.f32 %v2344_v8, 0.0  ;;  %v2346_v6 = vadd.f32 %v2345_v54, %v7236_v16  ;;  %v5643_v16 = vld [vmem:[%s9891_s1 + $0x144] ss:$8 sps:$4 sm:$0xff]  }
 0x32f   :  { %v7716_v10 = vpop.f32.mrf.mxu1  ;;  %v2349_v63 = vpop.f32.mrf.mxu0  ;;  %3591 = vmatmul.mubr.bf16.gmra.mxu1 %v5642_v31 }
 0x330   :  { %10103 = vst [vmem:[#allocation69_spill] sm:$0xff] %v7716_v10  ;;  %v3222_v17 = vadd.f32 %v3221_v0, %v3047_v33  ;;  %v2601_v15 = vmax.f32 %v2346_v6, 0.0  ;;  %v3048_v3 = vmul.f32 %v7710_v21, %v2600_v12  ;;  %v2350_v34 = vadd.f32 %v2349_v63, %v7238_v32  ;;  %5265 = vmatprep.mubr.msk.bf16.mxu1 %vm634_vm0, %v5643_v16  ;;  %v7737_v31 = vpop.permute.xlu1 %2803 }
 0x331   :  { %v7729_v54 = vpop.f32.mrf.mxu1  ;;  %v2351_v37 = vpop.f32.mrf.mxu0  ;;  %10107 = vst [vmem:[#allocation73_spill] sm:$0xff] %v7737_v31 }
 0x332   :  { %10105 = vst [vmem:[#allocation71_spill] sm:$0xff] %v7729_v54  ;;  %v3049_v19 = vmul.f32 %v7710_v21, %v2601_v15  ;;  %v3154_v45 = vadd.f32 %v3153_v46, %v3048_v3  ;;  %v2602_v8 = vmax.f32 %v2350_v34, 0.0  ;;  %v2352_v0 = vadd.f32 %v2351_v37, %v7250_v39 }
 0x333   :  { %v7733_v33 = vpop.f32.mrf.mxu1  ;;  %v2353_v32 = vpop.f32.mrf.mxu0 }
 0x334   :  { %10106 = vst [vmem:[#allocation72_spill] sm:$0xff] %v7733_v33  ;;  %v2603_v12 = vmax.f32 %v2352_v0, 0.0  ;;  %v3050_v6 = vmul.f32 %v7723_v30, %v2602_v8  ;;  %v2354_v63 = vadd.f32 %v2353_v32, %v7252_v23  ;;  %v3223_v16 = vadd.f32 %v3222_v17, %v3049_v19  ;;  %v5644_v8 = vld [vmem:[%s9891_s1 + $0x140] ss:$8 sps:$4 sm:$0xff]   ;;  %v7750_v32 = vpop.permute.xlu0 %2808  ;;  %v7764_v21 = vpop.permute.xlu1 %2813 }
 0x335   :  { %v7739_v48 = vpop.f32.mrf.mxu1  ;;  %v2355_v22 = vpop.f32.mrf.mxu0  ;;  %10110 = vst [vmem:[#allocation76_spill] sm:$0xff] %v7750_v32  ;;  %v5656_v33 = vld [vmem:[%s9891_s1 + $0x1a0] ss:$8 sps:$4 sm:$0xff]  }
 0x336   :  { %10108 = vst [vmem:[#allocation74_spill] sm:$0xff] %v7739_v48  ;;  %v3051_v15 = vmul.f32 %v7723_v30, %v2603_v12  ;;  %v3155_v46 = vadd.f32 %v3154_v45, %v3050_v6  ;;  %v2604_v3 = vmax.f32 %v2354_v63, 0.0  ;;  %v2356_v39 = vadd.f32 %v2355_v22, %v7263_v50  ;;  %v5645_v50 = vld [vmem:[%s9891_s1 + $0x154] ss:$8 sps:$4 sm:$0xff]  }
 0x337   :  { %v7743_v34 = vpop.f32.mrf.mxu1  ;;  %v2359_v37 = vpop.f32.mrf.mxu0  ;;  %3601 = vmatmul.mubr.bf16.gmra.mxu1 %v5644_v8  ;;  %v10114_v8 = vld [vmem:[#allocation3_spill] sm:$0xff] }
 0x338   :  { %10109 = vst [vmem:[#allocation75_spill] sm:$0xff] %v7743_v34  ;;  %v3224_v23 = vadd.f32 %v3223_v16, %v3051_v15  ;;  %v2605_v0 = vmax.f32 %v2356_v39, 0.0  ;;  %v3052_v17 = vmul.f32 %v7737_v31, %v2604_v3  ;;  %v2360_v19 = vadd.f32 %v2359_v37, %v7265_v4  ;;  %5266 = vmatprep.mubr.msk.bf16.mxu1 %vm634_vm0, %v5645_v50  ;;  %v10112_v16 = vld [vmem:[#allocation2_spill] sm:$0xff] }
 0x339   :  { %v7756_v22 = vpop.f32.mrf.mxu1  ;;  %v2361_v45 = vpop.f32.mrf.mxu0  ;;  %10115 = vst [vmem:[#allocation3_spill] sm:$0xff] %v7764_v21 }
 0x33a   :  { %10111 = vst [vmem:[#allocation77_spill] sm:$0xff] %v7756_v22  ;;  %v3053_v12 = vmul.f32 %v7737_v31, %v2605_v0  ;;  %v3156_v6 = vadd.f32 %v3155_v46, %v3052_v17  ;;  %v2606_v63 = vmax.f32 %v2360_v19, 0.0  ;;  %v2362_v15 = vadd.f32 %v2361_v45, %v10112_v16  ;;  %v10117_v19 = vld [vmem:[#allocation4_spill] sm:$0xff] }
 0x33b   :  { %v7760_v3 = vpop.f32.mrf.mxu1  ;;  %v2363_v4 = vpop.f32.mrf.mxu0 }
 0x33c   :  { %10113 = vst [vmem:[#allocation2_spill] sm:$0xff] %v7760_v3  ;;  %v2607_v39 = vmax.f32 %v2362_v15, 0.0  ;;  %v3054_v37 = vmul.f32 %v7750_v32, %v2606_v63  ;;  %v2364_v30 = vadd.f32 %v2363_v4, %v10114_v8  ;;  %v3225_v50 = vadd.f32 %v3224_v23, %v3053_v12  ;;  %v5646_v63 = vld [vmem:[%s9891_s1 + $0x150] ss:$8 sps:$4 sm:$0xff]  }
 0x33d   :  { %v7766_v34 = vpop.f32.mrf.mxu1  ;;  %v2365_v22 = vpop.f32.mrf.mxu0  ;;  %v10119_v12 = vld [vmem:[#allocation5_spill] sm:$0xff] }
 0x33e   :  { %10116 = vst [vmem:[#allocation78_spill] sm:$0xff] %v7766_v34  ;;  %v3055_v0 = vmul.f32 %v7750_v32, %v2607_v39  ;;  %v3157_v46 = vadd.f32 %v3156_v6, %v3054_v37  ;;  %v2608_v17 = vmax.f32 %v2364_v30, 0.0  ;;  %v2366_v45 = vadd.f32 %v2365_v22, %v10117_v19  ;;  %v7777_v34 = vpop.permute.xlu0 %2818  ;;  %v5647_v30 = vld [vmem:[%s9891_s1 + $0x164] ss:$8 sps:$4 sm:$0xff]  }
 0x33f   :  { %v7770_v16 = vpop.f32.mrf.mxu1  ;;  %v2369_v31 = vpop.f32.mrf.mxu0  ;;  %3611 = vmatmul.mubr.bf16.gmra.mxu1 %v5646_v63  ;;  %10120 = vst [vmem:[#allocation5_spill] sm:$0xff] %v7777_v34 }
 0x340   :  { %10118 = vst [vmem:[#allocation4_spill] sm:$0xff] %v7770_v16  ;;  %v3226_v15 = vadd.f32 %v3225_v50, %v3055_v0  ;;  %v2609_v4 = vmax.f32 %v2366_v45, 0.0  ;;  %v3056_v23 = vmul.f32 %v7764_v21, %v2608_v17  ;;  %v2370_v8 = vadd.f32 %v2369_v31, %v10119_v12  ;;  %5267 = vmatprep.mubr.msk.bf16.mxu1 %vm634_vm0, %v5647_v30  ;;  %v10122_v0 = vld [vmem:[#allocation6_spill] sm:$0xff]  ;;  %v10124_v12 = vld [vmem:[#allocation7_spill] sm:$0xff]  ;;  %v7791_v16 = vpop.permute.xlu1 %2823 }
 0x341   :  { %v7783_v22 = vpop.f32.mrf.mxu1  ;;  %v2371_v6 = vpop.f32.mrf.mxu0  ;;  %10125 = vst [vmem:[#allocation7_spill] sm:$0xff] %v7791_v16 }
 0x342   :  { %10121 = vst [vmem:[#allocation79_spill] sm:$0xff] %v7783_v22  ;;  %v3057_v39 = vmul.f32 %v7764_v21, %v2609_v4  ;;  %v3158_v37 = vadd.f32 %v3157_v46, %v3056_v23  ;;  %v2610_v50 = vmax.f32 %v2370_v8, 0.0  ;;  %v2372_v19 = vadd.f32 %v2371_v6, %v10122_v0  ;;  %v10127_v8 = vld [vmem:[#allocation8_spill] sm:$0xff] }
 0x343   :  { %v7787_v17 = vpop.f32.mrf.mxu1  ;;  %v2373_v31 = vpop.f32.mrf.mxu0 }
 0x344   :  { %10123 = vst [vmem:[#allocation6_spill] sm:$0xff] %v7787_v17  ;;  %v2611_v45 = vmax.f32 %v2372_v19, 0.0  ;;  %v3058_v63 = vmul.f32 %v7777_v34, %v2610_v50  ;;  %v2374_v32 = vadd.f32 %v2373_v31, %v10124_v12  ;;  %v3227_v30 = vadd.f32 %v3226_v15, %v3057_v39  ;;  %v5648_v50 = vld [vmem:[%s9891_s1 + $0x160] ss:$8 sps:$4 sm:$0xff]   ;;  %v10129_v39 = vld [vmem:[#allocation9_spill] sm:$0xff] }
 0x345   :  { %v7793_v3 = vpop.f32.mrf.mxu1  ;;  %v2375_v22 = vpop.f32.mrf.mxu0 }
 0x346   :  { %10126 = vst [vmem:[#allocation80_spill] sm:$0xff] %v7793_v3  ;;  %v3059_v4 = vmul.f32 %v7777_v34, %v2611_v45  ;;  %v3159_v46 = vadd.f32 %v3158_v37, %v3058_v63  ;;  %v2612_v23 = vmax.f32 %v2374_v32, 0.0  ;;  %v2376_v6 = vadd.f32 %v2375_v22, %v10127_v8  ;;  %v7804_v3 = vpop.permute.xlu0 %2828  ;;  %v5649_v32 = vld [vmem:[%s9891_s1 + $0x174] ss:$8 sps:$4 sm:$0xff]  }
 0x347   :  { %v7797_v0 = vpop.f32.mrf.mxu1  ;;  %v2379_v21 = vpop.f32.mrf.mxu0  ;;  %3621 = vmatmul.mubr.bf16.gmra.mxu1 %v5648_v50  ;;  %10130 = vst [vmem:[#allocation9_spill] sm:$0xff] %v7804_v3 }
 0x348   :  { %10128 = vst [vmem:[#allocation8_spill] sm:$0xff] %v7797_v0  ;;  %v3228_v19 = vadd.f32 %v3227_v30, %v3059_v4  ;;  %v2613_v31 = vmax.f32 %v2376_v6, 0.0  ;;  %v3060_v15 = vmul.f32 %v7791_v16, %v2612_v23  ;;  %v2380_v12 = vadd.f32 %v2379_v21, %v10129_v39  ;;  %5268 = vmatprep.mubr.msk.bf16.mxu1 %vm634_vm0, %v5649_v32  ;;  %v10132_v4 = vld [vmem:[#allocation10_spill] sm:$0xff]  ;;  %v10134_v39 = vld [vmem:[#allocation11_spill] sm:$0xff]  ;;  %v7818_v0 = vpop.permute.xlu1 %2833 }
 0x349   :  { %v7810_v22 = vpop.f32.mrf.mxu1  ;;  %v2381_v37 = vpop.f32.mrf.mxu0  ;;  %10135 = vst [vmem:[#allocation11_spill] sm:$0xff] %v7818_v0 }
 0x34a   :  { %10131 = vst [vmem:[#allocation81_spill] sm:$0xff] %v7810_v22  ;;  %v3061_v45 = vmul.f32 %v7791_v16, %v2613_v31  ;;  %v3160_v63 = vadd.f32 %v3159_v46, %v3060_v15  ;;  %v2614_v30 = vmax.f32 %v2380_v12, 0.0  ;;  %v2382_v8 = vadd.f32 %v2381_v37, %v10132_v4  ;;  %v10137_v12 = vld [vmem:[#allocation12_spill] sm:$0xff] }
 0x34b   :  { %v7814_v23 = vpop.f32.mrf.mxu1  ;;  %v2383_v21 = vpop.f32.mrf.mxu0 }
 0x34c   :  { %10133 = vst [vmem:[#allocation10_spill] sm:$0xff] %v7814_v23  ;;  %v2615_v6 = vmax.f32 %v2382_v8, 0.0  ;;  %v3062_v50 = vmul.f32 %v7804_v3, %v2614_v30  ;;  %v2384_v34 = vadd.f32 %v2383_v21, %v10134_v39  ;;  %v3229_v32 = vadd.f32 %v3228_v19, %v3061_v45  ;;  %v5650_v30 = vld [vmem:[%s9891_s1 + $0x170] ss:$8 sps:$4 sm:$0xff]  }
 0x34d   :  { %v7820_v17 = vpop.f32.mrf.mxu1  ;;  %v2385_v22 = vpop.f32.mrf.mxu0  ;;  %v10139_v45 = vld [vmem:[#allocation13_spill] sm:$0xff] }
 0x34e   :  { %10136 = vst [vmem:[#allocation82_spill] sm:$0xff] %v7820_v17  ;;  %v3063_v31 = vmul.f32 %v7804_v3, %v2615_v6  ;;  %v3161_v46 = vadd.f32 %v3160_v63, %v3062_v50  ;;  %v2616_v15 = vmax.f32 %v2384_v34, 0.0  ;;  %v2386_v37 = vadd.f32 %v2385_v22, %v10137_v12  ;;  %v7831_v17 = vpop.permute.xlu0 %2838  ;;  %v5651_v34 = vld [vmem:[%s9891_s1 + $0x184] ss:$8 sps:$4 sm:$0xff]  }
 0x34f   :  { %v7824_v4 = vpop.f32.mrf.mxu1  ;;  %v2389_v16 = vpop.f32.mrf.mxu0  ;;  %3631 = vmatmul.mubr.bf16.gmra.mxu1 %v5650_v30  ;;  %10140 = vst [vmem:[#allocation13_spill] sm:$0xff] %v7831_v17 }
 0x350   :  { %10138 = vst [vmem:[#allocation12_spill] sm:$0xff] %v7824_v4  ;;  %v3230_v8 = vadd.f32 %v3229_v32, %v3063_v31  ;;  %v2617_v21 = vmax.f32 %v2386_v37, 0.0  ;;  %v3064_v19 = vmul.f32 %v7818_v0, %v2616_v15  ;;  %v2390_v39 = vadd.f32 %v2389_v16, %v10139_v45  ;;  %5269 = vmatprep.mubr.msk.bf16.mxu1 %vm634_vm0, %v5651_v34  ;;  %v10142_v31 = vld [vmem:[#allocation14_spill] sm:$0xff]  ;;  %v10144_v45 = vld [vmem:[#allocation15_spill] sm:$0xff]  ;;  %v7845_v4 = vpop.permute.xlu1 %2843 }
 0x351   :  { %v7837_v22 = vpop.f32.mrf.mxu1  ;;  %v2391_v63 = vpop.f32.mrf.mxu0  ;;  %10145 = vst [vmem:[#allocation15_spill] sm:$0xff] %v7845_v4 }
 0x352   :  { %10141 = vst [vmem:[#allocation83_spill] sm:$0xff] %v7837_v22  ;;  %v3065_v6 = vmul.f32 %v7818_v0, %v2617_v21  ;;  %v3162_v50 = vadd.f32 %v3161_v46, %v3064_v19  ;;  %v2618_v32 = vmax.f32 %v2390_v39, 0.0  ;;  %v2392_v12 = vadd.f32 %v2391_v63, %v10142_v31  ;;  %v7861_v0 = vpop.permute.xlu0 %2848 }
 0x353   :  { %v7841_v15 = vpop.f32.mrf.mxu1  ;;  %v2393_v16 = vpop.f32.mrf.mxu0 }
 0x354   :  { %10143 = vst [vmem:[#allocation14_spill] sm:$0xff] %v7841_v15  ;;  %v2619_v37 = vmax.f32 %v2392_v12, 0.0  ;;  %v3066_v30 = vmul.f32 %v7831_v17, %v2618_v32  ;;  %v2394_v3 = vadd.f32 %v2393_v16, %v10144_v45  ;;  %v3231_v23 = vadd.f32 %v3230_v8, %v3065_v6  ;;  %v5652_v32 = vld [vmem:[%s9891_s1 + $0x180] ss:$8 sps:$4 sm:$0xff]  }
 0x355   :  { %v7847_v34 = vpop.f32.mrf.mxu1  ;;  %v7849_v22 = vpop.f32.mrf.mxu0  ;;  %v10148_v16 = vld [vmem:[#allocation18_spill] sm:$0xff] }
 0x356   :  { %10146 = vst [vmem:[#allocation84_spill] sm:$0xff] %v7847_v34  ;;  %v3067_v46 = vmul.f32 %v7831_v17, %v2619_v37  ;;  %v3163_v21 = vadd.f32 %v3162_v50, %v3066_v30  ;;  %v2620_v19 = vmax.f32 %v2394_v3, 0.0  ;;  %10149 = vst [vmem:[#allocation18_spill] sm:$0xff] %v7861_v0  ;;  %v5653_v3 = vld [vmem:[%s9891_s1 + $0x194] ss:$8 sps:$4 sm:$0xff]   ;;  %v2396_v29 = vadd.f32 %v7849_v22, %v10161_v40  ;;  %v10167_v40 = vld [vmem:[#allocation22_spill] sm:$0xff] }
 0x357   :  { %v2399_v39 = vpop.f32.mrf.mxu0  ;;  %v7852_v63 = vpop.f32.mrf.mxu1  ;;  %3641 = vmatmul.mubr.bf16.gmra.mxu1 %v5652_v32  ;;  %v5657_v17 = vld [vmem:[%s9891_s1 + $0x1b4] ss:$8 sps:$4 sm:$0xff]  }
 0x358   :  { %10147 = vst [vmem:[#allocation85_spill] sm:$0xff] %v7852_v63  ;;  %v7857_v31 = vadd.f32 %v3231_v23, %v3067_v46  ;;  %v3068_v12 = vmul.f32 %v7845_v4, %v2620_v19  ;;  %v2400_v45 = vadd.f32 %v2399_v39, %v10148_v16  ;;  %5270 = vmatprep.mubr.msk.bf16.mxu1 %vm634_vm0, %v5653_v3 }
 0x359   :  { %v7867_v8 = vpop.f32.mrf.mxu0  ;;  %v7869_v6 = vpop.f32.mrf.mxu1 }
 0x35a   :  { %10150 = vst [vmem:[#allocation86_spill] sm:$0xff] %v7869_v6  ;;  %v3164_v50 = vadd.f32 %v3163_v21, %v3068_v12  ;;  %v2622_v37 = vmax.f32 %v2400_v45, 0.0  ;;  %v5654_v45 = vld [vmem:[%s9891_s1 + $0x190] ss:$8 sps:$4 sm:$0xff]   ;;  %v2402_v49 = vadd.f32 %v7867_v8, %v10163_v9  ;;  %v5664_v9 = vld [vmem:[%s9891_s1 + $0x1e0] ss:$8 sps:$4 sm:$0xff]  }
 0x35b   :  { %v7871_v23 = vpop.f32.mrf.mxu0  ;;  %v7873_v30 = vpop.f32.mrf.mxu1 }
 0x35c   :  { %10151 = vst [vmem:[#allocation87_spill] sm:$0xff] %v7873_v30  ;;  %v3070_v46 = vmul.f32 %v7861_v0, %v2622_v37  ;;  %v5655_v37 = vld [vmem:[%s9891_s1 + $0x1a4] ss:$8 sps:$4 sm:$0xff]  }
 0x35d   :  { %v7878_v39 = vpop.f32.mrf.mxu0  ;;  %v7880_v32 = vpop.f32.mrf.mxu1 }
 0x35e   :  { %10152 = vst [vmem:[#allocation88_spill] sm:$0xff] %v7880_v32  ;;  %v7882_v16 = vadd.f32 %v3164_v50, %v3070_v46  ;;  %v2406_v22 = vadd.f32 %v7878_v39, %v10167_v40  ;;  %v5665_v39 = vld [vmem:[%s9891_s1 + $0x1f4] ss:$8 sps:$4 sm:$0xff]  }
 0x35f   :  { %v7886_v21 = vpop.f32.mrf.mxu0  ;;  %v7888_v12 = vpop.f32.mrf.mxu1  ;;  %3651 = vmatmul.mubr.bf16.gmra.mxu1 %v5654_v45 }
 0x360   :  { %10153 = vst [vmem:[#allocation89_spill] sm:$0xff] %v7888_v12  ;;  %5271 = vmatprep.mubr.msk.bf16.mxu1 %vm634_vm0, %v5655_v37 }
 0x361   :  { %v7897_v50 = vpop.f32.mrf.mxu0  ;;  %v7899_v46 = vpop.f32.mrf.mxu1 }
 0x362   :  { %10154 = vst [vmem:[#allocation90_spill] sm:$0xff] %v7899_v46 }
 0x363   :  { %v7901_v19 = vpop.f32.mrf.mxu0  ;;  %v7903_v3 = vpop.f32.mrf.mxu1 }
 0x364   :  { %10155 = vst [vmem:[#allocation91_spill] sm:$0xff] %v7903_v3 }
 0x365   :  { %v7907_v34 = vpop.f32.mrf.mxu0  ;;  %v7909_v45 = vpop.f32.mrf.mxu1 }
 0x366   :  { %10156 = vst [vmem:[#allocation92_spill] sm:$0xff] %v7909_v45 }
 0x367   :  { %v7913_v48 = vpop.f32.mrf.mxu0  ;;  %v7915_v37 = vpop.f32.mrf.mxu1  ;;  %3661 = vmatmul.mubr.bf16.gmra.mxu1 %v5656_v33 }
 0x368   :  { %5272 = vmatprep.mubr.msk.bf16.mxu1 %vm634_vm0, %v5657_v17  ;;  %v5658_v17 = vld [vmem:[%s9891_s1 + $0x1b0] ss:$8 sps:$4 sm:$0xff]  }
 0x369   :  { %v7924_v54 = vpop.f32.mrf.mxu0  ;;  %v7926_v10 = vpop.f32.mrf.mxu1 }
 0x36b   :  { %v7928_v15 = vpop.f32.mrf.mxu0  ;;  %v7930_v55 = vpop.f32.mrf.mxu1 }
 0x36d   :  { %v7934_v53 = vpop.f32.mrf.mxu0  ;;  %v7936_v33 = vpop.f32.mrf.mxu1 }
 0x36f   :  { %v7938_v63 = vpop.f32.mrf.mxu0  ;;  %v7940_v30 = vpop.f32.mrf.mxu1  ;;  %3671 = vmatmul.mubr.bf16.gmra.mxu1 %v5658_v17 }
 0x370   :  { %5273 = vmatprep.mubr.msk.bf16.mxu1 %vm634_vm0, %v5659_v62  ;;  %v5660_v62 = vld [vmem:[%s9891_s1 + $0x1c0] ss:$8 sps:$4 sm:$0xff]  }
 0x371   :  { %v7949_v36 = vpop.f32.mrf.mxu0  ;;  %v7951_v38 = vpop.f32.mrf.mxu1 }
 0x372   :  { %10157 = vst [vmem:[#allocation93_spill] sm:$0xff] %v7951_v38 }
 0x373   :  { %v7953_v41 = vpop.f32.mrf.mxu0  ;;  %v7955_v28 = vpop.f32.mrf.mxu1 }
 0x375   :  { %v7957_v6 = vpop.f32.mrf.mxu0  ;;  %v7959_v32 = vpop.f32.mrf.mxu1 }
 0x376   :  { %10158 = vst [vmem:[#allocation94_spill] sm:$0xff] %v7959_v32 }
 0x377   :  { %v7961_v5 = vpop.f32.mrf.mxu0  ;;  %v7963_v17 = vpop.f32.mrf.mxu1  ;;  %3681 = vmatmul.mubr.bf16.gmra.mxu1 %v5660_v62 }
 0x378   :  { %10159 = vst [vmem:[#allocation95_spill] sm:$0xff] %v7963_v17  ;;  %5274 = vmatprep.mubr.msk.bf16.mxu1 %vm634_vm0, %v5661_v35  ;;  %v5662_v35 = vld [vmem:[%s9891_s1 + $0x1d0] ss:$8 sps:$4 sm:$0xff]  }
 0x379   :  { %v7972_v12 = vpop.f32.mrf.mxu0  ;;  %v7974_v3 = vpop.f32.mrf.mxu1 }
 0x37b   :  { %v7976_v20 = vpop.f32.mrf.mxu0  ;;  %v7978_v46 = vpop.f32.mrf.mxu1 }
 0x37c   :  { %10160 = vst [vmem:[#allocation96_spill] sm:$0xff] %v7978_v46  ;;  %v10165_v46 = vld [vmem:[#allocation20_spill] sm:$0xff] }
 0x37d   :  { %v7980_v45 = vpop.f32.mrf.mxu0  ;;  %v7982_v18 = vpop.f32.mrf.mxu1  ;;  %v2404_v17 = vadd.f32 %v7871_v23, %v10165_v46  ;;  %v10170_v23 = vld [vmem:[#allocation25_spill] sm:$0xff] }
 0x37e   :  { %v2412_v46 = vadd.f32 %v7897_v50, %v10170_v23  ;;  %v10173_v50 = vld [vmem:[#allocation27_spill] sm:$0xff] }
 0x37f   :  { %v7984_v14 = vpop.f32.mrf.mxu0  ;;  %v7986_v62 = vpop.f32.mrf.mxu1  ;;  %3691 = vmatmul.mubr.bf16.gmra.mxu1 %v5662_v35  ;;  %v2621_v35 = vmax.f32 %v2396_v29, 0.0  ;;  %v10169_v29 = vld [vmem:[#allocation24_spill] sm:$0xff]  ;;  %v2624_v40 = vmax.f32 %v2404_v17, 0.0 }
 0x380   :  { %5275 = vmatprep.mubr.msk.bf16.mxu1 %vm634_vm0, %v5663_v27  ;;  %v2410_v8 = vadd.f32 %v7886_v21, %v10169_v29  ;;  %v2414_v21 = vadd.f32 %v7901_v19, %v7427_v51  ;;  %v2416_v29 = vadd.f32 %v7907_v34, %v10173_v50 }
 0x381   :  { %v7997_v60 = vpop.f32.mrf.mxu0  ;;  %v7999_v1 = vpop.f32.mrf.mxu1 }
 0x382   :  { %10162 = vst [vmem:[#allocation16_spill] sm:$0xff] %v7997_v60  ;;  %v2623_v60 = vmax.f32 %v2402_v49, 0.0  ;;  %v3069_v49 = vmul.f32 %v7845_v4, %v2621_v35  ;;  %v2626_v17 = vmax.f32 %v2410_v8, 0.0  ;;  %v2627_v35 = vmax.f32 %v2412_v46, 0.0  ;;  %v8046_v4 = vpop.permute.xlu0 %2858 }
 0x383   :  { %v8003_v52 = vpop.f32.mrf.mxu0  ;;  %v8005_v47 = vpop.f32.mrf.mxu1  ;;  %10175 = vst [vmem:[#allocation97_spill] sm:$0xff] %v8046_v4  ;;  %v2628_v50 = vmax.f32 %v2414_v21, 0.0  ;;  %v2422_v8 = vadd.f32 %v7924_v54, %v7456_v58  ;;  %v2426_v58 = vadd.f32 %v7934_v53, %v7472_v25  ;;  %v2430_v25 = vadd.f32 %v7938_v63, %v7476_v43 }
 0x384   :  { %10164 = vst [vmem:[#allocation19_spill] sm:$0xff] %v8003_v52  ;;  %v8035_v52 = vpop.permute.xlu1 %2853  ;;  %v3071_v23 = vmul.f32 %v7861_v0, %v2623_v60  ;;  %v2629_v0 = vmax.f32 %v2416_v29, 0.0 }
 0x385   :  { %v8009_v13 = vpop.f32.mrf.mxu0  ;;  %v8011_v27 = vpop.f32.mrf.mxu1  ;;  %10172 = vst [vmem:[#allocation25_spill] sm:$0xff] %v8035_v52  ;;  %v3072_v51 = vmul.f32 %v8035_v52, %v2624_v40  ;;  %v3074_v40 = vmul.f32 %v8046_v4, %v2626_v17 }
 0x386   :  { %10166 = vst [vmem:[#allocation20_spill] sm:$0xff] %v8009_v13  ;;  %v8070_v29 = vpop.permute.xlu0 %2868 }
 0x387   :  { %v8015_v56 = vpop.f32.mrf.mxu0  ;;  %v8017_v32 = vpop.f32.mrf.mxu1  ;;  %3701 = vmatmul.mubr.bf16.gmra.mxu1 %v5664_v9  ;;  %v2625_v9 = vmax.f32 %v2406_v22, 0.0  ;;  %v2420_v22 = vadd.f32 %v7913_v48, %v7443_v7  ;;  %v2424_v7 = vadd.f32 %v7928_v15, %v7460_v57  ;;  %10177 = vst [vmem:[#allocation99_spill] sm:$0xff] %v8070_v29  ;;  %v5667_v57 = vld [vmem:[%s9892_s2 + $0x2c] ss:$16 sps:$4 sm:$0xff]  }
 0x388   :  { %10168 = vst [vmem:[#allocation22_spill] sm:$0xff] %v8015_v56  ;;  %5276 = vmatprep.mubr.msk.bf16.mxu1 %vm634_vm0, %v5665_v39 }
 0x389   :  { %v8031_v56 = vpop.f32.mrf.mxu0  ;;  %v8033_v13 = vpop.f32.mrf.mxu1  ;;  %v3073_v60 = vmul.f32 %v8035_v52, %v2625_v9  ;;  %v3075_v9 = vmul.f32 %v8046_v4, %v2627_v35  ;;  %v2630_v21 = vmax.f32 %v2420_v22, 0.0  ;;  %v2631_v22 = vmax.f32 %v2422_v8, 0.0 }
 0x38a   :  { %10171 = vst [vmem:[#allocation24_spill] sm:$0xff] %v8031_v56  ;;  %v3233_v56 = vadd.f32 %v7857_v31, %v3069_v49  ;;  %v5666_v49 = vld [vmem:[%s9891_s1 + $0x1f0] ss:$8 sps:$4 sm:$0xff]  }
 0x38b   :  { %v8042_v38 = vpop.f32.mrf.mxu0  ;;  %v8044_v39 = vpop.f32.mrf.mxu1  ;;  %v3079_v43 = vmul.f32 %v8070_v29, %v2631_v22 }
 0x38c   :  { %10174 = vst [vmem:[#allocation27_spill] sm:$0xff] %v8042_v38  ;;  %v8057_v38 = vpop.permute.xlu1 %2863  ;;  %v3234_v46 = vadd.f32 %v3233_v56, %v3071_v23  ;;  %v3166_v56 = vadd.f32 %v7882_v16, %v3072_v51  ;;  %v3078_v16 = vmul.f32 %v8070_v29, %v2630_v21  ;;  %v2633_v51 = vmax.f32 %v2426_v58, 0.0  ;;  %v5779_v29 = vld [vmem:[%s9892_s2 + $0x308] ss:$16 sps:$4 sm:$0xff]  }
 0x38d   :  { %v8052_v19 = vpop.f32.mrf.mxu0  ;;  %v8054_v34 = vpop.f32.mrf.mxu1  ;;  %10176 = vst [vmem:[#allocation98_spill] sm:$0xff] %v8057_v38  ;;  %v3076_v17 = vmul.f32 %v8057_v38, %v2628_v50  ;;  %v3077_v35 = vmul.f32 %v8057_v38, %v2629_v0 }
 0x38e   :  { %v3235_v23 = vadd.f32 %v3234_v46, %v3073_v60  ;;  %v3167_v52 = vadd.f32 %v3166_v56, %v3074_v40  ;;  %v2432_v60 = vadd.f32 %v7949_v36, %v7489_v44  ;;  %v2634_v40 = vmax.f32 %v2430_v25, 0.0 }
 0x38f   :  { %v8063_v48 = vpop.f32.mrf.mxu0  ;;  %v3472_v31 = vpop.f32.mrf.mxu1  ;;  %3711 = vmatmul.mubr.bf16.gmra.mxu1 %v5666_v49  ;;  %v2632_v49 = vmax.f32 %v2424_v7, 0.0  ;;  %v10180_v36 = vpack.c.bf16 %v7930_v55, %v7915_v37 }
 0x390   :  { %4244 = vmatprep.mubr.bf16.mxu1 %v5667_v57  ;;  %v3236_v57 = vadd.f32 %v3235_v23, %v3075_v9  ;;  %v3168_v8 = vadd.f32 %v3167_v52, %v3076_v17  ;;  %v3734_v9 = vpack.c.bf16 %v8054_v34, %v8033_v13  ;;  %v10181_v52 = vmov 0  }
 0x391   :  { %v8078_v54 = vpop.f32.mrf.mxu0  ;;  %v3474_v15 = vpop.f32.mrf.mxu1  ;;  %v8105_v23 = vmax.bf16 %v10181_v52, %v10180_v36  ;;  %v2434_v17 = vadd.f32 %v7953_v41, %v7493_v59  ;;  %v3726_v13 = vpack.c.bf16 %v7936_v33, %v7926_v10  ;;  %v2635_v34 = vmax.f32 %v2432_v60, 0.0 }
 0x392   :  { %10178 = vst [vmem:[#allocation100_spill] sm:$0xff] %v8078_v54  ;;  %v8087_v54 = vpop.permute.xlu1 %2873  ;;  %v3237_v46 = vadd.f32 %v3236_v57, %v3077_v35  ;;  %v3169_v44 = vadd.f32 %v3168_v8, %v3078_v16  ;;  %v3733_v59 = vpack.c.bf16 %v8044_v39, %v8017_v32  ;;  %v2442_v32 = vadd.f32 %v7972_v12, %v7522_v61 }
 0x393   :  { %v8084_v53 = vpop.f32.mrf.mxu0  ;;  %v3476_v4 = vpop.f32.mrf.mxu1  ;;  %10179 = vst [vmem:[#allocation101_spill] sm:$0xff] %v8087_v54  ;;  %v3080_v7 = vmul.f32 %v8087_v54, %v2632_v49  ;;  %v2440_v49 = vadd.f32 %v7961_v5, %v7509_v42  ;;  %v2636_v42 = vmax.f32 %v2434_v17, 0.0  ;;  %v2444_v39 = vadd.f32 %v7976_v20, %v7526_v2 }
 0x394   :  { %v3735_v63 = vpack.c.bf16 %v3476_v4, %v3472_v31  ;;  %v3081_v4 = vmul.f32 %v8087_v54, %v2633_v51  ;;  %v8108_v31 = vpop.permute.xlu0 %2878  ;;  %v3238_v22 = vadd.f32 %v3237_v46, %v3079_v43  ;;  %v2446_v2 = vadd.f32 %v7980_v45, %v7538_v26  ;;  %v10186_v26 = vld [vmem:[#allocation94_spill] sm:$0xff] }
 0x395   :  { %v8091_v50 = vpop.f32.mrf.mxu0  ;;  %v3478_v0 = vpop.f32.mrf.mxu1  ;;  %10182 = vst [vmem:[#allocation102_spill] sm:$0xff] %v8108_v31  ;;  %v3170_v25 = vadd.f32 %v3169_v44, %v3080_v7  ;;  %v3082_v57 = vmul.f32 %v8108_v31, %v2634_v40  ;;  %v3731_v20 = vpack.c.bf16 %v8005_v47, %v7986_v62  ;;  %v3797_v12 = vmax.bf16 %v10181_v52, %v3733_v59 }
 0x396   :  { %v3736_v21 = vpack.c.bf16 %v3478_v0, %v3474_v15  ;;  %v2436_v15 = vadd.f32 %v7957_v6, %v7505_v24  ;;  %v3799_v41 = vmax.bf16 %v10181_v52, %v3735_v63  ;;  %v3732_v24 = vpack.c.bf16 %v8011_v27, %v7999_v1  ;;  %v8134_v5 = vpop.permute.xlu1 %2883 }
 0x397   :  { %v8097_v58 = vpop.f32.mrf.mxu0  ;;  %v8099_v56 = vpop.f32.mrf.mxu1  ;;  %v3798_v6 = vmax.bf16 %v10181_v52, %v3734_v9  ;;  %v3239_v60 = vadd.f32 %v3238_v22, %v3081_v4  ;;  %10183 = vst [vmem:[#allocation103_spill] sm:$0xff] %v8134_v5  ;;  %v3083_v1 = vmul.f32 %v8108_v31, %v2635_v34  ;;  %v3727_v27 = vpack.c.bf16 %v7955_v28, %v7940_v30  ;;  %v10185_v4 = vld [vmem:[#allocation93_spill] sm:$0xff]  ;;  %v10191_v22 = vld [vmem:[#allocation19_spill] sm:$0xff] }
 0x398   :  { %v3800_v35 = vmax.bf16 %v10181_v52, %v3736_v21  ;;  %v2637_v0 = vmax.f32 %v2436_v15, 0.0  ;;  %v2638_v63 = vmax.f32 %v2440_v49, 0.0  ;;  %v8149_v61 = vpop.permute.xlu0 %2888  ;;  %v3171_v7 = vadd.f32 %v3170_v25, %v3082_v57  ;;  %v10192_v57 = vld [vmem:[#allocation95_spill] sm:$0xff] }
 0x399   :  { %v8117_v55 = vpop.f32.mrf.mxu0  ;;  %v8119_v37 = vpop.f32.mrf.mxu1  ;;  %10184 = vst [vmem:[#allocation104_spill] sm:$0xff] %v8149_v61  ;;  %v3730_v40 = vpack.c.bf16 %v7982_v18, %v7974_v3  ;;  %v2450_v9 = vadd.f32 %v7984_v14, %v7542_v11  ;;  %v3796_v21 = vmax.bf16 %v10181_v52, %v3732_v24  ;;  %v3728_v45 = vpack.c.bf16 %v10186_v26, %v10185_v4  ;;  %v10188_v11 = vld [vmem:[#allocation35_spill] sm:$0xff]  ;;  %v10189_v14 = vld [vmem:[#allocation16_spill] sm:$0xff] }
 0x39a   :  { %3849 = vmatprep.subr.bf16.mxu0 %v3800_v35  ;;  %v3084_v47 = vmul.f32 %v8134_v5, %v2636_v42  ;;  %v2639_v62 = vmax.f32 %v2442_v32, 0.0  ;;  %v2640_v17 = vmax.f32 %v2444_v39, 0.0  ;;  %v8168_v34 = vpop.permute.xlu1 %2893  ;;  %v3240_v18 = vadd.f32 %v3239_v60, %v3083_v1  ;;  %v10190_v35 = vld [vmem:[#allocation36_spill] sm:$0xff]  ;;  %v10194_v1 = vld [vmem:[#allocation38_spill] sm:$0xff]  ;;  %v10196_v4 = vld [vmem:[#allocation39_spill] sm:$0xff] }
 0x39b   :  { %v8130_v16 = vpop.f32.mrf.mxu0  ;;  %v8132_v51 = vpop.f32.mrf.mxu1  ;;  %3850 = vmatpush1.bf16.msra.mxu0 %v3799_v41  ;;  %10187 = vst [vmem:[#allocation93_spill] sm:$0xff] %v8168_v34  ;;  %v3085_v3 = vmul.f32 %v8134_v5, %v2637_v0  ;;  %v2452_v15 = vadd.f32 %v10189_v14, %v10188_v11  ;;  %v2454_v49 = vadd.f32 %v10191_v22, %v10190_v35  ;;  %v10193_v24 = vld [vmem:[#allocation96_spill] sm:$0xff]  ;;  %v2641_v42 = vmax.f32 %v2446_v2, 0.0 }
 0x39c   :  { %3851 = vmatprep.subr.bf16.mxu0 %v3798_v6  ;;  %v3086_v25 = vmul.f32 %v8149_v61, %v2638_v63  ;;  %v3729_v6 = vpack.c.bf16 %v10193_v24, %v10192_v57  ;;  %v3795_v60 = vmax.bf16 %v10181_v52, %v3731_v20  ;;  %v3794_v32 = vmax.bf16 %v10181_v52, %v3730_v40  ;;  %v10195_v0 = vld [vmem:[#allocation20_spill] sm:$0xff]  ;;  %v8195_v22 = vpop.permute.xlu0 %2898  ;;  %v10199_v57 = vld [vmem:[#allocation41_spill] sm:$0xff] }
 0x39d   :  { %v8145_v46 = vpop.f32.mrf.mxu0  ;;  %v8147_v43 = vpop.f32.mrf.mxu1  ;;  %v2642_v39 = vmax.f32 %v2450_v9, 0.0  ;;  %v3792_v63 = vmax.bf16 %v10181_v52, %v3728_v45  ;;  %v3172_v35 = vadd.f32 %v3171_v7, %v3084_v47  ;;  %v3087_v2 = vmul.f32 %v8149_v61, %v2639_v62  ;;  %10198 = vst [vmem:[#allocation94_spill] sm:$0xff] %v8195_v22  ;;  %v10200_v24 = vld [vmem:[#allocation24_spill] sm:$0xff] }
 0x39e   :  { %v3088_v20 = vmul.f32 %v8168_v34, %v2640_v17  ;;  %v2643_v40 = vmax.f32 %v2452_v15, 0.0  ;;  %v2644_v9 = vmax.f32 %v2454_v49, 0.0  ;;  %v3241_v7 = vadd.f32 %v3240_v18, %v3085_v3  ;;  %v8206_v17 = vpop.permute.xlu1 %2903  ;;  %v10203_v15 = vld [vmem:[#allocation27_spill] sm:$0xff] }
 0x39f   :  { %v8161_v44 = vpop.f32.mrf.mxu0  ;;  %v8163_v36 = vpop.f32.mrf.mxu1  ;;  %3852 = vmatpush1.bf16.msra.mxu0 %v3797_v12  ;;  %v2456_v12 = vadd.f32 %v10195_v0, %v10194_v1  ;;  %v2462_v1 = vadd.f32 %v10200_v24, %v10199_v57  ;;  %v3173_v47 = vadd.f32 %v3172_v35, %v3086_v25  ;;  %v3793_v62 = vmax.bf16 %v10181_v52, %v3729_v6  ;;  %v10205_v6 = vld [vmem:[#allocation44_spill] sm:$0xff] }
 0x3a0   :  { %3853 = vmatprep.subr.bf16.mxu0 %v3796_v21  ;;  %v10197_v21 = vld [vmem:[#allocation22_spill] sm:$0xff]  ;;  %10201 = vst [vmem:[#allocation35_spill] sm:$0xff] %v8206_v17  ;;  %v3090_v57 = vmul.f32 %v8195_v22, %v2642_v39  ;;  %v3790_v18 = vmax.bf16 %v10181_v52, %v3726_v13  ;;  %v3242_v3 = vadd.f32 %v3241_v7, %v3087_v2  ;;  %v8220_v25 = vpop.permute.xlu0 %2908 }
 0x3a1   :  { %v8175_v59 = vpop.f32.mrf.mxu0  ;;  %v8177_v41 = vpop.f32.mrf.mxu1  ;;  %v2460_v26 = vadd.f32 %v10197_v21, %v10196_v4  ;;  %v3089_v21 = vmul.f32 %v8168_v34, %v2641_v42  ;;  %v2645_v24 = vmax.f32 %v2456_v12, 0.0  ;;  %10204 = vst [vmem:[#allocation16_spill] sm:$0xff] %v8220_v25  ;;  %v2466_v35 = vadd.f32 %v8052_v19, %v10205_v6  ;;  %v10206_v42 = vld [vmem:[#allocation45_spill] sm:$0xff] }
 0x3a2   :  { %v2470_v39 = vadd.f32 %v8063_v48, %v10206_v42  ;;  %v3174_v12 = vadd.f32 %v3173_v47, %v3088_v20  ;;  %v3791_v19 = vmax.bf16 %v10181_v52, %v3727_v27  ;;  %v8236_v2 = vpop.permute.xlu1 %2913  ;;  %v10208_v48 = vld [vmem:[#allocation47_spill] sm:$0xff]  ;;  %v10209_v20 = vld [vmem:[#allocation100_spill] sm:$0xff]  ;;  %v10212_v42 = vld [vmem:[#allocation50_spill] sm:$0xff] }
 0x3a3   :  { %v8188_v11 = vpop.f32.mrf.mxu0  ;;  %v8190_v14 = vpop.f32.mrf.mxu1  ;;  %3854 = vmatpush1.bf16.msra.mxu0 %v3795_v60  ;;  %v10202_v60 = vld [vmem:[#allocation42_spill] sm:$0xff]  ;;  %v2646_v8 = vmax.f32 %v2460_v26, 0.0  ;;  %v3091_v26 = vmul.f32 %v8195_v22, %v2643_v40  ;;  %10207 = vst [vmem:[#allocation36_spill] sm:$0xff] %v8236_v2  ;;  %v2472_v7 = vadd.f32 %v10209_v20, %v10208_v48  ;;  %v10210_v40 = vld [vmem:[#allocation48_spill] sm:$0xff]  ;;  %v3093_v47 = vmul.f32 %v8206_v17, %v2645_v24  ;;  %v10213_v20 = vld [vmem:[#allocation51_spill] sm:$0xff] }
 0x3a4   :  { %3855 = vmatprep.subr.bf16.mxu0 %v3794_v32  ;;  %v2464_v49 = vadd.f32 %v10203_v15, %v10202_v60  ;;  %v3092_v60 = vmul.f32 %v8206_v17, %v2644_v9  ;;  %v2647_v15 = vmax.f32 %v2462_v1, 0.0  ;;  %v2474_v9 = vadd.f32 %v8084_v53, %v10210_v40  ;;  %v10249_v22 = vld [vmem:[#allocation75_spill] sm:$0xff] }
 0x3a5   :  { %v8201_v4 = vpop.f32.mrf.mxu0  ;;  %v8203_v45 = vpop.f32.mrf.mxu1  ;;  %v3243_v1 = vadd.f32 %v3242_v3, %v3089_v21  ;;  %v2649_v30 = vmax.f32 %v2466_v35, 0.0  ;;  %v2650_v27 = vmax.f32 %v2470_v39, 0.0  ;;  %v2476_v48 = vadd.f32 %v8091_v50, %v10212_v42  ;;  %v10219_v42 = vld [vmem:[#allocation54_spill] sm:$0xff] }
 0x3a6   :  { %v2648_v13 = vmax.f32 %v2464_v49, 0.0  ;;  %v8248_v49 = vpop.permute.xlu0 %2918  ;;  %v2480_v53 = vadd.f32 %v8097_v58, %v10213_v20  ;;  %v3095_v24 = vmul.f32 %v8220_v25, %v2647_v15  ;;  %v2652_v50 = vmax.f32 %v2474_v9, 0.0  ;;  %v8262_v40 = vpop.permute.xlu1 %2923  ;;  %v10215_v58 = vld [vmem:[#allocation53_spill] sm:$0xff] }
 0x3a7   :  { %v8212_v32 = vpop.f32.mrf.mxu0  ;;  %v8214_v0 = vpop.f32.mrf.mxu1  ;;  %3856 = vmatpush1.bf16.msra.mxu0 %v3793_v62  ;;  %v3094_v62 = vmul.f32 %v8220_v25, %v2646_v8  ;;  %10211 = vst [vmem:[#allocation19_spill] sm:$0xff] %v8248_v49  ;;  %v3244_v21 = vadd.f32 %v3243_v1, %v3091_v26  ;;  %10214 = vst [vmem:[#allocation95_spill] sm:$0xff] %v8262_v40  ;;  %v2482_v26 = vadd.f32 %v8117_v55, %v10215_v58 }
 0x3a8   :  { %3857 = vmatprep.subr.bf16.mxu0 %v3792_v63  ;;  %v3175_v63 = vadd.f32 %v3174_v12, %v3090_v57  ;;  %v3096_v39 = vmul.f32 %v8236_v2, %v2648_v13  ;;  %v2651_v12 = vmax.f32 %v2472_v7, 0.0  ;;  %v2484_v20 = vadd.f32 %v8130_v16, %v10219_v42 }
 0x3a9   :  { %v8228_v10 = vpop.f32.mrf.mxu0  ;;  %v8230_v33 = vpop.f32.mrf.mxu1  ;;  %v3097_v7 = vmul.f32 %v8236_v2, %v2649_v30  ;;  %v3098_v9 = vmul.f32 %v8248_v49, %v2650_v27  ;;  %v2653_v25 = vmax.f32 %v2476_v48, 0.0  ;;  %v2654_v55 = vmax.f32 %v2480_v53, 0.0 }
 0x3aa   :  { %v3176_v57 = vadd.f32 %v3175_v63, %v3092_v60  ;;  %v10216_v60 = vld [vmem:[#allocation92_spill] sm:$0xff]  ;;  %v3245_v63 = vadd.f32 %v3244_v21, %v3093_v47  ;;  %v8278_v58 = vpop.permute.xlu0 %2928  ;;  %v10222_v47 = vld [vmem:[#allocation89_spill] sm:$0xff]  ;;  %v3099_v42 = vmul.f32 %v8248_v49, %v2651_v12  ;;  %v2655_v2 = vmax.f32 %v2482_v26, 0.0 }
 0x3ab   :  { %v8244_v6 = vpop.f32.mrf.mxu0  ;;  %v8246_v28 = vpop.f32.mrf.mxu1  ;;  %3858 = vmatpush1.bf16.msra.mxu0 %v3791_v19  ;;  %v10217_v19 = vld [vmem:[#allocation90_spill] sm:$0xff]  ;;  %10220 = vst [vmem:[#allocation96_spill] sm:$0xff] %v8278_v58  ;;  %v3102_v26 = vmul.f32 %v8278_v58, %v2654_v55 }
 0x3ac   :  { %3859 = vmatprep.subr.bf16.mxu0 %v3790_v18  ;;  %v10218_v15 = vpack.c.bf16 %v10216_v60, %v10217_v19  ;;  %v3177_v18 = vadd.f32 %v3176_v57, %v3094_v62  ;;  %v10221_v60 = vld [vmem:[#allocation91_spill] sm:$0xff]  ;;  %v3246_v16 = vadd.f32 %v3245_v63, %v3095_v24  ;;  %v10224_v57 = vld [vmem:[#allocation56_spill] sm:$0xff]  ;;  %v2656_v63 = vmax.f32 %v2484_v20, 0.0 }
 0x3ad   :  { %v8257_v3 = vpop.f32.mrf.mxu0  ;;  %v8259_v35 = vpop.f32.mrf.mxu1  ;;  %v10223_v62 = vpack.c.bf16 %v10221_v60, %v10222_v47  ;;  %v2486_v19 = vadd.f32 %v8145_v46, %v10224_v57  ;;  %v10226_v60 = vld [vmem:[#allocation88_spill] sm:$0xff]  ;;  %v10227_v47 = vld [vmem:[#allocation86_spill] sm:$0xff]  ;;  %v10229_v46 = vld [vmem:[#allocation59_spill] sm:$0xff] }
 0x3ae   :  { %v3788_v1 = vmax.bf16 %v10181_v52, %v10218_v15  ;;  %v10225_v15 = vld [vmem:[#allocation57_spill] sm:$0xff]  ;;  %v3178_v53 = vadd.f32 %v3177_v18, %v3096_v39  ;;  %v2492_v57 = vadd.f32 %v8175_v59, %v10229_v46  ;;  %v3247_v39 = vadd.f32 %v3246_v16, %v3097_v7  ;;  %v8305_v18 = vpop.permute.xlu1 %2933  ;;  %v10234_v7 = vld [vmem:[#allocation87_spill] sm:$0xff] }
 0x3af   :  { %v8272_v8 = vpop.f32.mrf.mxu0  ;;  %v8274_v13 = vpop.f32.mrf.mxu1  ;;  %3860 = vmatpush1.bf16.msra.mxu0 %v8105_v23  ;;  %v3787_v21 = vmax.bf16 %v10181_v52, %v10223_v62  ;;  %v2490_v30 = vadd.f32 %v8161_v44, %v10225_v15  ;;  %v3100_v23 = vmul.f32 %v8262_v40, %v2652_v50  ;;  %v10228_v62 = vpack.c.bf16 %v10226_v60, %v10227_v47  ;;  %v10230_v44 = vld [vmem:[#allocation60_spill] sm:$0xff]  ;;  %v10232_v47 = vld [vmem:[#allocation62_spill] sm:$0xff] }
 0x3b0   :  { %3861 = vmatprep.subr.bf16.mxu0 %v3788_v1  ;;  %v2494_v1 = vadd.f32 %v8188_v11, %v10230_v44  ;;  %v3179_v12 = vadd.f32 %v3178_v53, %v3098_v9  ;;  %v3101_v50 = vmul.f32 %v8262_v40, %v2653_v25  ;;  %10231 = vst [vmem:[#allocation38_spill] sm:$0xff] %v8305_v18  ;;  %v2657_v60 = vmax.f32 %v2486_v19, 0.0  ;;  %v10235_v9 = vld [vmem:[#allocation85_spill] sm:$0xff]  ;;  %v8318_v19 = vpop.permute.xlu0 %2938 }
 0x3b1   :  { %v2511_v27 = vpop.f32.mrf.mxu0  ;;  %v8289_v48 = vpop.f32.mrf.mxu1  ;;  %v3786_v24 = vmax.bf16 %v10181_v52, %v10228_v62  ;;  %v2658_v20 = vmax.f32 %v2490_v30, 0.0  ;;  %v2496_v59 = vadd.f32 %v8201_v4, %v10232_v47  ;;  %v10233_v62 = vld [vmem:[#allocation63_spill] sm:$0xff]  ;;  %v10236_v25 = vpack.c.bf16 %v10234_v7, %v10235_v9  ;;  %10237 = vst [vmem:[#allocation20_spill] sm:$0xff] %v8318_v19 }
 0x3b2   :  { %v2500_v11 = vadd.f32 %v8212_v32, %v10233_v62  ;;  %v3248_v16 = vadd.f32 %v3247_v39, %v3099_v42  ;;  %v3180_v53 = vadd.f32 %v3179_v12, %v3100_v23  ;;  %v3104_v4 = vmul.f32 %v8305_v18, %v2656_v63  ;;  %v10238_v32 = vld [vmem:[#allocation65_spill] sm:$0xff]  ;;  %v8325_v9 = vpop.permute.xlu1 %2943  ;;  %v10240_v42 = vld [vmem:[#allocation66_spill] sm:$0xff] }
 0x3b3   :  { %v2513_v15 = vpop.f32.mrf.mxu0  ;;  %v8301_v17 = vpop.f32.mrf.mxu1  ;;  %3862 = vmatpush1.bf16.msra.mxu0 %v3787_v21  ;;  %v3785_v55 = vmax.bf16 %v10181_v52, %v10236_v25  ;;  %v3103_v21 = vmul.f32 %v8278_v58, %v2655_v2  ;;  %v2659_v30 = vmax.f32 %v2492_v57, 0.0  ;;  %v2660_v47 = vmax.f32 %v2494_v1, 0.0  ;;  %10239 = vst [vmem:[#allocation39_spill] sm:$0xff] %v8325_v9 }
 0x3b4   :  { %3863 = vmatprep.subr.bf16.mxu0 %v3786_v24  ;;  %v2502_v24 = vadd.f32 %v8228_v10, %v10238_v32  ;;  %v3249_v49 = vadd.f32 %v3248_v16, %v3101_v50  ;;  %v3181_v7 = vadd.f32 %v3180_v53, %v3102_v26  ;;  %v2504_v23 = vadd.f32 %v8244_v6, %v10240_v42  ;;  %v8333_v25 = vpop.permute.xlu0 %2948  ;;  %v10242_v50 = vld [vmem:[#allocation68_spill] sm:$0xff]  ;;  %v10243_v16 = vld [vmem:[#allocation69_spill] sm:$0xff] }
 0x3b5   :  { %v2515_v46 = vpop.f32.mrf.mxu0  ;;  %v8311_v44 = vpop.f32.mrf.mxu1  ;;  %v3105_v2 = vmul.f32 %v8305_v18, %v2657_v60  ;;  %v3106_v63 = vmul.f32 %v8318_v19, %v2658_v20  ;;  %v2661_v57 = vmax.f32 %v2496_v59, 0.0  ;;  %v2662_v1 = vmax.f32 %v2500_v11, 0.0  ;;  %10241 = vst [vmem:[#allocation22_spill] sm:$0xff] %v8333_v25  ;;  %v10246_v18 = vld [vmem:[#allocation72_spill] sm:$0xff] }
 0x3b6   :  { %v3250_v10 = vadd.f32 %v3249_v49, %v3103_v21  ;;  %v2506_v26 = vadd.f32 %v8257_v3, %v10242_v50  ;;  %v2510_v53 = vadd.f32 %v8272_v8, %v10243_v16  ;;  %v3182_v6 = vadd.f32 %v3181_v7, %v3104_v4  ;;  %v8343_v42 = vpop.permute.xlu1 %2953  ;;  %v10245_v49 = vld [vmem:[#allocation71_spill] sm:$0xff] }
 0x3b7   :  { %v2519_v62 = vpop.f32.mrf.mxu0  ;;  %v8323_v40 = vpop.f32.mrf.mxu1  ;;  %3864 = vmatpush1.bf16.msra.mxu0 %v3785_v55  ;;  %v3107_v55 = vmul.f32 %v8318_v19, %v2659_v30  ;;  %v3108_v60 = vmul.f32 %v8325_v9, %v2660_v47  ;;  %v2663_v20 = vmax.f32 %v2502_v24, 0.0  ;;  %v2664_v32 = vmax.f32 %v2504_v23, 0.0  ;;  %10244 = vst [vmem:[#allocation41_spill] sm:$0xff] %v8343_v42  ;;  %v10248_v23 = vld [vmem:[#allocation74_spill] sm:$0xff] }
 0x3b8   :  { %v2512_v21 = vadd.f32 %v2511_v27, %v10245_v49  ;;  %v2514_v58 = vadd.f32 %v2513_v15, %v10246_v18  ;;  %v3251_v3 = vadd.f32 %v3250_v10, %v3105_v2  ;;  %v3183_v50 = vadd.f32 %v3182_v6, %v3106_v63  ;;  %v8351_v16 = vpop.permute.xlu0 %2958 }
 0x3b9   :  { %v2521_v39 = vpop.f32.mrf.mxu0  ;;  %v8331_v12 = vpop.f32.mrf.mxu1  ;;  %v3109_v8 = vmul.f32 %v8325_v9, %v2661_v57  ;;  %v3110_v4 = vmul.f32 %v8333_v25, %v2662_v1  ;;  %v2665_v47 = vmax.f32 %v2506_v26, 0.0  ;;  %v2666_v24 = vmax.f32 %v2510_v53, 0.0  ;;  %10247 = vst [vmem:[#allocation24_spill] sm:$0xff] %v8351_v16  ;;  %v10251_v26 = vld [vmem:[#allocation77_spill] sm:$0xff] }
 0x3ba   :  { %v2516_v19 = vadd.f32 %v2515_v46, %v10248_v23  ;;  %v2520_v34 = vadd.f32 %v2519_v62, %v10249_v22  ;;  %v3252_v27 = vadd.f32 %v3251_v3, %v3107_v55  ;;  %v3184_v49 = vadd.f32 %v3183_v50, %v3108_v60  ;;  %v8359_v10 = vpop.permute.xlu1 %2963  ;;  %v10252_v46 = vld [vmem:[#allocation2_spill] sm:$0xff] }
 0x3bb   :  { %v2523_v59 = vpop.f32.mrf.mxu0  ;;  %v8341_v11 = vpop.f32.mrf.mxu1  ;;  %v3111_v15 = vmul.f32 %v8333_v25, %v2663_v20  ;;  %v3112_v63 = vmul.f32 %v8343_v42, %v2664_v32  ;;  %v2667_v57 = vmax.f32 %v2512_v21, 0.0  ;;  %v2668_v1 = vmax.f32 %v2514_v58, 0.0  ;;  %10250 = vst [vmem:[#allocation42_spill] sm:$0xff] %v8359_v10  ;;  %v10254_v21 = vld [vmem:[#allocation78_spill] sm:$0xff]  ;;  %v10255_v25 = vld [vmem:[#allocation4_spill] sm:$0xff] }
 0x3bc   :  { %v2522_v53 = vadd.f32 %v2521_v39, %v10251_v26  ;;  %v3253_v6 = vadd.f32 %v3252_v27, %v3109_v8  ;;  %v3185_v9 = vadd.f32 %v3184_v49, %v3110_v4  ;;  %v2524_v23 = vadd.f32 %v2523_v59, %v10252_v46  ;;  %v8367_v32 = vpop.permute.xlu0 %2968 }
 0x3bd   :  { %v2525_v30 = vpop.f32.mrf.mxu0  ;;  %v8349_v7 = vpop.f32.mrf.mxu1  ;;  %v3113_v55 = vmul.f32 %v8343_v42, %v2665_v47  ;;  %v3114_v60 = vmul.f32 %v8351_v16, %v2666_v24  ;;  %v2669_v20 = vmax.f32 %v2516_v19, 0.0  ;;  %v2670_v3 = vmax.f32 %v2520_v34, 0.0  ;;  %10253 = vst [vmem:[#allocation27_spill] sm:$0xff] %v8367_v32  ;;  %v10256_v24 = vld [vmem:[#allocation79_spill] sm:$0xff]  ;;  %v10257_v34 = vld [vmem:[#allocation6_spill] sm:$0xff] }
 0x3be   :  { %v3254_v58 = vadd.f32 %v3253_v6, %v3111_v15  ;;  %v2526_v50 = vadd.f32 %v2525_v30, %v10254_v21  ;;  %v3186_v59 = vadd.f32 %v3185_v9, %v3112_v63  ;;  %v3115_v27 = vmul.f32 %v8351_v16, %v2667_v57  ;;  %v8381_v9 = vpop.permute.xlu1 %2973 }
 0x3bf   :  { %v2529_v18 = vpop.f32.mrf.mxu0  ;;  %v8356_v2 = vpop.f32.mrf.mxu1  ;;  %v3116_v49 = vmul.f32 %v8359_v10, %v2668_v1  ;;  %v2671_v47 = vmax.f32 %v2522_v53, 0.0  ;;  %v2672_v26 = vmax.f32 %v2524_v23, 0.0  ;;  %10258 = vst [vmem:[#allocation44_spill] sm:$0xff] %v8381_v9  ;;  %v10259_v1 = vld [vmem:[#allocation80_spill] sm:$0xff] }
 0x3c0   :  { %v2530_v39 = vadd.f32 %v2529_v18, %v10255_v25  ;;  %v3255_v30 = vadd.f32 %v3254_v58, %v3113_v55  ;;  %v3187_v6 = vadd.f32 %v3186_v59, %v3114_v60  ;;  %v3117_v25 = vmul.f32 %v8359_v10, %v2669_v20  ;;  %v10261_v55 = vld [vmem:[#allocation8_spill] sm:$0xff]  ;;  %v10263_v10 = vld [vmem:[#allocation81_spill] sm:$0xff] }
 0x3c1   :  { %v2531_v22 = vpop.f32.mrf.mxu0  ;;  %v8363_v62 = vpop.f32.mrf.mxu1  ;;  %v3118_v18 = vmul.f32 %v8367_v32, %v2670_v3  ;;  %v2673_v63 = vmax.f32 %v2526_v50, 0.0  ;;  %v3120_v20 = vmul.f32 %v8381_v9, %v2672_v26 }
 0x3c2   :  { %v2532_v19 = vadd.f32 %v2531_v22, %v10256_v24  ;;  %v2674_v57 = vmax.f32 %v2530_v39, 0.0  ;;  %v3256_v22 = vadd.f32 %v3255_v30, %v3115_v27  ;;  %v3119_v24 = vmul.f32 %v8367_v32, %v2671_v47 }
 0x3c3   :  { %v2533_v8 = vpop.f32.mrf.mxu0  ;;  %v8371_v4 = vpop.f32.mrf.mxu1 }
 0x3c4   :  { %v2534_v46 = vadd.f32 %v2533_v8, %v10257_v34  ;;  %v3188_v8 = vadd.f32 %v3187_v6, %v3116_v49  ;;  %v8387_v34 = vpop.permute.xlu0 %2978  ;;  %v2675_v3 = vmax.f32 %v2532_v19, 0.0  ;;  %v3257_v39 = vadd.f32 %v3256_v22, %v3117_v25 }
 0x3c5   :  { %v2535_v42 = vpop.f32.mrf.mxu0  ;;  %v8377_v15 = vpop.f32.mrf.mxu1  ;;  %10260 = vst [vmem:[#allocation45_spill] sm:$0xff] %v8387_v34  ;;  %v3121_v49 = vmul.f32 %v8381_v9, %v2673_v63  ;;  %v3122_v47 = vmul.f32 %v8387_v34, %v2674_v57  ;;  %v10266_v57 = vld [vmem:[#allocation82_spill] sm:$0xff] }
 0x3c6   :  { %v2536_v53 = vadd.f32 %v2535_v42, %v10259_v1  ;;  %v2676_v58 = vmax.f32 %v2534_v46, 0.0  ;;  %v3189_v42 = vadd.f32 %v3188_v8, %v3118_v18  ;;  %v8393_v1 = vpop.permute.xlu1 %2983  ;;  %v3258_v26 = vadd.f32 %v3257_v39, %v3119_v24  ;;  %v10265_v46 = vld [vmem:[#allocation10_spill] sm:$0xff] }
 0x3c7   :  { %v2539_v23 = vpop.f32.mrf.mxu0  ;;  %v8384_v21 = vpop.f32.mrf.mxu1  ;;  %10262 = vst [vmem:[#allocation47_spill] sm:$0xff] %v8393_v1  ;;  %v3123_v18 = vmul.f32 %v8387_v34, %v2675_v3  ;;  %v10268_v3 = vld [vmem:[#allocation12_spill] sm:$0xff] }
 0x3c8   :  { %v2540_v60 = vadd.f32 %v2539_v23, %v10261_v55  ;;  %v2677_v30 = vmax.f32 %v2536_v53, 0.0  ;;  %v8400_v19 = vpop.permute.xlu0 %2988  ;;  %v3190_v25 = vadd.f32 %v3189_v42, %v3120_v20  ;;  %v3124_v22 = vmul.f32 %v8393_v1, %v2676_v58 }
 0x3c9   :  { %v2541_v59 = vpop.f32.mrf.mxu0  ;;  %v8391_v50 = vpop.f32.mrf.mxu1  ;;  %10264 = vst [vmem:[#allocation100_spill] sm:$0xff] %v8400_v19  ;;  %v3259_v9 = vadd.f32 %v3258_v26, %v3121_v49  ;;  %v10270_v26 = vld [vmem:[#allocation83_spill] sm:$0xff] }
 0x3ca   :  { %v2542_v27 = vadd.f32 %v2541_v59, %v10263_v10  ;;  %v2678_v6 = vmax.f32 %v2540_v60, 0.0  ;;  %v8406_v60 = vpop.permute.xlu1 %2993  ;;  %v3191_v16 = vadd.f32 %v3190_v25, %v3122_v47  ;;  %v3125_v24 = vmul.f32 %v8393_v1, %v2677_v30 }
 0x3cb   :  { %v2543_v23 = vpop.f32.mrf.mxu0  ;;  %v8398_v55 = vpop.f32.mrf.mxu1  ;;  %10267 = vst [vmem:[#allocation48_spill] sm:$0xff] %v8406_v60 }
 0x3cc   :  { %v2544_v32 = vadd.f32 %v2543_v23, %v10265_v46  ;;  %v2679_v10 = vmax.f32 %v2542_v27, 0.0  ;;  %v3126_v39 = vmul.f32 %v8400_v19, %v2678_v6  ;;  %v8411_v58 = vpop.permute.xlu0 %2998  ;;  %v3260_v27 = vadd.f32 %v3259_v9, %v3123_v18  ;;  %v10271_v9 = vld [vmem:[#allocation14_spill] sm:$0xff] }
 0x3cd   :  { %v2545_v8 = vpop.f32.mrf.mxu0  ;;  %v3548_v63 = vpop.f32.mrf.mxu1  ;;  %10269 = vst [vmem:[#allocation50_spill] sm:$0xff] %v8411_v58  ;;  %v3192_v34 = vadd.f32 %v3191_v16, %v3124_v22 }
 0x3ce   :  { %v2680_v59 = vmax.f32 %v2544_v32, 0.0  ;;  %v2546_v53 = vadd.f32 %v2545_v8, %v10266_v57  ;;  %v3127_v32 = vmul.f32 %v8400_v19, %v2679_v10  ;;  %v3261_v25 = vadd.f32 %v3260_v27, %v3125_v24  ;;  %v8419_v18 = vpop.permute.xlu1 %3003 }
 0x3cf   :  { %v2549_v23 = vpop.f32.mrf.mxu0  ;;  %v3552_v20 = vpop.f32.mrf.mxu1  ;;  %v3193_v6 = vadd.f32 %v3192_v34, %v3126_v39  ;;  %10272 = vst [vmem:[#allocation51_spill] sm:$0xff] %v8419_v18  ;;  %v10273_v34 = vld [vmem:[#allocation84_spill] sm:$0xff]  ;;  %v3750_v27 = vpack.c.bf16 %v3548_v63, %v8391_v50  ;;  %v3748_v63 = vpack.c.bf16 %v8377_v15, %v8363_v62 }
 0x3d0   :  { %v2681_v42 = vmax.f32 %v2546_v53, 0.0  ;;  %v2550_v46 = vadd.f32 %v2549_v23, %v10268_v3  ;;  %v3128_v8 = vmul.f32 %v8406_v60, %v2680_v59  ;;  %v3262_v22 = vadd.f32 %v3261_v25, %v3127_v32 }
 0x3d1   :  { %v2551_v57 = vpop.f32.mrf.mxu0  ;;  %v3554_v49 = vpop.f32.mrf.mxu1  ;;  %v3749_v32 = vpack.c.bf16 %v8398_v55, %v8384_v21 }
 0x3d2   :  { %v2682_v47 = vmax.f32 %v2550_v46, 0.0  ;;  %v2552_v30 = vadd.f32 %v2551_v57, %v10270_v26  ;;  %v3129_v53 = vmul.f32 %v8406_v60, %v2681_v42  ;;  %v3194_v10 = vadd.f32 %v3193_v6, %v3128_v8  ;;  %v5777_v60 = vld [vmem:[%s9892_s2 + $0x2e8] ss:$16 sps:$4 sm:$0xff]  }
 0x3d3   :  { %v2553_v1 = vpop.f32.mrf.mxu0  ;;  %v3556_v61 = vpop.f32.mrf.mxu1 }
 0x3d4   :  { %v2683_v23 = vmax.f32 %v2552_v30, 0.0  ;;  %v3130_v3 = vmul.f32 %v8411_v58, %v2682_v47  ;;  %v2554_v16 = vadd.f32 %v2553_v1, %v10271_v9  ;;  %v3751_v24 = vpack.c.bf16 %v3556_v61, %v3552_v20 }
 0x3d5   :  { %v2555_v59 = vpop.f32.mrf.mxu0  ;;  %v3558_v19 = vpop.f32.mrf.mxu1  ;;  %v3263_v30 = vadd.f32 %v3262_v22, %v3129_v53  ;;  %v3746_v22 = vpack.c.bf16 %v8349_v7, %v8331_v12  ;;  %v3744_v7 = vpack.c.bf16 %v8311_v44, %v8289_v48 }
 0x3d6   :  { %v3131_v46 = vmul.f32 %v8411_v58, %v2683_v23  ;;  %v2684_v57 = vmax.f32 %v2554_v16, 0.0  ;;  %v2556_v39 = vadd.f32 %v2555_v59, %v10273_v34  ;;  %v3752_v42 = vpack.c.bf16 %v3558_v19, %v3554_v49 }
 0x3d7   :  { %v8424_v26 = vpop.f32.mrf.mxu1  ;;  %v3195_v47 = vadd.f32 %v3194_v10, %v3130_v3  ;;  %v3815_v20 = vmax.bf16 %v10181_v52, %v3751_v24  ;;  %v3814_v49 = vmax.bf16 %v10181_v52, %v3750_v27  ;;  %v3747_v3 = vpack.c.bf16 %v8371_v4, %v8356_v2 }
 0x3d8   :  { %v2685_v1 = vmax.f32 %v2556_v39, 0.0  ;;  %v3132_v9 = vmul.f32 %v8419_v18, %v2684_v57  ;;  %v3816_v8 = vmax.bf16 %v10181_v52, %v3752_v42  ;;  %v3264_v61 = vadd.f32 %v3263_v30, %v3131_v46 }
 0x3d9   :  { %v8430_v25 = vpop.f32.mrf.mxu1  ;;  %v3813_v16 = vmax.bf16 %v10181_v52, %v3749_v32  ;;  %v3812_v10 = vmax.bf16 %v10181_v52, %v3748_v63  ;;  %v3278_v59 = vlaneseq  ;;  %v5795_v57 = vmov 1966171168  }
 0x3da   :  { %v3133_v50 = vmul.f32 %v8419_v18, %v2685_v1  ;;  %v3196_v19 = vadd.f32 %v3195_v47, %v3132_v9  ;;  %3865 = vmatprep.subr.bf16.mxu0 %v3816_v8  ;;  %v3276_v24 = vunpack.c.l.s4 %v5795_v57  ;;  %v3745_v2 = vpack.c.bf16 %v8341_v11, %v8323_v40 }
 0x3db   :  { %v8437_v6 = vpop.f32.mrf.mxu1  ;;  %3866 = vmatpush2.bf16.msra.mxu0 %v3815_v20  ;;  %v3811_v4 = vmax.bf16 %v10181_v52, %v3747_v3  ;;  %v3810_v47 = vmax.bf16 %v10181_v52, %v3746_v22  ;;  %v3279_v30 = vshrl.u32 %v3278_v59, 7  ;;  %v3743_v11 = vpack.c.bf16 %v8301_v17, %v8274_v13 }
 0x3dc   :  { %v3197_v53 = vrot.slane %v3196_v19, 4  ;;  %v3265_v21 = vadd.f32 %v3264_v61, %v3133_v50  ;;  %v3753_v55 = vpack.c.bf16 %v8437_v6, %v8424_v26  ;;  %3867 = vmatprep.subr.bf16.mxu0 %v3814_v49  ;;  %v3277_v9 = vunpack.c.0.s8 %v3276_v24  ;;  %v5685_v6 = vld [vmem:[%s9892_s2 + $0x124] ss:$16 sps:$4 sm:$0xff]  }
 0x3dd   :  { %v8441_v23 = vpop.f32.mrf.mxu1  ;;  %v3809_v48 = vmax.bf16 %v10181_v52, %v3745_v2  ;;  %v3742_v20 = vpack.c.bf16 %v8259_v35, %v8230_v33  ;;  %v3808_v50 = vmax.bf16 %v10181_v52, %v3744_v7  ;;  %v3807_v17 = vmax.bf16 %v10181_v52, %v3743_v11 }
 0x3de   :  { %v3198_v62 = vadd.f32 %v3197_v53, %v3196_v19  ;;  %v3266_v15 = vrot.slane %v3265_v21, 4  ;;  %v8473_v63 = vsub.s32 %v3277_v9, %v3279_v30  ;;  %v3740_v3 = vpack.c.bf16 %v8203_v45, %v8177_v41  ;;  %v5671_v9 = vld [vmem:[%s9892_s2 + $0x44] ss:$16 sps:$4 sm:$0xff]  }
 0x3df   :  { %v8449_v46 = vpop.f32.mrf.mxu1  ;;  %3868 = vmatpush2.bf16.msra.mxu0 %v3813_v16  ;;  %v3806_v33 = vmax.bf16 %v10181_v52, %v3742_v20  ;;  %vm8484_vm1 = vcmp.lt.s32.totalorder %v3278_v59, 256  ;;  %v10278_v22 = vpack.c.bf16 %v8246_v28, %v8214_v0  ;;  %v3738_v45 = vpack.c.bf16 %v8147_v43, %v8119_v37  ;;  %v5673_v20 = vld [vmem:[%s9892_s2 + $0x64] ss:$16 sps:$4 sm:$0xff]  }
 0x3e0   :  { %v3199_v34 = vrot.slane %v3198_v62, 2  ;;  %v3267_v39 = vadd.f32 %v3266_v15, %v3265_v21  ;;  %3869 = vmatprep.subr.bf16.mxu0 %v3812_v10  ;;  %10274 = vst [vmem:[#allocation53_spill] sm:$0xff] %v8473_v63  ;;  %v3804_v57 = vmax.bf16 %v10181_v52, %v3740_v3  ;;  %v10279_v28 = vpack.c.bf16 %v8190_v14, %v8163_v36  ;;  %v5668_v36 = vld [vmem:[%s9892_s2] ss:$16 sps:$4 sm:$0xff]  }
 0x3e1   :  { %v8451_v27 = vpop.f32.mrf.mxu1  ;;  %v3805_v10 = vmax.bf16 %v10181_v52, %v10278_v22  ;;  %v3802_v37 = vmax.bf16 %v10181_v52, %v3738_v45 }
 0x3e2   :  { %v3200_v42 = vadd.f32 %v3199_v34, %v3198_v62  ;;  %v3268_v12 = vrot.slane %v3267_v39, 2  ;;  %v10275_v62 = vmov 0  ;;  %v3803_v59 = vmax.bf16 %v10181_v52, %v10279_v28 }
 0x3e3   :  { %v8459_v1 = vpop.f32.mrf.mxu1  ;;  %3870 = vmatpush2.bf16.msra.mxu0 %v3811_v4  ;;  %v10276_v62 = vsel %vm8484_vm1, 4294967295, %v10275_v62 }
 0x3e4   :  { %v3201_v32 = vrot.slane %v3200_v42, 1  ;;  %v3269_v8 = vadd.f32 %v3268_v12, %v3267_v39  ;;  %v3755_v61 = vpack.c.bf16 %v8459_v1, %v8449_v46  ;;  %3871 = vmatprep.subr.bf16.mxu0 %v3810_v47  ;;  %10277 = vst [vmem:[#allocation92_spill] sm:$0xff] %v10276_v62  ;;  %v10280_v39 = vpack.c.bf16 %v8132_v51, %v8099_v56  ;;  %v5669_v12 = vld [vmem:[%s9892_s2 + $0x24] ss:$16 sps:$4 sm:$0xff]   ;;  %v5670_v47 = vld [vmem:[%s9892_s2 + $0x20] ss:$16 sps:$4 sm:$0xff]  }
 0x3e5   :  { %v8463_v40 = vpop.f32.mrf.mxu1  ;;  %v3817_v46 = vmax.bf16 %v10181_v52, %v3753_v55  ;;  %v5775_v62 = vld [vmem:[%s9892_s2 + $0x2c8] ss:$16 sps:$4 sm:$0xff]  }
 0x3e6   :  { %v3270_v44 = vrot.slane %v3269_v8, 1  ;;  %v3202_v49 = vadd.f32 %v3201_v32, %v3200_v42  ;;  %v3801_v2 = vmax.bf16 %v10181_v52, %v10280_v39 }
 0x3e7   :  { %v8471_v19 = vpop.f32.mrf.mxu1  ;;  %3872 = vmatpush2.bf16.msra.mxu0 %v3809_v48  ;;  %v5672_v48 = vld [vmem:[%s9892_s2 + $0x40] ss:$16 sps:$4 sm:$0xff]  }
 0x3e8   :  { %v3271_v53 = vadd.f32 %v3270_v44, %v3269_v8  ;;  %3873 = vmatprep.subr.bf16.mxu0 %v3808_v50 }
 0x3e9   :  { %v8475_v21 = vpop.f32.mrf.mxu1 }
 0x3ea   :  { %v3274_v13 = vcombine.low %v3202_v49, %v3271_v53 }
 0x3eb   :  { %v8481_v35 = vpop.f32.mrf.mxu1  ;;  %3874 = vmatpush2.bf16.msra.mxu0 %v3807_v17  ;;  %v5674_v17 = vld [vmem:[%s9892_s2 + $0x60] ss:$16 sps:$4 sm:$0xff]  }
 0x3ec   :  { %v3281_v16 = vrot.slane %v3274_v13, %v8473_v63  ;;  %3875 = vmatprep.subr.bf16.mxu0 %v3806_v33  ;;  %v5675_v33 = vld [vmem:[%s9892_s2 + $0x84] ss:$16 sps:$4 sm:$0xff]  }
 0x3ed   :  { %v8488_v15 = vpop.f32.mrf.mxu1 }
 0x3ee   :  { %v3288_v41 = vrot.slane %v3281_v16, %v8473_v63 }
 0x3ef   :  { %v8498_v24 = vpop.f32.mrf.mxu1  ;;  %3876 = vmatpush2.bf16.msra.mxu0 %v3805_v10 }
 0x3f0   :  { %3294 = vst.msk [vmem:[%s9894_s4] sm:$0x3] %vm8484_vm1, %v3288_v41  ;;  %3877 = vmatprep.subr.bf16.mxu0 %v3804_v57 }
 0x3f1   :  { %v8505_v0 = vpop.f32.mrf.mxu1 }
 0x3f3   :  { %v8512_v43 = vpop.f32.mrf.mxu1  ;;  %3878 = vmatpush2.bf16.msra.mxu0 %v3803_v59 }
 0x3f4   :  { %3879 = vmatprep.subr.bf16.mxu0 %v3802_v37 }
 0x3f5   :  { %v8514_v34 = vpop.f32.mrf.mxu1 }
 0x3f7   :  { %v8520_v4 = vpop.f32.mrf.mxu1  ;;  %3880 = vmatpush2.bf16.msra.mxu0 %v3801_v2  ;;  %v5676_v2 = vld [vmem:[%s9892_s2 + $0x80] ss:$16 sps:$4 sm:$0xff]  }
 0x3f9   :  { %v8522_v42 = vpop.f32.mrf.mxu1 }
 0x3fa   :  { %3882 = vmatmul.mubr.bf16.vlgmr.msra.gmra.mxu0 %v5668_v36 }
 0x3fb   :  { %v8527_v14 = vpop.f32.mrf.mxu1  ;;  %3891 = vmatprep.mubr.bf16.mxu0 %v5669_v12 }
 0x3fd   :  { %v3608_v56 = vpop.f32.mrf.mxu1 }
 0x3ff   :  { %v3612_v51 = vpop.f32.mrf.mxu1 }
 0x401   :  { %v3614_v7 = vpop.f32.mrf.mxu1 }
 0x402   :  { %3892 = vmatmul.mubr.bf16.gmra.mxu0 %v5670_v47 }
 0x403   :  { %v3616_v30 = vpop.f32.mrf.mxu1  ;;  %3901 = vmatprep.mubr.bf16.mxu0 %v5671_v9 }
 0x404   :  { %v3763_v47 = vpack.c.bf16 %v3616_v30, %v3612_v51  ;;  %v3761_v51 = vpack.c.bf16 %v8527_v14, %v8520_v4  ;;  %v3759_v14 = vpack.c.bf16 %v8512_v43, %v8498_v24  ;;  %v3757_v24 = vpack.c.bf16 %v8481_v35, %v8471_v19 }
 0x405   :  { %v3618_v32 = vpop.f32.mrf.mxu1 }
 0x406   :  { %v3764_v37 = vpack.c.bf16 %v3618_v32, %v3614_v7  ;;  %v5677_v32 = vld [vmem:[%s9892_s2 + $0xa4] ss:$16 sps:$4 sm:$0xff]   ;;  %v3827_v30 = vmax.bf16 %v10181_v52, %v3763_v47  ;;  %v3823_v43 = vmax.bf16 %v10181_v52, %v3759_v14  ;;  %v3821_v19 = vmax.bf16 %v10181_v52, %v3757_v24 }
 0x407   :  { %v3622_v8 = vpop.f32.mrf.mxu1  ;;  %v5689_v14 = vld [vmem:[%s9892_s2 + $0x164] ss:$16 sps:$4 sm:$0xff]  }
 0x409   :  { %v3624_v11 = vpop.f32.mrf.mxu1 }
 0x40a   :  { %3902 = vmatmul.mubr.bf16.gmra.mxu0 %v5672_v48 }
 0x40b   :  { %v3626_v44 = vpop.f32.mrf.mxu1  ;;  %3911 = vmatprep.mubr.bf16.mxu0 %v5673_v20  ;;  %v3760_v20 = vpack.c.bf16 %v8514_v34, %v8505_v0  ;;  %v3825_v0 = vmax.bf16 %v10181_v52, %v3761_v51 }
 0x40c   :  { %v3765_v28 = vpack.c.bf16 %v3626_v44, %v3622_v8  ;;  %v3762_v8 = vpack.c.bf16 %v3608_v56, %v8522_v42  ;;  %v5678_v56 = vld [vmem:[%s9892_s2 + $0xa0] ss:$16 sps:$4 sm:$0xff]  }
 0x40d   :  { %v3628_v50 = vpop.f32.mrf.mxu1 }
 0x40e   :  { %v3766_v22 = vpack.c.bf16 %v3628_v50, %v3624_v11  ;;  %v3829_v7 = vmax.bf16 %v10181_v52, %v3765_v28  ;;  %v3828_v11 = vmax.bf16 %v10181_v52, %v3764_v37  ;;  %v3826_v42 = vmax.bf16 %v10181_v52, %v3762_v8 }
 0x40f   :  { %v3632_v49 = vpop.f32.mrf.mxu1 }
 0x410   :  { %v3830_v39 = vmax.bf16 %v10181_v52, %v3766_v22 }
 0x411   :  { %v3634_v53 = vpop.f32.mrf.mxu1 }
 0x412   :  { %3912 = vmatmul.mubr.bf16.gmra.mxu0 %v5674_v17  ;;  %v3824_v17 = vmax.bf16 %v10181_v52, %v3760_v20 }
 0x413   :  { %v3636_v13 = vpop.f32.mrf.mxu1  ;;  %3921 = vmatprep.mubr.bf16.mxu0 %v5675_v33  ;;  %v3756_v33 = vpack.c.bf16 %v8463_v40, %v8451_v27  ;;  %v5681_v27 = vld [vmem:[%s9892_s2 + $0xe4] ss:$16 sps:$4 sm:$0xff]   ;;  %v3754_v40 = vpack.c.bf16 %v8441_v23, %v8430_v25  ;;  %v5682_v25 = vld [vmem:[%s9892_s2 + $0xe0] ss:$16 sps:$4 sm:$0xff]  }
 0x414   :  { %v3767_v3 = vpack.c.bf16 %v3636_v13, %v3632_v49  ;;  %v5679_v49 = vld [vmem:[%s9892_s2 + $0xc4] ss:$16 sps:$4 sm:$0xff]  }
 0x415   :  { %v3638_v16 = vpop.f32.mrf.mxu1  ;;  %v3820_v22 = vmax.bf16 %v10181_v52, %v3756_v33  ;;  %v3818_v28 = vmax.bf16 %v10181_v52, %v3754_v40  ;;  %v5691_v33 = vld [vmem:[%s9892_s2 + $0x184] ss:$16 sps:$4 sm:$0xff]  }
 0x416   :  { %v3768_v10 = vpack.c.bf16 %v3638_v16, %v3634_v53  ;;  %v3831_v41 = vmax.bf16 %v10181_v52, %v3767_v3  ;;  %v3758_v53 = vpack.c.bf16 %v8488_v15, %v8475_v21  ;;  %v5680_v15 = vld [vmem:[%s9892_s2 + $0xc0] ss:$16 sps:$4 sm:$0xff]  }
 0x417   :  { %v8551_v45 = vpop.f32.mrf.mxu1 }
 0x418   :  { %v3832_v57 = vmax.bf16 %v10181_v52, %v3768_v10  ;;  %v3822_v21 = vmax.bf16 %v10181_v52, %v3758_v53 }
 0x419   :  { %v8554_v59 = vpop.f32.mrf.mxu1 }
 0x41a   :  { %4202 = vmatprep.subr.bf16.mxu0 %v3832_v57  ;;  %5278 = vmatprep.subr.bf16.mxu1 %v3832_v57 }
 0x41b   :  { %3922 = vmatmul.mubr.bf16.gmra.mxu0 %v5676_v2  ;;  %v8560_v36 = vpop.f32.mrf.mxu1  ;;  %5294 = vmatpush1.bf16.msra.mxu1 %v3831_v41  ;;  %v5684_v2 = vld [vmem:[%s9892_s2 + $0x100] ss:$16 sps:$4 sm:$0xff]  }
 0x41c   :  { %v3769_v12 = vpack.c.bf16 %v8560_v36, %v8551_v45  ;;  %4203 = vmatpush1.bf16.msra.mxu0 %v3831_v41  ;;  %5279 = vmatprep.subr.bf16.mxu1 %v3830_v39  ;;  %v3819_v41 = vmax.bf16 %v10181_v52, %v3755_v61  ;;  %v5683_v61 = vld [vmem:[%s9892_s2 + $0x104] ss:$16 sps:$4 sm:$0xff]   ;;  %v5704_v36 = vld [vmem:[%s9892_s2 + $0x48] ss:$16 sps:$4 sm:$0xff]  }
 0x41d   :  { %4204 = vmatprep.subr.bf16.mxu0 %v3830_v39  ;;  %v8565_v9 = vpop.f32.mrf.mxu1  ;;  %3931 = vmatprep.mubr.bf16.mxu0 %v5677_v32  ;;  %v5686_v32 = vld [vmem:[%s9892_s2 + $0x120] ss:$16 sps:$4 sm:$0xff]   ;;  %v5703_v45 = vld [vmem:[%s9892_s2 + $0x224] ss:$16 sps:$4 sm:$0xff]  }
 0x41f   :  { %v8572_v48 = vpop.f32.mrf.mxu1  ;;  %5295 = vmatpush1.bf16.msra.mxu1 %v3829_v7 }
 0x420   :  { %4205 = vmatpush1.bf16.msra.mxu0 %v3829_v7  ;;  %5280 = vmatprep.subr.bf16.mxu1 %v3828_v11 }
 0x421   :  { %4206 = vmatprep.subr.bf16.mxu0 %v3828_v11  ;;  %v8577_v44 = vpop.f32.mrf.mxu1  ;;  %v5687_v11 = vld [vmem:[%s9892_s2 + $0x144] ss:$16 sps:$4 sm:$0xff]  }
 0x423   :  { %3932 = vmatmul.mubr.bf16.gmra.mxu0 %v5678_v56  ;;  %v8585_v50 = vpop.f32.mrf.mxu1  ;;  %5296 = vmatpush1.bf16.msra.mxu1 %v3827_v30 }
 0x424   :  { %v3771_v4 = vpack.c.bf16 %v8585_v50, %v8572_v48  ;;  %4207 = vmatpush1.bf16.msra.mxu0 %v3827_v30  ;;  %5281 = vmatprep.subr.bf16.mxu1 %v3826_v42  ;;  %v5700_v48 = vld [vmem:[%s9892_s2 + $0x28] ss:$16 sps:$4 sm:$0xff]   ;;  %v5701_v50 = vld [vmem:[%s9892_s2 + $0x200] ss:$16 sps:$4 sm:$0xff]  }
 0x425   :  { %4208 = vmatprep.subr.bf16.mxu0 %v3826_v42  ;;  %v8592_v34 = vpop.f32.mrf.mxu1  ;;  %3941 = vmatprep.mubr.bf16.mxu0 %v5679_v49  ;;  %v5688_v42 = vld [vmem:[%s9892_s2 + $0x140] ss:$16 sps:$4 sm:$0xff]  }
 0x427   :  { %v8600_v13 = vpop.f32.mrf.mxu1  ;;  %5297 = vmatpush1.bf16.msra.mxu1 %v3825_v0 }
 0x428   :  { %4209 = vmatpush1.bf16.msra.mxu0 %v3825_v0  ;;  %5282 = vmatprep.subr.bf16.mxu1 %v3824_v17 }
 0x429   :  { %4210 = vmatprep.subr.bf16.mxu0 %v3824_v17  ;;  %v8605_v3 = vpop.f32.mrf.mxu1  ;;  %v5690_v17 = vld [vmem:[%s9892_s2 + $0x160] ss:$16 sps:$4 sm:$0xff]  }
 0x42b   :  { %3942 = vmatmul.mubr.bf16.gmra.mxu0 %v5680_v15  ;;  %v8613_v16 = vpop.f32.mrf.mxu1  ;;  %5298 = vmatpush1.bf16.msra.mxu1 %v3823_v43 }
 0x42c   :  { %4211 = vmatpush1.bf16.msra.mxu0 %v3823_v43  ;;  %5283 = vmatprep.subr.bf16.mxu1 %v3822_v21 }
 0x42d   :  { %4212 = vmatprep.subr.bf16.mxu0 %v3822_v21  ;;  %v8616_v35 = vpop.f32.mrf.mxu1  ;;  %3951 = vmatprep.mubr.bf16.mxu0 %v5681_v27 }
 0x42f   :  { %v8624_v10 = vpop.f32.mrf.mxu1  ;;  %5299 = vmatpush1.bf16.msra.mxu1 %v3821_v19 }
 0x430   :  { %4213 = vmatpush1.bf16.msra.mxu0 %v3821_v19  ;;  %5284 = vmatprep.subr.bf16.mxu1 %v3820_v22 }
 0x431   :  { %4214 = vmatprep.subr.bf16.mxu0 %v3820_v22  ;;  %v8630_v57 = vpop.f32.mrf.mxu1 }
 0x433   :  { %3952 = vmatmul.mubr.bf16.gmra.mxu0 %v5682_v25  ;;  %v8636_v23 = vpop.f32.mrf.mxu1  ;;  %5300 = vmatpush1.bf16.msra.mxu1 %v3819_v41  ;;  %v5692_v25 = vld [vmem:[%s9892_s2 + $0x180] ss:$16 sps:$4 sm:$0xff]  }
 0x434   :  { %4215 = vmatpush1.bf16.msra.mxu0 %v3819_v41  ;;  %5285 = vmatprep.subr.bf16.mxu1 %v3818_v28 }
 0x435   :  { %4216 = vmatprep.subr.bf16.mxu0 %v3818_v28  ;;  %v8642_v1 = vpop.f32.mrf.mxu1  ;;  %3961 = vmatprep.mubr.bf16.mxu0 %v5683_v61 }
 0x437   :  { %v8647_v37 = vpop.f32.mrf.mxu1  ;;  %5301 = vmatpush1.bf16.msra.mxu1 %v3817_v46 }
 0x438   :  { %4217 = vmatpush1.bf16.msra.mxu0 %v3817_v46 }
 0x439   :  { %v3684_v39 = vpop.f32.mrf.mxu1 }
 0x43b   :  { %3962 = vmatmul.mubr.bf16.gmra.mxu0 %v5684_v2  ;;  %v8652_v26 = vpop.f32.mrf.mxu1  ;;  %v5693_v2 = vld [vmem:[%s9892_s2 + $0x1a4] ss:$16 sps:$4 sm:$0xff]  }
 0x43c   :  { %3971 = vmatprep.mubr.bf16.mxu0 %v5685_v6 }
 0x43d   :  { %v3688_v55 = vpop.f32.mrf.mxu1 }
 0x43e   :  { %v3778_v6 = vpack.c.bf16 %v3688_v55, %v3684_v39  ;;  %v5694_v39 = vld [vmem:[%s9892_s2 + $0x1a0] ss:$16 sps:$4 sm:$0xff]   ;;  %v3775_v55 = vpack.c.bf16 %v8636_v23, %v8624_v10  ;;  %v3772_v23 = vpack.c.bf16 %v8592_v34, %v8577_v44  ;;  %v3770_v44 = vpack.c.bf16 %v8565_v9, %v8554_v59  ;;  %v5699_v9 = vld [vmem:[%s9892_s2 + $0x204] ss:$16 sps:$4 sm:$0xff]  }
 0x43f   :  { %v3692_v47 = vpop.f32.mrf.mxu1  ;;  %v3833_v59 = vmax.bf16 %v10181_v52, %v3769_v12  ;;  %v5705_v12 = vld [vmem:[%s9892_s2 + $0x220] ss:$16 sps:$4 sm:$0xff]  }
 0x440   :  { %v3839_v10 = vmax.bf16 %v10181_v52, %v3775_v55  ;;  %v3836_v34 = vmax.bf16 %v10181_v52, %v3772_v23  ;;  %v5734_v55 = vld [vmem:[%s9892_s2 + $0x14c] ss:$16 sps:$4 sm:$0xff]   ;;  %v5737_v23 = vld [vmem:[%s9892_s2 + $0x320] ss:$16 sps:$4 sm:$0xff]  }
 0x441   :  { %v3694_v7 = vpop.f32.mrf.mxu1 }
 0x443   :  { %3972 = vmatmul.mubr.bf16.gmra.mxu0 %v5686_v32  ;;  %v3696_v8 = vpop.f32.mrf.mxu1  ;;  %v3777_v32 = vpack.c.bf16 %v8652_v26, %v8647_v37 }
 0x444   :  { %3981 = vmatprep.mubr.bf16.mxu0 %v5687_v11  ;;  %v3779_v46 = vpack.c.bf16 %v3696_v8, %v3692_v47  ;;  %v3776_v47 = vpack.c.bf16 %v8642_v1, %v8630_v57  ;;  %v3842_v8 = vmax.bf16 %v10181_v52, %v3778_v6  ;;  %v5695_v57 = vld [vmem:[%s9892_s2 + $0x1c4] ss:$16 sps:$4 sm:$0xff]   ;;  %v3774_v1 = vpack.c.bf16 %v8616_v35, %v8605_v3  ;;  %v5696_v3 = vld [vmem:[%s9892_s2 + $0x1c0] ss:$16 sps:$4 sm:$0xff]   ;;  %v5728_v6 = vld [vmem:[%s9892_s2 + $0x108] ss:$16 sps:$4 sm:$0xff]  }
 0x445   :  { %v3698_v51 = vpop.f32.mrf.mxu1  ;;  %v3841_v37 = vmax.bf16 %v10181_v52, %v3777_v32  ;;  %v5730_v32 = vld [vmem:[%s9892_s2 + $0x12c] ss:$16 sps:$4 sm:$0xff]  }
 0x446   :  { %v3780_v41 = vpack.c.bf16 %v3698_v51, %v3694_v7  ;;  %v3843_v11 = vmax.bf16 %v10181_v52, %v3779_v46  ;;  %v3840_v26 = vmax.bf16 %v10181_v52, %v3776_v47  ;;  %v3773_v51 = vpack.c.bf16 %v8613_v16, %v8600_v13  ;;  %v5697_v13 = vld [vmem:[%s9892_s2 + $0x1e4] ss:$16 sps:$4 sm:$0xff]   ;;  %v5725_v46 = vld [vmem:[%s9892_s2 + $0x2c0] ss:$16 sps:$4 sm:$0xff]   ;;  %v5732_v47 = vld [vmem:[%s9892_s2 + $0x128] ss:$16 sps:$4 sm:$0xff]  }
 0x447   :  { %v3702_v30 = vpop.f32.mrf.mxu1  ;;  %v3835_v16 = vmax.bf16 %v10181_v52, %v3771_v4  ;;  %v5706_v4 = vld [vmem:[%s9892_s2 + $0x6c] ss:$16 sps:$4 sm:$0xff]  }
 0x448   :  { %v3844_v7 = vmax.bf16 %v10181_v52, %v3780_v41  ;;  %v3837_v35 = vmax.bf16 %v10181_v52, %v3773_v51  ;;  %v5722_v41 = vld [vmem:[%s9892_s2 + $0xec] ss:$16 sps:$4 sm:$0xff]   ;;  %v5736_v51 = vld [vmem:[%s9892_s2 + $0x148] ss:$16 sps:$4 sm:$0xff]  }
 0x449   :  { %v3704_v20 = vpop.f32.mrf.mxu1 }
 0x44b   :  { %3982 = vmatmul.mubr.bf16.gmra.mxu0 %v5688_v42  ;;  %v3706_v56 = vpop.f32.mrf.mxu1  ;;  %v5698_v42 = vld [vmem:[%s9892_s2 + $0x1e0] ss:$16 sps:$4 sm:$0xff]  }
 0x44c   :  { %3991 = vmatprep.mubr.bf16.mxu0 %v5689_v14  ;;  %v3781_v22 = vpack.c.bf16 %v3706_v56, %v3702_v30  ;;  %v3838_v30 = vmax.bf16 %v10181_v52, %v3774_v1  ;;  %v5707_v56 = vld [vmem:[%s9892_s2 + $0x244] ss:$16 sps:$4 sm:$0xff]   ;;  %v5708_v14 = vld [vmem:[%s9892_s2 + $0x68] ss:$16 sps:$4 sm:$0xff]  }
 0x44d   :  { %v3708_v0 = vpop.f32.mrf.mxu1 }
 0x44e   :  { %v3782_v15 = vpack.c.bf16 %v3708_v0, %v3704_v20  ;;  %v3845_v61 = vmax.bf16 %v10181_v52, %v3781_v22  ;;  %v3834_v20 = vmax.bf16 %v10181_v52, %v3770_v44  ;;  %v5709_v0 = vld [vmem:[%s9892_s2 + $0x240] ss:$16 sps:$4 sm:$0xff]  }
 0x44f   :  { %v3712_v49 = vpop.f32.mrf.mxu1  ;;  %v5721_v22 = vld [vmem:[%s9892_s2 + $0x2a0] ss:$16 sps:$4 sm:$0xff]  }
 0x450   :  { %v3846_v28 = vmax.bf16 %v10181_v52, %v3782_v15  ;;  %v5717_v15 = vld [vmem:[%s9892_s2 + $0x280] ss:$16 sps:$4 sm:$0xff]  }
 0x451   :  { %v3714_v53 = vpop.f32.mrf.mxu1 }
 0x453   :  { %3992 = vmatmul.mubr.bf16.gmra.mxu0 %v5690_v17  ;;  %v3716_v24 = vpop.f32.mrf.mxu1  ;;  %v5712_v17 = vld [vmem:[%s9892_s2 + $0x88] ss:$16 sps:$4 sm:$0xff]  }
 0x454   :  { %v3783_v43 = vpack.c.bf16 %v3716_v24, %v3712_v49  ;;  %4001 = vmatprep.mubr.bf16.mxu0 %v5691_v33  ;;  %v5710_v49 = vld [vmem:[%s9892_s2 + $0x8c] ss:$16 sps:$4 sm:$0xff]   ;;  %v5713_v24 = vld [vmem:[%s9892_s2 + $0x260] ss:$16 sps:$4 sm:$0xff]   ;;  %v5715_v33 = vld [vmem:[%s9892_s2 + $0x284] ss:$16 sps:$4 sm:$0xff]  }
 0x455   :  { %v3718_v21 = vpop.f32.mrf.mxu1 }
 0x456   :  { %v3784_v19 = vpack.c.bf16 %v3718_v21, %v3714_v53  ;;  %v3847_v27 = vmax.bf16 %v10181_v52, %v3783_v43  ;;  %v5711_v53 = vld [vmem:[%s9892_s2 + $0x264] ss:$16 sps:$4 sm:$0xff]   ;;  %v5714_v43 = vld [vmem:[%s9892_s2 + $0xac] ss:$16 sps:$4 sm:$0xff]   ;;  %v5716_v21 = vld [vmem:[%s9892_s2 + $0xa8] ss:$16 sps:$4 sm:$0xff]  }
 0x458   :  { %v3848_v40 = vmax.bf16 %v10181_v52, %v3784_v19  ;;  %v5702_v52 = vld [vmem:[%s9892_s2 + $0x4c] ss:$16 sps:$4 sm:$0xff]  }
 0x459   :  { %v5718_v19 = vld [vmem:[%s9892_s2 + $0xcc] ss:$16 sps:$4 sm:$0xff]  }
 0x45a   :  { %4218 = vmatprep.subr.bf16.mxu0 %v3848_v40  ;;  %5286 = vmatprep.subr.bf16.mxu1 %v3848_v40  ;;  %v5720_v40 = vld [vmem:[%s9892_s2 + $0xc8] ss:$16 sps:$4 sm:$0xff]  }
 0x45b   :  { %4002 = vmatmul.mubr.bf16.gmra.mxu0 %v5692_v25  ;;  %5302 = vmatpush2.bf16.msra.mxu1 %v3847_v27  ;;  %v5724_v25 = vld [vmem:[%s9892_s2 + $0xe8] ss:$16 sps:$4 sm:$0xff]  }
 0x45c   :  { %4219 = vmatpush2.bf16.msra.mxu0 %v3847_v27  ;;  %5287 = vmatprep.subr.bf16.mxu1 %v3846_v28  ;;  %v5719_v27 = vld [vmem:[%s9892_s2 + $0x2a4] ss:$16 sps:$4 sm:$0xff]  }
 0x45d   :  { %4220 = vmatprep.subr.bf16.mxu0 %v3846_v28  ;;  %4011 = vmatprep.mubr.bf16.mxu0 %v5693_v2  ;;  %v5723_v28 = vld [vmem:[%s9892_s2 + $0x2c4] ss:$16 sps:$4 sm:$0xff]  }
 0x45e   :  { %v5727_v2 = vld [vmem:[%s9892_s2 + $0x2e4] ss:$16 sps:$4 sm:$0xff]  }
 0x45f   :  { %5303 = vmatpush2.bf16.msra.mxu1 %v3845_v61 }
 0x460   :  { %4221 = vmatpush2.bf16.msra.mxu0 %v3845_v61  ;;  %5288 = vmatprep.subr.bf16.mxu1 %v3844_v7  ;;  %v5726_v61 = vld [vmem:[%s9892_s2 + $0x10c] ss:$16 sps:$4 sm:$0xff]  }
 0x461   :  { %4222 = vmatprep.subr.bf16.mxu0 %v3844_v7  ;;  %v5729_v7 = vld [vmem:[%s9892_s2 + $0x2e0] ss:$16 sps:$4 sm:$0xff]  }
 0x463   :  { %4012 = vmatmul.mubr.bf16.gmra.mxu0 %v5694_v39  ;;  %5304 = vmatpush2.bf16.msra.mxu1 %v3843_v11  ;;  %v5733_v39 = vld [vmem:[%s9892_s2 + $0x300] ss:$16 sps:$4 sm:$0xff]  }
 0x464   :  { %4223 = vmatpush2.bf16.msra.mxu0 %v3843_v11  ;;  %5289 = vmatprep.subr.bf16.mxu1 %v3842_v8  ;;  %v5731_v11 = vld [vmem:[%s9892_s2 + $0x304] ss:$16 sps:$4 sm:$0xff]  }
 0x465   :  { %4224 = vmatprep.subr.bf16.mxu0 %v3842_v8  ;;  %4021 = vmatprep.mubr.bf16.mxu0 %v5695_v57 }
 0x467   :  { %5305 = vmatpush2.bf16.msra.mxu1 %v3841_v37 }
 0x468   :  { %4225 = vmatpush2.bf16.msra.mxu0 %v3841_v37  ;;  %5290 = vmatprep.subr.bf16.mxu1 %v3840_v26  ;;  %v5735_v37 = vld [vmem:[%s9892_s2 + $0x324] ss:$16 sps:$4 sm:$0xff]  }
 0x469   :  { %4226 = vmatprep.subr.bf16.mxu0 %v3840_v26 }
 0x46b   :  { %4022 = vmatmul.mubr.bf16.gmra.mxu0 %v5696_v3  ;;  %5306 = vmatpush2.bf16.msra.mxu1 %v3839_v10  ;;  %v5739_v3 = vld [vmem:[%s9892_s2 + $0x344] ss:$16 sps:$4 sm:$0xff]  }
 0x46c   :  { %4227 = vmatpush2.bf16.msra.mxu0 %v3839_v10  ;;  %5291 = vmatprep.subr.bf16.mxu1 %v3838_v30 }
 0x46d   :  { %4228 = vmatprep.subr.bf16.mxu0 %v3838_v30  ;;  %4031 = vmatprep.mubr.bf16.mxu0 %v5697_v13  ;;  %v5738_v30 = vld [vmem:[%s9892_s2 + $0x16c] ss:$16 sps:$4 sm:$0xff]  }
 0x46f   :  { %5307 = vmatpush2.bf16.msra.mxu1 %v3837_v35 }
 0x470   :  { %4229 = vmatpush2.bf16.msra.mxu0 %v3837_v35  ;;  %5292 = vmatprep.subr.bf16.mxu1 %v3836_v34 }
 0x471   :  { %4230 = vmatprep.subr.bf16.mxu0 %v3836_v34  ;;  %v5740_v34 = vld [vmem:[%s9892_s2 + $0x168] ss:$16 sps:$4 sm:$0xff]  }
 0x473   :  { %4032 = vmatmul.mubr.bf16.gmra.mxu0 %v5698_v42  ;;  %5308 = vmatpush2.bf16.msra.mxu1 %v3835_v16  ;;  %v5742_v42 = vld [vmem:[%s9892_s2 + $0x18c] ss:$16 sps:$4 sm:$0xff]  }
 0x474   :  { %4231 = vmatpush2.bf16.msra.mxu0 %v3835_v16  ;;  %5293 = vmatprep.subr.bf16.mxu1 %v3834_v20 }
 0x475   :  { %4232 = vmatprep.subr.bf16.mxu0 %v3834_v20  ;;  %4041 = vmatprep.mubr.bf16.mxu0 %v5699_v9  ;;  %v5741_v20 = vld [vmem:[%s9892_s2 + $0x340] ss:$16 sps:$4 sm:$0xff]  }
 0x477   :  { %5309 = vmatpush2.bf16.msra.mxu1 %v3833_v59 }
 0x478   :  { %4233 = vmatpush2.bf16.msra.mxu0 %v3833_v59  ;;  %v5743_v59 = vld [vmem:[%s9892_s2 + $0x364] ss:$16 sps:$4 sm:$0xff]  }
 0x47a   :  { %4245 = vmatmul.mubr.bf16.vlgmr.msra.gmra.mxu1 %v5700_v48 }
 0x47b   :  { %4042 = vmatmul.mubr.bf16.gmra.mxu0 %v5701_v50  ;;  %4254 = vmatprep.mubr.bf16.mxu1 %v5702_v52  ;;  %v5744_v52 = vld [vmem:[%s9892_s2 + $0x188] ss:$16 sps:$4 sm:$0xff]  }
 0x47c   :  { %4051 = vmatprep.mubr.bf16.mxu0 %v5703_v45 }
 0x482   :  { %4255 = vmatmul.mubr.bf16.gmra.mxu1 %v5704_v36  ;;  %v5745_v36 = vld [vmem:[%s9892_s2 + $0x360] ss:$16 sps:$4 sm:$0xff]  }
 0x483   :  { %4052 = vmatmul.mubr.bf16.gmra.mxu0 %v5705_v12  ;;  %4264 = vmatprep.mubr.bf16.mxu1 %v5706_v4  ;;  %v5746_v12 = vld [vmem:[%s9892_s2 + $0x1ac] ss:$16 sps:$4 sm:$0xff]   ;;  %v5747_v4 = vld [vmem:[%s9892_s2 + $0x384] ss:$16 sps:$4 sm:$0xff]  }
 0x484   :  { %4061 = vmatprep.mubr.bf16.mxu0 %v5707_v56 }
 0x48a   :  { %4265 = vmatmul.mubr.bf16.gmra.mxu1 %v5708_v14 }
 0x48b   :  { %4062 = vmatmul.mubr.bf16.gmra.mxu0 %v5709_v0  ;;  %4274 = vmatprep.mubr.bf16.mxu1 %v5710_v49  ;;  %v5748_v49 = vld [vmem:[%s9892_s2 + $0x1a8] ss:$16 sps:$4 sm:$0xff]  }
 0x48c   :  { %4071 = vmatprep.mubr.bf16.mxu0 %v5711_v53 }
 0x492   :  { %4275 = vmatmul.mubr.bf16.gmra.mxu1 %v5712_v17  ;;  %v5749_v17 = vld [vmem:[%s9892_s2 + $0x380] ss:$16 sps:$4 sm:$0xff]  }
 0x493   :  { %4072 = vmatmul.mubr.bf16.gmra.mxu0 %v5713_v24  ;;  %4284 = vmatprep.mubr.bf16.mxu1 %v5714_v43  ;;  %v5750_v24 = vld [vmem:[%s9892_s2 + $0x1cc] ss:$16 sps:$4 sm:$0xff]   ;;  %v5751_v43 = vld [vmem:[%s9892_s2 + $0x3a4] ss:$16 sps:$4 sm:$0xff]  }
 0x494   :  { %4081 = vmatprep.mubr.bf16.mxu0 %v5715_v33 }
 0x49a   :  { %4285 = vmatmul.mubr.bf16.gmra.mxu1 %v5716_v21 }
 0x49b   :  { %4082 = vmatmul.mubr.bf16.gmra.mxu0 %v5717_v15  ;;  %4294 = vmatprep.mubr.bf16.mxu1 %v5718_v19  ;;  %v5752_v19 = vld [vmem:[%s9892_s2 + $0x1c8] ss:$16 sps:$4 sm:$0xff]  }
 0x49c   :  { %4091 = vmatprep.mubr.bf16.mxu0 %v5719_v27 }
 0x4a2   :  { %4295 = vmatmul.mubr.bf16.gmra.mxu1 %v5720_v40  ;;  %v5753_v40 = vld [vmem:[%s9892_s2 + $0x3a0] ss:$16 sps:$4 sm:$0xff]  }
 0x4a3   :  { %4092 = vmatmul.mubr.bf16.gmra.mxu0 %v5721_v22  ;;  %4304 = vmatprep.mubr.bf16.mxu1 %v5722_v41  ;;  %v5754_v22 = vld [vmem:[%s9892_s2 + $0x1ec] ss:$16 sps:$4 sm:$0xff]   ;;  %v5755_v41 = vld [vmem:[%s9892_s2 + $0x3c4] ss:$16 sps:$4 sm:$0xff]  }
 0x4a4   :  { %4101 = vmatprep.mubr.bf16.mxu0 %v5723_v28 }
 0x4aa   :  { %4305 = vmatmul.mubr.bf16.gmra.mxu1 %v5724_v25 }
 0x4ab   :  { %4102 = vmatmul.mubr.bf16.gmra.mxu0 %v5725_v46  ;;  %4314 = vmatprep.mubr.bf16.mxu1 %v5726_v61  ;;  %v5756_v61 = vld [vmem:[%s9892_s2 + $0x1e8] ss:$16 sps:$4 sm:$0xff]  }
 0x4ac   :  { %4111 = vmatprep.mubr.bf16.mxu0 %v5727_v2 }
 0x4b2   :  { %4315 = vmatmul.mubr.bf16.gmra.mxu1 %v5728_v6  ;;  %v5757_v6 = vld [vmem:[%s9892_s2 + $0x3c0] ss:$16 sps:$4 sm:$0xff]  }
 0x4b3   :  { %4112 = vmatmul.mubr.bf16.gmra.mxu0 %v5729_v7  ;;  %4324 = vmatprep.mubr.bf16.mxu1 %v5730_v32  ;;  %v5758_v7 = vld [vmem:[%s9892_s2 + $0x20c] ss:$16 sps:$4 sm:$0xff]   ;;  %v5759_v32 = vld [vmem:[%s9892_s2 + $0x3e4] ss:$16 sps:$4 sm:$0xff]  }
 0x4b4   :  { %4121 = vmatprep.mubr.bf16.mxu0 %v5731_v11 }
 0x4ba   :  { %4325 = vmatmul.mubr.bf16.gmra.mxu1 %v5732_v47  ;;  %v8834_v8 = vpop.f32.mrf.mxu0 }
 0x4bb   :  { %4122 = vmatmul.mubr.bf16.gmra.mxu0 %v5733_v39  ;;  %4334 = vmatprep.mubr.bf16.mxu1 %v5734_v55  ;;  %v5760_v55 = vld [vmem:[%s9892_s2 + $0x208] ss:$16 sps:$4 sm:$0xff]  }
 0x4bc   :  { %4131 = vmatprep.mubr.bf16.mxu0 %v5735_v37  ;;  %v8845_v57 = vpop.f32.mrf.mxu0 }
 0x4be   :  { %v8847_v1 = vpop.f32.mrf.mxu0 }
 0x4c0   :  { %v8849_v26 = vpop.f32.mrf.mxu0 }
 0x4c2   :  { %4335 = vmatmul.mubr.bf16.gmra.mxu1 %v5736_v51  ;;  %v8854_v10 = vpop.f32.mrf.mxu0  ;;  %v5761_v51 = vld [vmem:[%s9892_s2 + $0x3e0] ss:$16 sps:$4 sm:$0xff]  }
 0x4c3   :  { %4132 = vmatmul.mubr.bf16.gmra.mxu0 %v5737_v23  ;;  %4344 = vmatprep.mubr.bf16.mxu1 %v5738_v30  ;;  %v5762_v23 = vld [vmem:[%s9892_s2 + $0x22c] ss:$16 sps:$4 sm:$0xff]  }
 0x4c4   :  { %4141 = vmatprep.mubr.bf16.mxu0 %v5739_v3  ;;  %v8865_v35 = vpop.f32.mrf.mxu0  ;;  %v5763_v30 = vld [vmem:[%s9892_s2 + $0xc] ss:$16 sps:$4 sm:$0xff]  }
 0x4c6   :  { %v8867_v13 = vpop.f32.mrf.mxu0 }
 0x4c8   :  { %v8869_v44 = vpop.f32.mrf.mxu0 }
 0x4ca   :  { %4345 = vmatmul.mubr.bf16.gmra.mxu1 %v5740_v34  ;;  %v8874_v16 = vpop.f32.mrf.mxu0 }
 0x4cb   :  { %4142 = vmatmul.mubr.bf16.gmra.mxu0 %v5741_v20  ;;  %4354 = vmatprep.mubr.bf16.mxu1 %v5742_v42  ;;  %v5764_v42 = vld [vmem:[%s9892_s2 + $0x228] ss:$16 sps:$4 sm:$0xff]  }
 0x4cc   :  { %4151 = vmatprep.mubr.bf16.mxu0 %v5743_v59  ;;  %v8885_v9 = vpop.f32.mrf.mxu0 }
 0x4ce   :  { %v8887_v48 = vpop.f32.mrf.mxu0 }
 0x4d0   :  { %v8889_v50 = vpop.f32.mrf.mxu0 }
 0x4d2   :  { %4355 = vmatmul.mubr.bf16.gmra.mxu1 %v5744_v52  ;;  %v8894_v45 = vpop.f32.mrf.mxu0  ;;  %v5765_v52 = vld [vmem:[%s9892_s2 + $0x8] ss:$16 sps:$4 sm:$0xff]  }
 0x4d3   :  { %4152 = vmatmul.mubr.bf16.gmra.mxu0 %v5745_v36  ;;  %4364 = vmatprep.mubr.bf16.mxu1 %v5746_v12  ;;  %v5766_v36 = vld [vmem:[%s9892_s2 + $0x24c] ss:$16 sps:$4 sm:$0xff]  }
 0x4d4   :  { %4161 = vmatprep.mubr.bf16.mxu0 %v5747_v4  ;;  %v8905_v56 = vpop.f32.mrf.mxu0 }
 0x4d6   :  { %v8907_v14 = vpop.f32.mrf.mxu0 }
 0x4d8   :  { %v8909_v0 = vpop.f32.mrf.mxu0 }
 0x4da   :  { %4365 = vmatmul.mubr.bf16.gmra.mxu1 %v5748_v49 }
 0x4db   :  { %v8914_v53 = vpop.f32.mrf.mxu0  ;;  %4162 = vmatmul.mubr.bf16.gmra.mxu0 %v5749_v17  ;;  %4374 = vmatprep.mubr.bf16.mxu1 %v5750_v24  ;;  %v5767_v17 = vld [vmem:[%s9892_s2 + $0x248] ss:$16 sps:$4 sm:$0xff]  }
 0x4dc   :  { %4171 = vmatprep.mubr.bf16.mxu0 %v5751_v43  ;;  %v5768_v43 = vld [vmem:[%s9892_s2 + $0x26c] ss:$16 sps:$4 sm:$0xff]  }
 0x4dd   :  { %v8925_v33 = vpop.f32.mrf.mxu0 }
 0x4df   :  { %v8927_v21 = vpop.f32.mrf.mxu0 }
 0x4e1   :  { %v8929_v15 = vpop.f32.mrf.mxu0 }
 0x4e2   :  { %4375 = vmatmul.mubr.bf16.gmra.mxu1 %v5752_v19 }
 0x4e3   :  { %v8934_v27 = vpop.f32.mrf.mxu0  ;;  %4172 = vmatmul.mubr.bf16.gmra.mxu0 %v5753_v40  ;;  %4384 = vmatprep.mubr.bf16.mxu1 %v5754_v22 }
 0x4e4   :  { %4181 = vmatprep.mubr.bf16.mxu0 %v5755_v41  ;;  %v5769_v41 = vld [vmem:[%s9892_s2 + $0x268] ss:$16 sps:$4 sm:$0xff]  }
 0x4e5   :  { %v8945_v28 = vpop.f32.mrf.mxu0 }
 0x4e7   :  { %v8947_v25 = vpop.f32.mrf.mxu0 }
 0x4e9   :  { %v8949_v46 = vpop.f32.mrf.mxu0 }
 0x4ea   :  { %4385 = vmatmul.mubr.bf16.gmra.mxu1 %v5756_v61 }
 0x4eb   :  { %v8954_v2 = vpop.f32.mrf.mxu0  ;;  %4182 = vmatmul.mubr.bf16.gmra.mxu0 %v5757_v6  ;;  %4394 = vmatprep.mubr.bf16.mxu1 %v5758_v7  ;;  %v5770_v6 = vld [vmem:[%s9892_s2 + $0x28c] ss:$16 sps:$4 sm:$0xff]  }
 0x4ec   :  { %4191 = vmatprep.mubr.bf16.mxu0 %v5759_v32 }
 0x4ed   :  { %v8965_v11 = vpop.f32.mrf.mxu0 }
 0x4ef   :  { %v8967_v47 = vpop.f32.mrf.mxu0 }
 0x4f1   :  { %v8969_v39 = vpop.f32.mrf.mxu0 }
 0x4f2   :  { %4395 = vmatmul.mubr.bf16.gmra.mxu1 %v5760_v55 }
 0x4f3   :  { %v8974_v37 = vpop.f32.mrf.mxu0  ;;  %4192 = vmatmul.mubr.bf16.gmra.mxu0 %v5761_v51  ;;  %4404 = vmatprep.mubr.bf16.mxu1 %v5762_v23  ;;  %v5771_v51 = vld [vmem:[%s9892_s2 + $0x288] ss:$16 sps:$4 sm:$0xff]  }
 0x4f4   :  { %4234 = vmatprep.mubr.bf16.mxu0 %v5763_v30  ;;  %v5772_v30 = vld [vmem:[%s9892_s2 + $0x2ac] ss:$16 sps:$4 sm:$0xff]  }
 0x4f5   :  { %v8985_v3 = vpop.f32.mrf.mxu0 }
 0x4f6   :  { %10281 = vst [vmem:[#allocation90_spill] sm:$0xff] %v8985_v3 }
 0x4f7   :  { %v8987_v34 = vpop.f32.mrf.mxu0 }
 0x4f8   :  { %10282 = vst [vmem:[#allocation54_spill] sm:$0xff] %v8987_v34 }
 0x4f9   :  { %v8989_v20 = vpop.f32.mrf.mxu0 }
 0x4fa   :  { %10283 = vst [vmem:[#allocation91_spill] sm:$0xff] %v8989_v20  ;;  %4405 = vmatmul.mubr.bf16.gmra.mxu1 %v5764_v42 }
 0x4fb   :  { %v8994_v59 = vpop.f32.mrf.mxu0  ;;  %4235 = vmatmul.mubr.bf16.vlgmr.msra.gmra.mxu0 %v5765_v52  ;;  %4414 = vmatprep.mubr.bf16.mxu1 %v5766_v36 }
 0x4fc   :  { %10284 = vst [vmem:[#allocation89_spill] sm:$0xff] %v8994_v59 }
 0x4fd   :  { %v9002_v12 = vpop.f32.mrf.mxu0 }
 0x4fe   :  { %10285 = vst [vmem:[#allocation56_spill] sm:$0xff] %v9002_v12 }
 0x4ff   :  { %v9004_v4 = vpop.f32.mrf.mxu0 }
 0x500   :  { %10286 = vst [vmem:[#allocation57_spill] sm:$0xff] %v9004_v4 }
 0x501   :  { %v9006_v49 = vpop.f32.mrf.mxu0 }
 0x502   :  { %10287 = vst [vmem:[#allocation88_spill] sm:$0xff] %v9006_v49  ;;  %4415 = vmatmul.mubr.bf16.gmra.mxu1 %v5767_v17  ;;  %v5773_v17 = vld [vmem:[%s9892_s2 + $0x2a8] ss:$16 sps:$4 sm:$0xff]  }
 0x503   :  { %v9011_v24 = vpop.f32.mrf.mxu0  ;;  %4424 = vmatprep.mubr.bf16.mxu1 %v5768_v43 }
 0x504   :  { %10288 = vst [vmem:[#allocation86_spill] sm:$0xff] %v9011_v24 }
 0x505   :  { %v9016_v19 = vpop.f32.mrf.mxu0 }
 0x506   :  { %10289 = vst [vmem:[#allocation59_spill] sm:$0xff] %v9016_v19 }
 0x507   :  { %v9018_v40 = vpop.f32.mrf.mxu0 }
 0x508   :  { %10290 = vst [vmem:[#allocation60_spill] sm:$0xff] %v9018_v40 }
 0x509   :  { %v9020_v22 = vpop.f32.mrf.mxu0 }
 0x50a   :  { %10291 = vst [vmem:[#allocation62_spill] sm:$0xff] %v9020_v22  ;;  %4425 = vmatmul.mubr.bf16.gmra.mxu1 %v5769_v41  ;;  %v5774_v41 = vld [vmem:[%s9892_s2 + $0x2cc] ss:$16 sps:$4 sm:$0xff]  }
 0x50b   :  { %v9025_v61 = vpop.f32.mrf.mxu0  ;;  %4434 = vmatprep.mubr.bf16.mxu1 %v5770_v6 }
 0x50c   :  { %10292 = vst [vmem:[#allocation63_spill] sm:$0xff] %v9025_v61 }
 0x50d   :  { %v9030_v7 = vpop.f32.mrf.mxu0 }
 0x50e   :  { %10293 = vst [vmem:[#allocation87_spill] sm:$0xff] %v9030_v7 }
 0x50f   :  { %v9032_v32 = vpop.f32.mrf.mxu0 }
 0x510   :  { %10294 = vst [vmem:[#allocation85_spill] sm:$0xff] %v9032_v32 }
 0x511   :  { %v9034_v55 = vpop.f32.mrf.mxu0 }
 0x512   :  { %10295 = vst [vmem:[#allocation65_spill] sm:$0xff] %v9034_v55  ;;  %4435 = vmatmul.mubr.bf16.gmra.mxu1 %v5771_v51 }
 0x513   :  { %v9039_v23 = vpop.f32.mrf.mxu0  ;;  %4444 = vmatprep.mubr.bf16.mxu1 %v5772_v30 }
 0x514   :  { %10296 = vst [vmem:[#allocation66_spill] sm:$0xff] %v9039_v23 }
 0x515   :  { %v9044_v42 = vpop.f32.mrf.mxu0 }
 0x516   :  { %10297 = vst [vmem:[#allocation68_spill] sm:$0xff] %v9044_v42 }
 0x517   :  { %v9046_v52 = vpop.f32.mrf.mxu0 }
 0x518   :  { %10298 = vst [vmem:[#allocation69_spill] sm:$0xff] %v9046_v52 }
 0x519   :  { %v9048_v36 = vpop.f32.mrf.mxu0 }
 0x51a   :  { %10299 = vst [vmem:[#allocation71_spill] sm:$0xff] %v9048_v36  ;;  %4445 = vmatmul.mubr.bf16.gmra.mxu1 %v5773_v17  ;;  %v5776_v17 = vld [vmem:[%s9892_s2 + $0x2ec] ss:$16 sps:$4 sm:$0xff]  }
 0x51b   :  { %v9053_v43 = vpop.f32.mrf.mxu0  ;;  %4454 = vmatprep.mubr.bf16.mxu1 %v5774_v41 }
 0x51c   :  { %10300 = vst [vmem:[#allocation72_spill] sm:$0xff] %v9053_v43 }
 0x51d   :  { %v9058_v6 = vpop.f32.mrf.mxu0 }
 0x51e   :  { %10301 = vst [vmem:[#allocation74_spill] sm:$0xff] %v9058_v6 }
 0x51f   :  { %v9060_v51 = vpop.f32.mrf.mxu0 }
 0x520   :  { %10302 = vst [vmem:[#allocation75_spill] sm:$0xff] %v9060_v51 }
 0x521   :  { %v9062_v30 = vpop.f32.mrf.mxu0 }
 0x522   :  { %10303 = vst [vmem:[#allocation77_spill] sm:$0xff] %v9062_v30  ;;  %4455 = vmatmul.mubr.bf16.gmra.mxu1 %v5775_v62  ;;  %v5778_v62 = vld [vmem:[%s9892_s2 + $0x30c] ss:$16 sps:$4 sm:$0xff]  }
 0x523   :  { %v9067_v63 = vpop.f32.mrf.mxu0  ;;  %4464 = vmatprep.mubr.bf16.mxu1 %v5776_v17 }
 0x524   :  { %10304 = vst [vmem:[#allocation2_spill] sm:$0xff] %v9067_v63 }
 0x525   :  { %v9072_v18 = vpop.f32.mrf.mxu0 }
 0x526   :  { %10305 = vst [vmem:[#allocation78_spill] sm:$0xff] %v9072_v18 }
 0x527   :  { %v9074_v41 = vpop.f32.mrf.mxu0 }
 0x528   :  { %10306 = vst [vmem:[#allocation4_spill] sm:$0xff] %v9074_v41 }
 0x529   :  { %v9076_v58 = vpop.f32.mrf.mxu0 }
 0x52a   :  { %10307 = vst [vmem:[#allocation79_spill] sm:$0xff] %v9076_v58  ;;  %4465 = vmatmul.mubr.bf16.gmra.mxu1 %v5777_v60  ;;  %v5780_v60 = vld [vmem:[%s9892_s2 + $0x32c] ss:$16 sps:$4 sm:$0xff]  }
 0x52b   :  { %v9081_v5 = vpop.f32.mrf.mxu0  ;;  %4474 = vmatprep.mubr.bf16.mxu1 %v5778_v62 }
 0x52c   :  { %10308 = vst [vmem:[#allocation6_spill] sm:$0xff] %v9081_v5 }
 0x52d   :  { %v9086_v31 = vpop.f32.mrf.mxu0 }
 0x52e   :  { %10309 = vst [vmem:[#allocation80_spill] sm:$0xff] %v9086_v31 }
 0x52f   :  { %v9088_v17 = vpop.f32.mrf.mxu0 }
 0x530   :  { %10310 = vst [vmem:[#allocation8_spill] sm:$0xff] %v9088_v17 }
 0x531   :  { %v9090_v54 = vpop.f32.mrf.mxu0 }
 0x532   :  { %10311 = vst [vmem:[#allocation81_spill] sm:$0xff] %v9090_v54  ;;  %4475 = vmatmul.mubr.bf16.gmra.mxu1 %v5779_v29  ;;  %v5781_v54 = vld [vmem:[%s9892_s2 + $0x328] ss:$16 sps:$4 sm:$0xff]  }
 0x533   :  { %v9095_v38 = vpop.f32.mrf.mxu0  ;;  %4484 = vmatprep.mubr.bf16.mxu1 %v5780_v60 }
 0x534   :  { %10312 = vst [vmem:[#allocation10_spill] sm:$0xff] %v9095_v38  ;;  %v5782_v38 = vld [vmem:[%s9892_s2 + $0x34c] ss:$16 sps:$4 sm:$0xff]  }
 0x535   :  { %v9100_v5 = vpop.f32.mrf.mxu0 }
 0x536   :  { %10313 = vst [vmem:[#allocation82_spill] sm:$0xff] %v9100_v5 }
 0x537   :  { %v9102_v62 = vpop.f32.mrf.mxu0 }
 0x538   :  { %10314 = vst [vmem:[#allocation12_spill] sm:$0xff] %v9102_v62 }
 0x539   :  { %v9104_v31 = vpop.f32.mrf.mxu0 }
 0x53a   :  { %10315 = vst [vmem:[#allocation83_spill] sm:$0xff] %v9104_v31  ;;  %v9106_v17 = vpop.f32.mrf.mxu1  ;;  %4485 = vmatmul.mubr.bf16.gmra.mxu1 %v5781_v54 }
 0x53b   :  { %v9111_v29 = vpop.f32.mrf.mxu0  ;;  %4494 = vmatprep.mubr.bf16.mxu1 %v5782_v38 }
 0x53c   :  { %10316 = vst [vmem:[#allocation14_spill] sm:$0xff] %v9111_v29  ;;  %v9116_v60 = vpop.f32.mrf.mxu1  ;;  %v5783_v29 = vld [vmem:[%s9892_s2 + $0x348] ss:$16 sps:$4 sm:$0xff]  }
 0x53d   :  { %v9118_v5 = vpop.f32.mrf.mxu0 }
 0x53e   :  { %10317 = vst [vmem:[#allocation84_spill] sm:$0xff] %v9118_v5  ;;  %v9120_v62 = vpop.f32.mrf.mxu1  ;;  %v5784_v5 = vld [vmem:[%s9892_s2 + $0x36c] ss:$16 sps:$4 sm:$0xff]  }
 0x53f   :  { %v9122_v31 = vpop.f32.mrf.mxu0 }
 0x540   :  { %10318 = vst [vmem:[#allocation105_spill] sm:$0xff] %v9122_v31  ;;  %v9124_v58 = vpop.f32.mrf.mxu1 }
 0x541   :  { %v9126_v41 = vpop.f32.mrf.mxu0 }
 0x542   :  { %10319 = vst [vmem:[#allocation106_spill] sm:$0xff] %v9126_v41  ;;  %v9128_v54 = vpop.f32.mrf.mxu1  ;;  %4495 = vmatmul.mubr.bf16.gmra.mxu1 %v5783_v29 }
 0x543   :  { %v9133_v38 = vpop.f32.mrf.mxu0  ;;  %4504 = vmatprep.mubr.bf16.mxu1 %v5784_v5 }
 0x544   :  { %10320 = vst [vmem:[#allocation107_spill] sm:$0xff] %v9133_v38  ;;  %v9138_v18 = vpop.f32.mrf.mxu1  ;;  %v5785_v38 = vld [vmem:[%s9892_s2 + $0x368] ss:$16 sps:$4 sm:$0xff]  }
 0x545   :  { %v9140_v31 = vpop.f32.mrf.mxu0 }
 0x546   :  { %10321 = vst [vmem:[#allocation108_spill] sm:$0xff] %v9140_v31  ;;  %v9142_v63 = vpop.f32.mrf.mxu1  ;;  %v5786_v31 = vld [vmem:[%s9892_s2 + $0x38c] ss:$16 sps:$4 sm:$0xff]  }
 0x547   :  { %v9144_v41 = vpop.f32.mrf.mxu0 }
 0x548   :  { %10322 = vst [vmem:[#allocation109_spill] sm:$0xff] %v9144_v41  ;;  %v9146_v30 = vpop.f32.mrf.mxu1 }
 0x549   :  { %v9148_v51 = vpop.f32.mrf.mxu0 }
 0x54a   :  { %10323 = vst [vmem:[#allocation110_spill] sm:$0xff] %v9148_v51  ;;  %v9150_v29 = vpop.f32.mrf.mxu1  ;;  %4505 = vmatmul.mubr.bf16.gmra.mxu1 %v5785_v38 }
 0x54b   :  { %v9155_v5 = vpop.f32.mrf.mxu0  ;;  %4514 = vmatprep.mubr.bf16.mxu1 %v5786_v31 }
 0x54c   :  { %10324 = vst [vmem:[#allocation111_spill] sm:$0xff] %v9155_v5  ;;  %v9160_v6 = vpop.f32.mrf.mxu1  ;;  %v5787_v5 = vld [vmem:[%s9892_s2 + $0x388] ss:$16 sps:$4 sm:$0xff]  }
 0x54d   :  { %v9162_v41 = vpop.f32.mrf.mxu0 }
 0x54e   :  { %10325 = vst [vmem:[#allocation112_spill] sm:$0xff] %v9162_v41  ;;  %v9164_v43 = vpop.f32.mrf.mxu1  ;;  %v5788_v41 = vld [vmem:[%s9892_s2 + $0x3ac] ss:$16 sps:$4 sm:$0xff]  }
 0x54f   :  { %v9166_v51 = vpop.f32.mrf.mxu0 }
 0x550   :  { %10326 = vst [vmem:[#allocation113_spill] sm:$0xff] %v9166_v51  ;;  %v9168_v36 = vpop.f32.mrf.mxu1 }
 0x551   :  { %v9170_v52 = vpop.f32.mrf.mxu0 }
 0x552   :  { %10327 = vst [vmem:[#allocation114_spill] sm:$0xff] %v9170_v52  ;;  %v9172_v38 = vpop.f32.mrf.mxu1  ;;  %4515 = vmatmul.mubr.bf16.gmra.mxu1 %v5787_v5 }
 0x553   :  { %v9177_v31 = vpop.f32.mrf.mxu0  ;;  %4524 = vmatprep.mubr.bf16.mxu1 %v5788_v41 }
 0x554   :  { %10328 = vst [vmem:[#allocation115_spill] sm:$0xff] %v9177_v31  ;;  %v9182_v42 = vpop.f32.mrf.mxu1  ;;  %v5789_v31 = vld [vmem:[%s9892_s2 + $0x3a8] ss:$16 sps:$4 sm:$0xff]  }
 0x555   :  { %v9184_v51 = vpop.f32.mrf.mxu0 }
 0x556   :  { %10329 = vst [vmem:[#allocation116_spill] sm:$0xff] %v9184_v51  ;;  %v9186_v23 = vpop.f32.mrf.mxu1  ;;  %v5790_v51 = vld [vmem:[%s9892_s2 + $0x3cc] ss:$16 sps:$4 sm:$0xff]  }
 0x557   :  { %v9188_v52 = vpop.f32.mrf.mxu0 }
 0x558   :  { %10330 = vst [vmem:[#allocation117_spill] sm:$0xff] %v9188_v52  ;;  %v9190_v55 = vpop.f32.mrf.mxu1 }
 0x559   :  { %v9192_v32 = vpop.f32.mrf.mxu0 }
 0x55a   :  { %10331 = vst [vmem:[#allocation118_spill] sm:$0xff] %v9192_v32  ;;  %v9194_v5 = vpop.f32.mrf.mxu1  ;;  %4525 = vmatmul.mubr.bf16.gmra.mxu1 %v5789_v31 }
 0x55b   :  { %v9199_v41 = vpop.f32.mrf.mxu0  ;;  %4534 = vmatprep.mubr.bf16.mxu1 %v5790_v51 }
 0x55c   :  { %10332 = vst [vmem:[#allocation119_spill] sm:$0xff] %v9199_v41  ;;  %v9204_v7 = vpop.f32.mrf.mxu1  ;;  %v5791_v41 = vld [vmem:[%s9892_s2 + $0x3c8] ss:$16 sps:$4 sm:$0xff]  }
 0x55d   :  { %v9206_v52 = vpop.f32.mrf.mxu0 }
 0x55e   :  { %10333 = vst [vmem:[#allocation120_spill] sm:$0xff] %v9206_v52  ;;  %v9208_v61 = vpop.f32.mrf.mxu1  ;;  %v5792_v52 = vld [vmem:[%s9892_s2 + $0x3ec] ss:$16 sps:$4 sm:$0xff]  }
 0x55f   :  { %v9210_v32 = vpop.f32.mrf.mxu0 }
 0x560   :  { %10334 = vst [vmem:[#allocation121_spill] sm:$0xff] %v9210_v32  ;;  %v9212_v22 = vpop.f32.mrf.mxu1 }
 0x561   :  { %v9214_v40 = vpop.f32.mrf.mxu0 }
 0x562   :  { %10335 = vst [vmem:[#allocation122_spill] sm:$0xff] %v9214_v40  ;;  %v9216_v31 = vpop.f32.mrf.mxu1  ;;  %4535 = vmatmul.mubr.bf16.gmra.mxu1 %v5791_v41 }
 0x563   :  { %v9221_v51 = vpop.f32.mrf.mxu0  ;;  %4544 = vmatprep.mubr.bf16.mxu1 %v5792_v52 }
 0x564   :  { %10336 = vst [vmem:[#allocation123_spill] sm:$0xff] %v9221_v51  ;;  %v9226_v19 = vpop.f32.mrf.mxu1  ;;  %v5793_v51 = vld [vmem:[%s9892_s2 + $0x3e8] ss:$16 sps:$4 sm:$0xff]  }
 0x565   :  { %v9228_v32 = vpop.f32.mrf.mxu0 }
 0x566   :  { %10337 = vst [vmem:[#allocation124_spill] sm:$0xff] %v9228_v32  ;;  %v9230_v24 = vpop.f32.mrf.mxu1 }
 0x567   :  { %v9232_v40 = vpop.f32.mrf.mxu0 }
 0x568   :  { %10338 = vst [vmem:[#allocation125_spill] sm:$0xff] %v9232_v40  ;;  %v9234_v49 = vpop.f32.mrf.mxu1 }
 0x569   :  { %v9236_v4 = vpop.f32.mrf.mxu0 }
 0x56a   :  { %10339 = vst [vmem:[#allocation126_spill] sm:$0xff] %v9236_v4  ;;  %v9238_v41 = vpop.f32.mrf.mxu1  ;;  %4545 = vmatmul.mubr.bf16.gmra.mxu1 %v5793_v51 }
 0x56b   :  { %10340 = vst [vmem:[#allocation127_spill] sm:$0xff] %v9238_v41  ;;  %v9243_v52 = vpop.f32.mrf.mxu0 }
 0x56c   :  { %10341 = vst [vmem:[#allocation128_spill] sm:$0xff] %v9243_v52  ;;  %v9245_v12 = vpop.f32.mrf.mxu1 }
 0x56d   :  { %10342 = vst [vmem:[#allocation129_spill] sm:$0xff] %v9245_v12  ;;  %v9247_v32 = vpop.f32.mrf.mxu0 }
 0x56e   :  { %10343 = vst [vmem:[#allocation130_spill] sm:$0xff] %v9247_v32  ;;  %v9249_v59 = vpop.f32.mrf.mxu1 }
 0x56f   :  { %10344 = vst [vmem:[#allocation131_spill] sm:$0xff] %v9249_v59  ;;  %v9251_v40 = vpop.f32.mrf.mxu0 }
 0x570   :  { %10345 = vst [vmem:[#allocation132_spill] sm:$0xff] %v9251_v40  ;;  %v9253_v20 = vpop.f32.mrf.mxu1 }
 0x571   :  { %10346 = vst [vmem:[#allocation133_spill] sm:$0xff] %v9253_v20  ;;  %v9255_v4 = vpop.f32.mrf.mxu0 }
 0x572   :  { %10347 = vst [vmem:[#allocation134_spill] sm:$0xff] %v9255_v4  ;;  %v9257_v34 = vpop.f32.mrf.mxu1 }
 0x573   :  { %10348 = vst [vmem:[#allocation135_spill] sm:$0xff] %v9257_v34  ;;  %v9259_v3 = vpop.f32.mrf.mxu0 }
 0x574   :  { %10349 = vst [vmem:[#allocation136_spill] sm:$0xff] %v9259_v3  ;;  %v9261_v41 = vpop.f32.mrf.mxu1 }
 0x575   :  { %10350 = vst [vmem:[#allocation137_spill] sm:$0xff] %v9261_v41  ;;  %v9263_v51 = vpop.f32.mrf.mxu0 }
 0x576   :  { %10351 = vst [vmem:[#allocation138_spill] sm:$0xff] %v9263_v51  ;;  %v9265_v52 = vpop.f32.mrf.mxu1 }
 0x577   :  { %10352 = vst [vmem:[#allocation139_spill] sm:$0xff] %v9265_v52  ;;  %v9267_v12 = vpop.f32.mrf.mxu0 }
 0x578   :  { %10353 = vst [vmem:[#allocation140_spill] sm:$0xff] %v9267_v12  ;;  %v9269_v32 = vpop.f32.mrf.mxu1 }
 0x579   :  { %10354 = vst [vmem:[#allocation141_spill] sm:$0xff] %v9269_v32  ;;  %v9271_v59 = vpop.f32.mrf.mxu0 }
 0x57a   :  { %10355 = vst [vmem:[#allocation142_spill] sm:$0xff] %v9271_v59  ;;  %v9273_v40 = vpop.f32.mrf.mxu1 }
 0x57b   :  { %10356 = vst [vmem:[#allocation143_spill] sm:$0xff] %v9273_v40  ;;  %v9275_v20 = vpop.f32.mrf.mxu0 }
 0x57c   :  { %10357 = vst [vmem:[#allocation144_spill] sm:$0xff] %v9275_v20  ;;  %v9277_v4 = vpop.f32.mrf.mxu1 }
 0x57d   :  { %10358 = vst [vmem:[#allocation145_spill] sm:$0xff] %v9277_v4  ;;  %v9279_v34 = vpop.f32.mrf.mxu0 }
 0x57e   :  { %10359 = vst [vmem:[#allocation146_spill] sm:$0xff] %v9279_v34  ;;  %v9281_v3 = vpop.f32.mrf.mxu1 }
 0x57f   :  { %10360 = vst [vmem:[#allocation147_spill] sm:$0xff] %v9281_v3  ;;  %v9283_v41 = vpop.f32.mrf.mxu0 }
 0x580   :  { %10361 = vst [vmem:[#allocation148_spill] sm:$0xff] %v9283_v41  ;;  %v9285_v51 = vpop.f32.mrf.mxu1 }
 0x581   :  { %10362 = vst [vmem:[#allocation149_spill] sm:$0xff] %v9285_v51  ;;  %v9287_v52 = vpop.f32.mrf.mxu0 }
 0x582   :  { %10363 = vst [vmem:[#allocation150_spill] sm:$0xff] %v9287_v52  ;;  %v9289_v12 = vpop.f32.mrf.mxu1 }
 0x583   :  { %10364 = vst [vmem:[#allocation151_spill] sm:$0xff] %v9289_v12  ;;  %v9291_v32 = vpop.f32.mrf.mxu0 }
 0x584   :  { %10365 = vst [vmem:[#allocation152_spill] sm:$0xff] %v9291_v32  ;;  %v9293_v59 = vpop.f32.mrf.mxu1 }
 0x585   :  { %10366 = vst [vmem:[#allocation153_spill] sm:$0xff] %v9293_v59  ;;  %v9295_v40 = vpop.f32.mrf.mxu0 }
 0x586   :  { %10367 = vst [vmem:[#allocation154_spill] sm:$0xff] %v9295_v40  ;;  %v9297_v20 = vpop.f32.mrf.mxu1 }
 0x587   :  { %10368 = vst [vmem:[#allocation155_spill] sm:$0xff] %v9297_v20  ;;  %v9299_v4 = vpop.f32.mrf.mxu0 }
 0x588   :  { %10369 = vst [vmem:[#allocation156_spill] sm:$0xff] %v9299_v4  ;;  %v9301_v34 = vpop.f32.mrf.mxu1 }
 0x589   :  { %10370 = vst [vmem:[#allocation157_spill] sm:$0xff] %v9301_v34  ;;  %v9303_v3 = vpop.f32.mrf.mxu0 }
 0x58a   :  { %10371 = vst [vmem:[#allocation158_spill] sm:$0xff] %v9303_v3  ;;  %v9305_v41 = vpop.f32.mrf.mxu1 }
 0x58b   :  { %10372 = vst [vmem:[#allocation159_spill] sm:$0xff] %v9305_v41  ;;  %v9307_v51 = vpop.f32.mrf.mxu0 }
 0x58c   :  { %10373 = vst [vmem:[#allocation160_spill] sm:$0xff] %v9307_v51  ;;  %v9309_v52 = vpop.f32.mrf.mxu1 }
 0x58d   :  { %10374 = vst [vmem:[#allocation161_spill] sm:$0xff] %v9309_v52  ;;  %v9311_v12 = vpop.f32.mrf.mxu0 }
 0x58e   :  { %10375 = vst [vmem:[#allocation162_spill] sm:$0xff] %v9311_v12  ;;  %v9313_v32 = vpop.f32.mrf.mxu1 }
 0x58f   :  { %10376 = vst [vmem:[#allocation163_spill] sm:$0xff] %v9313_v32  ;;  %v9315_v59 = vpop.f32.mrf.mxu0 }
 0x590   :  { %10377 = vst [vmem:[#allocation164_spill] sm:$0xff] %v9315_v59  ;;  %v9317_v40 = vpop.f32.mrf.mxu1 }
 0x591   :  { %10378 = vst [vmem:[#allocation165_spill] sm:$0xff] %v9317_v40  ;;  %v9319_v20 = vpop.f32.mrf.mxu0 }
 0x592   :  { %10379 = vst [vmem:[#allocation166_spill] sm:$0xff] %v9319_v20  ;;  %v9321_v4 = vpop.f32.mrf.mxu1 }
 0x593   :  { %10380 = vst [vmem:[#allocation167_spill] sm:$0xff] %v9321_v4  ;;  %v9323_v34 = vpop.f32.mrf.mxu0 }
 0x594   :  { %10381 = vst [vmem:[#allocation168_spill] sm:$0xff] %v9323_v34  ;;  %v9325_v3 = vpop.f32.mrf.mxu1 }
 0x595   :  { %10382 = vst [vmem:[#allocation169_spill] sm:$0xff] %v9325_v3  ;;  %v9327_v41 = vpop.f32.mrf.mxu0 }
 0x596   :  { %10383 = vst [vmem:[#allocation170_spill] sm:$0xff] %v9327_v41  ;;  %v9329_v51 = vpop.f32.mrf.mxu1 }
 0x597   :  { %10384 = vst [vmem:[#allocation171_spill] sm:$0xff] %v9329_v51  ;;  %v9331_v52 = vpop.f32.mrf.mxu0 }
 0x598   :  { %10385 = vst [vmem:[#allocation172_spill] sm:$0xff] %v9331_v52  ;;  %v9333_v12 = vpop.f32.mrf.mxu1 }
 0x599   :  { %10386 = vst [vmem:[#allocation173_spill] sm:$0xff] %v9333_v12  ;;  %v9335_v32 = vpop.f32.mrf.mxu0 }
 0x59a   :  { %10387 = vst [vmem:[#allocation174_spill] sm:$0xff] %v9335_v32  ;;  %v9337_v59 = vpop.f32.mrf.mxu1 }
 0x59b   :  { %10388 = vst [vmem:[#allocation175_spill] sm:$0xff] %v9337_v59  ;;  %v9339_v40 = vpop.f32.mrf.mxu0 }
 0x59c   :  { %10389 = vst [vmem:[#allocation176_spill] sm:$0xff] %v9339_v40  ;;  %v9341_v20 = vpop.f32.mrf.mxu1 }
 0x59d   :  { %10390 = vst [vmem:[#allocation177_spill] sm:$0xff] %v9341_v20  ;;  %v9343_v4 = vpop.f32.mrf.mxu0 }
 0x59e   :  { %10391 = vst [vmem:[#allocation178_spill] sm:$0xff] %v9343_v4  ;;  %v9345_v34 = vpop.f32.mrf.mxu1 }
 0x59f   :  { %10392 = vst [vmem:[#allocation179_spill] sm:$0xff] %v9345_v34  ;;  %v9347_v3 = vpop.f32.mrf.mxu0 }
 0x5a0   :  { %10393 = vst [vmem:[#allocation180_spill] sm:$0xff] %v9347_v3  ;;  %v9349_v41 = vpop.f32.mrf.mxu1 }
 0x5a1   :  { %10394 = vst [vmem:[#allocation181_spill] sm:$0xff] %v9349_v41  ;;  %v9351_v51 = vpop.f32.mrf.mxu0 }
 0x5a2   :  { %10395 = vst [vmem:[#allocation182_spill] sm:$0xff] %v9351_v51  ;;  %v9353_v52 = vpop.f32.mrf.mxu1 }
 0x5a3   :  { %10396 = vst [vmem:[#allocation183_spill] sm:$0xff] %v9353_v52  ;;  %v9355_v12 = vpop.f32.mrf.mxu0 }
 0x5a4   :  { %10397 = vst [vmem:[#allocation184_spill] sm:$0xff] %v9355_v12  ;;  %v9357_v32 = vpop.f32.mrf.mxu1 }
 0x5a5   :  { %10398 = vst [vmem:[#allocation185_spill] sm:$0xff] %v9357_v32  ;;  %v9359_v59 = vpop.f32.mrf.mxu0 }
 0x5a6   :  { %10399 = vst [vmem:[#allocation186_spill] sm:$0xff] %v9359_v59  ;;  %v9361_v40 = vpop.f32.mrf.mxu1 }
 0x5a7   :  { %10400 = vst [vmem:[#allocation187_spill] sm:$0xff] %v9361_v40  ;;  %v9363_v20 = vpop.f32.mrf.mxu0 }
 0x5a8   :  { %10401 = vst [vmem:[#allocation188_spill] sm:$0xff] %v9363_v20  ;;  %v9365_v4 = vpop.f32.mrf.mxu1 }
 0x5a9   :  { %10402 = vst [vmem:[#allocation189_spill] sm:$0xff] %v9365_v4  ;;  %v9367_v34 = vpop.f32.mrf.mxu0 }
 0x5aa   :  { %10403 = vst [vmem:[#allocation190_spill] sm:$0xff] %v9367_v34  ;;  %v9369_v3 = vpop.f32.mrf.mxu1 }
 0x5ab   :  { %10404 = vst [vmem:[#allocation191_spill] sm:$0xff] %v9369_v3  ;;  %v9371_v41 = vpop.f32.mrf.mxu0 }
 0x5ac   :  { %10405 = vst [vmem:[#allocation192_spill] sm:$0xff] %v9371_v41  ;;  %v9373_v51 = vpop.f32.mrf.mxu1 }
 0x5ad   :  { %10406 = vst [vmem:[#allocation193_spill] sm:$0xff] %v9373_v51  ;;  %v9375_v52 = vpop.f32.mrf.mxu0 }
 0x5ae   :  { %10407 = vst [vmem:[#allocation194_spill] sm:$0xff] %v9375_v52  ;;  %v9377_v12 = vpop.f32.mrf.mxu1 }
 0x5af   :  { %10408 = vst [vmem:[#allocation195_spill] sm:$0xff] %v9377_v12  ;;  %v9379_v32 = vpop.f32.mrf.mxu0 }
 0x5b0   :  { %10409 = vst [vmem:[#allocation196_spill] sm:$0xff] %v9379_v32  ;;  %v9381_v59 = vpop.f32.mrf.mxu1 }
 0x5b1   :  { %10410 = vst [vmem:[#allocation197_spill] sm:$0xff] %v9381_v59  ;;  %v9383_v40 = vpop.f32.mrf.mxu0 }
 0x5b2   :  { %10411 = vst [vmem:[#allocation198_spill] sm:$0xff] %v9383_v40  ;;  %v9385_v20 = vpop.f32.mrf.mxu1 }
 0x5b3   :  { %10412 = vst [vmem:[#allocation199_spill] sm:$0xff] %v9385_v20  ;;  %v9387_v4 = vpop.f32.mrf.mxu0 }
 0x5b4   :  { %10413 = vst [vmem:[#allocation200_spill] sm:$0xff] %v9387_v4  ;;  %v9389_v34 = vpop.f32.mrf.mxu1  ;;  %v4247_v4 = vadd.f32 %v9106_v17, %v8854_v10  ;;  %v4253_v10 = vadd.f32 %v9124_v58, %v8869_v44  ;;  %v10425_v44 = vld [vmem:[#allocation21_spill] sm:$0xff] }
 0x5b5   :  { %10414 = vst [vmem:[#allocation201_spill] sm:$0xff] %v9389_v34  ;;  %v9391_v3 = vpop.f32.mrf.mxu0 }
 0x5b6   :  { %10415 = vst [vmem:[#allocation202_spill] sm:$0xff] %v9391_v3  ;;  %v9393_v41 = vpop.f32.mrf.mxu1 }
 0x5b7   :  { %10416 = vst [vmem:[#allocation203_spill] sm:$0xff] %v9393_v41  ;;  %v9395_v51 = vpop.f32.mrf.mxu0 }
 0x5b8   :  { %10417 = vst [vmem:[#allocation204_spill] sm:$0xff] %v9395_v51  ;;  %v9397_v52 = vpop.f32.mrf.mxu1  ;;  %v4249_v51 = vadd.f32 %v9116_v60, %v8865_v35 }
 0x5b9   :  { %10418 = vst [vmem:[#allocation205_spill] sm:$0xff] %v9397_v52  ;;  %v9399_v12 = vpop.f32.mrf.mxu0 }
 0x5ba   :  { %10419 = vst [vmem:[#allocation206_spill] sm:$0xff] %v9399_v12  ;;  %v9401_v32 = vpop.f32.mrf.mxu1  ;;  %v4251_v12 = vadd.f32 %v9120_v62, %v8867_v13  ;;  %v4560_v13 = vmax.f32 %v4249_v51, 0.0  ;;  %v10424_v62 = vld [vmem:[#allocation17_spill] sm:$0xff]  ;;  %v4263_v51 = vadd.f32 %v9146_v30, %v8889_v50  ;;  %v10427_v30 = vld [vmem:[#allocation26_spill] sm:$0xff] }
 0x5bb   :  { %10420 = vst [vmem:[#allocation207_spill] sm:$0xff] %v9401_v32  ;;  %v4236_v59 = vpop.f32.mrf.mxu0 }
 0x5bc   :  { %v4237_v40 = vadd.f32 %v4236_v59, %v8834_v8  ;;  %v9404_v20 = vpop.f32.mrf.mxu1 }
 0x5bd   :  { %10421 = vst [vmem:[#allocation208_spill] sm:$0xff] %v9404_v20  ;;  %v4238_v34 = vpop.f32.mrf.mxu0  ;;  %v4559_v20 = vmax.f32 %v4247_v4, 0.0  ;;  %v4261_v4 = vadd.f32 %v9142_v63, %v8887_v48 }
 0x5be   :  { %v4239_v3 = vadd.f32 %v4238_v34, %v8845_v57  ;;  %v9409_v41 = vpop.f32.mrf.mxu1  ;;  %v4555_v32 = vmax.f32 %v4237_v40, 0.0  ;;  %v4257_v57 = vadd.f32 %v9128_v54, %v8874_v16  ;;  %v4561_v40 = vmax.f32 %v4251_v12, 0.0 }
 0x5bf   :  { %10422 = vst [vmem:[#allocation209_spill] sm:$0xff] %v9409_v41  ;;  %v4240_v52 = vpop.f32.mrf.mxu0 }
 0x5c0   :  { %v4241_v8 = vadd.f32 %v4240_v52, %v8847_v1  ;;  %v9416_v59 = vpop.f32.mrf.mxu1  ;;  %v4556_v34 = vmax.f32 %v4239_v3, 0.0  ;;  %v4259_v1 = vadd.f32 %v9138_v18, %v8885_v9  ;;  %v4683_v58 = vmul.f32 %v4555_v32, %v10424_v62  ;;  %v10426_v3 = vld [vmem:[#allocation23_spill] sm:$0xff] }
 0x5c1   :  { %10423 = vst [vmem:[#allocation210_spill] sm:$0xff] %v9416_v59  ;;  %v4242_v17 = vpop.f32.mrf.mxu0  ;;  %v4687_v54 = vmul.f32 %v4559_v20, %v10426_v3  ;;  %v4267_v18 = vadd.f32 %v9150_v29, %v8894_v45  ;;  %v4563_v9 = vmax.f32 %v4257_v57, 0.0  ;;  %v4269_v20 = vadd.f32 %v9160_v6, %v8905_v56 }
 0x5c2   :  { %v4557_v41 = vmax.f32 %v4241_v8, 0.0  ;;  %v4243_v35 = vadd.f32 %v4242_v17, %v8849_v26  ;;  %v9423_v60 = vpop.f32.mrf.mxu1  ;;  %v4562_v26 = vmax.f32 %v4253_v10, 0.0  ;;  %v4684_v63 = vmul.f32 %v4556_v34, %v10424_v62  ;;  %v10429_v62 = vld [vmem:[#allocation29_spill] sm:$0xff] }
 0x5c3   :  { %v4565_v8 = vmax.f32 %v4261_v4, 0.0  ;;  %v4271_v10 = vadd.f32 %v9164_v43, %v8907_v14  ;;  %v4688_v50 = vmul.f32 %v4560_v13, %v10426_v3  ;;  %v4689_v45 = vmul.f32 %v4561_v40, %v10427_v30  ;;  %v10428_v4 = vld [vmem:[#allocation28_spill] sm:$0xff] }
 0x5c4   :  { %v4685_v52 = vmul.f32 %v4557_v41, %v10425_v44  ;;  %v4558_v59 = vmax.f32 %v4243_v35, 0.0  ;;  %v9431_v16 = vpop.f32.mrf.mxu1  ;;  %v4564_v41 = vmax.f32 %v4259_v1, 0.0  ;;  %v4566_v34 = vmax.f32 %v4263_v51, 0.0 }
 0x5c5   :  { %v4567_v35 = vmax.f32 %v4267_v18, 0.0  ;;  %v4273_v1 = vadd.f32 %v9168_v36, %v8909_v0  ;;  %v4691_v56 = vmul.f32 %v4563_v9, %v10428_v4  ;;  %v4277_v14 = vadd.f32 %v9172_v38, %v8914_v53  ;;  %v10430_v38 = vld [vmem:[#allocation30_spill] sm:$0xff] }
 0x5c6   :  { %v4811_v48 = vadd.f32 %v4685_v52, %v4683_v58  ;;  %v4686_v12 = vmul.f32 %v4558_v59, %v10425_v44  ;;  %v9440_v32 = vpop.f32.mrf.mxu1  ;;  %v4690_v59 = vmul.f32 %v4562_v26, %v10427_v30  ;;  %v4692_v40 = vmul.f32 %v4564_v41, %v10428_v4 }
 0x5c7   :  { %v4693_v58 = vmul.f32 %v4565_v8, %v10429_v62  ;;  %v4568_v44 = vmax.f32 %v4269_v20, 0.0  ;;  %v4569_v52 = vmax.f32 %v4271_v10, 0.0  ;;  %v4279_v3 = vadd.f32 %v9182_v42, %v8925_v33 }
 0x5c8   :  { %v4812_v29 = vadd.f32 %v4811_v48, %v4687_v54  ;;  %v4880_v17 = vadd.f32 %v4686_v12, %v4684_v63  ;;  %v9448_v57 = vpop.f32.mrf.mxu1  ;;  %v4281_v0 = vadd.f32 %v9186_v23, %v8927_v21  ;;  %v4694_v53 = vmul.f32 %v4566_v34, %v10429_v62  ;;  %v10431_v23 = vld [vmem:[#allocation31_spill] sm:$0xff] }
 0x5c9   :  { %v4695_v51 = vmul.f32 %v4567_v35, %v10430_v38  ;;  %v4570_v18 = vmax.f32 %v4273_v1, 0.0  ;;  %v4283_v9 = vadd.f32 %v9190_v55, %v8929_v15  ;;  %v4571_v63 = vmax.f32 %v4277_v14, 0.0 }
 0x5ca   :  { %v4813_v43 = vadd.f32 %v4812_v29, %v4689_v45  ;;  %v4881_v6 = vadd.f32 %v4880_v17, %v4688_v50  ;;  %v9456_v13 = vpop.f32.mrf.mxu1  ;;  %v4287_v48 = vadd.f32 %v9194_v5, %v8934_v27  ;;  %v4696_v21 = vmul.f32 %v4568_v44, %v10430_v38  ;;  %v10432_v17 = vld [vmem:[#allocation32_spill] sm:$0xff]  ;;  %v10437_v38 = vld [vmem:[#allocation90_spill] sm:$0xff] }
 0x5cb   :  { %v4697_v41 = vmul.f32 %v4569_v52, %v10431_v23  ;;  %v4289_v8 = vadd.f32 %v9204_v7, %v8945_v28  ;;  %v4291_v20 = vadd.f32 %v9208_v61, %v8947_v25  ;;  %v4572_v10 = vmax.f32 %v4279_v3, 0.0 }
 0x5cc   :  { %v4814_v36 = vadd.f32 %v4813_v43, %v4691_v56  ;;  %v4882_v54 = vadd.f32 %v4881_v6, %v4690_v59  ;;  %v9464_v26 = vpop.f32.mrf.mxu1  ;;  %v4573_v15 = vmax.f32 %v4281_v0, 0.0  ;;  %v4698_v27 = vmul.f32 %v4570_v18, %v10431_v23  ;;  %v10436_v0 = vld [vmem:[#allocation37_spill] sm:$0xff] }
 0x5cd   :  { %v4574_v5 = vmax.f32 %v4283_v9, 0.0  ;;  %v4293_v45 = vadd.f32 %v9212_v22, %v8949_v46  ;;  %v4297_v29 = vadd.f32 %v9216_v31, %v8954_v2  ;;  %v4699_v28 = vmul.f32 %v4571_v63, %v10432_v17  ;;  %v10433_v22 = vld [vmem:[#allocation33_spill] sm:$0xff]  ;;  %v10439_v9 = vld [vmem:[#allocation54_spill] sm:$0xff] }
 0x5ce   :  { %v4815_v33 = vadd.f32 %v4814_v36, %v4693_v58  ;;  %v4883_v42 = vadd.f32 %v4882_v54, %v4692_v40  ;;  %v9472_v12 = vpop.f32.mrf.mxu1  ;;  %v4575_v7 = vmax.f32 %v4287_v48, 0.0  ;;  %v4576_v34 = vmax.f32 %v4289_v8, 0.0  ;;  %v10434_v58 = vld [vmem:[#allocation34_spill] sm:$0xff]  ;;  %v10443_v8 = vld [vmem:[#allocation133_spill] sm:$0xff] }
 0x5cf   :  { %v4577_v35 = vmax.f32 %v4291_v20, 0.0  ;;  %v4299_v1 = vadd.f32 %v9226_v19, %v8965_v11  ;;  %v4301_v4 = vadd.f32 %v9230_v24, %v8967_v47  ;;  %v4700_v46 = vmul.f32 %v4572_v10, %v10432_v17  ;;  %v10435_v19 = vld [vmem:[#allocation127_spill] sm:$0xff] }
 0x5d0   :  { %v4816_v55 = vadd.f32 %v4815_v33, %v4695_v51  ;;  %v4884_v50 = vadd.f32 %v4883_v42, %v4694_v53  ;;  %v9480_v30 = vpop.f32.mrf.mxu1  ;;  %v4701_v56 = vmul.f32 %v4573_v15, %v10433_v22  ;;  %v4702_v43 = vmul.f32 %v4574_v5, %v10433_v22  ;;  %v10438_v51 = vld [vmem:[#allocation129_spill] sm:$0xff]  ;;  %v10441_v42 = vld [vmem:[#allocation40_spill] sm:$0xff]  ;;  %v10446_v17 = vld [vmem:[#allocation43_spill] sm:$0xff] }
 0x5d1   :  { %v4578_v6 = vmax.f32 %v4293_v45, 0.0  ;;  %v4579_v40 = vmax.f32 %v4297_v29, 0.0  ;;  %v4303_v62 = vadd.f32 %v9234_v49, %v8969_v39  ;;  %v4703_v11 = vmul.f32 %v4575_v7, %v10434_v58  ;;  %v10440_v39 = vld [vmem:[#allocation131_spill] sm:$0xff]  ;;  %v10444_v15 = vld [vmem:[#allocation89_spill] sm:$0xff]  ;;  %v10447_v7 = vld [vmem:[#allocation56_spill] sm:$0xff] }
 0x5d2   :  { %v4817_v59 = vadd.f32 %v4816_v55, %v4697_v41  ;;  %v4885_v25 = vadd.f32 %v4884_v50, %v4696_v21  ;;  %v9488_v61 = vpop.f32.mrf.mxu1  ;;  %v4307_v47 = vadd.f32 %v10435_v19, %v8974_v37  ;;  %v4704_v3 = vmul.f32 %v4576_v34, %v10434_v58  ;;  %v10442_v41 = vld [vmem:[#allocation91_spill] sm:$0xff]  ;;  %v10449_v34 = vld [vmem:[#allocation57_spill] sm:$0xff]  ;;  %v10453_v58 = vld [vmem:[#allocation86_spill] sm:$0xff] }
 0x5d3   :  { %v4705_v36 = vmul.f32 %v4577_v35, %v10436_v0  ;;  %v4580_v54 = vmax.f32 %v4299_v1, 0.0  ;;  %v4581_v53 = vmax.f32 %v4301_v4, 0.0  ;;  %v4309_v18 = vadd.f32 %v10438_v51, %v10437_v38  ;;  %v10445_v55 = vld [vmem:[#allocation135_spill] sm:$0xff]  ;;  %v10457_v51 = vld [vmem:[#allocation145_spill] sm:$0xff] }
 0x5d4   :  { %v4818_v2 = vadd.f32 %v4817_v59, %v4699_v28  ;;  %v4886_v31 = vadd.f32 %v4885_v25, %v4698_v27  ;;  %v9496_v14 = vpop.f32.mrf.mxu1  ;;  %v4311_v49 = vadd.f32 %v10440_v39, %v10439_v9  ;;  %v4706_v37 = vmul.f32 %v4578_v6, %v10436_v0  ;;  %v10448_v59 = vld [vmem:[#allocation137_spill] sm:$0xff]  ;;  %v10450_v35 = vld [vmem:[#allocation139_spill] sm:$0xff]  ;;  %v10451_v6 = vld [vmem:[#allocation88_spill] sm:$0xff] }
 0x5d5   :  { %v4707_v21 = vmul.f32 %v4579_v40, %v10441_v42  ;;  %v4582_v23 = vmax.f32 %v4303_v62, 0.0  ;;  %v4313_v20 = vadd.f32 %v10443_v8, %v10442_v41  ;;  %v4583_v10 = vmax.f32 %v4307_v47, 0.0  ;;  %v10452_v40 = vld [vmem:[#allocation141_spill] sm:$0xff]  ;;  %v10455_v47 = vld [vmem:[#allocation46_spill] sm:$0xff]  ;;  %v10456_v38 = vld [vmem:[#allocation59_spill] sm:$0xff] }
 0x5d6   :  { %v4819_v24 = vadd.f32 %v4818_v2, %v4701_v56  ;;  %v4887_v44 = vadd.f32 %v4886_v31, %v4700_v46  ;;  %v9504_v52 = vpop.f32.mrf.mxu1  ;;  %v4317_v50 = vadd.f32 %v10445_v55, %v10444_v15  ;;  %v4708_v29 = vmul.f32 %v4580_v54, %v10441_v42  ;;  %v10458_v9 = vld [vmem:[#allocation60_spill] sm:$0xff]  ;;  %v10459_v39 = vld [vmem:[#allocation147_spill] sm:$0xff]  ;;  %v10462_v15 = vld [vmem:[#allocation149_spill] sm:$0xff] }
 0x5d7   :  { %v4709_v28 = vmul.f32 %v4581_v53, %v10446_v17  ;;  %v4319_v25 = vadd.f32 %v10448_v59, %v10447_v7  ;;  %v4321_v1 = vadd.f32 %v10450_v35, %v10449_v34  ;;  %v4584_v4 = vmax.f32 %v4309_v18, 0.0  ;;  %v10466_v34 = vld [vmem:[#allocation55_spill] sm:$0xff] }
 0x5d8   :  { %v4820_v63 = vadd.f32 %v4819_v24, %v4703_v11  ;;  %v4888_v48 = vadd.f32 %v4887_v44, %v4702_v43  ;;  %v9512_v33 = vpop.f32.mrf.mxu1  ;;  %v4585_v46 = vmax.f32 %v4311_v49, 0.0  ;;  %v4710_v31 = vmul.f32 %v4582_v23, %v10446_v17  ;;  %v10454_v11 = vld [vmem:[#allocation143_spill] sm:$0xff] }
 0x5d9   :  { %v4586_v43 = vmax.f32 %v4313_v20, 0.0  ;;  %v4323_v62 = vadd.f32 %v10452_v40, %v10451_v6  ;;  %v4327_v19 = vadd.f32 %v10454_v11, %v10453_v58  ;;  %v4711_v24 = vmul.f32 %v4583_v10, %v10455_v47  ;;  %v10461_v10 = vld [vmem:[#allocation62_spill] sm:$0xff] }
 0x5da   :  { %v4821_v27 = vadd.f32 %v4820_v63, %v4705_v36  ;;  %v4889_v5 = vadd.f32 %v4888_v48, %v4704_v3  ;;  %v9520_v45 = vpop.f32.mrf.mxu1  ;;  %v4587_v44 = vmax.f32 %v4317_v50, 0.0  ;;  %v4588_v54 = vmax.f32 %v4319_v25, 0.0  ;;  %v10460_v48 = vld [vmem:[#allocation49_spill] sm:$0xff]  ;;  %v10463_v50 = vld [vmem:[#allocation52_spill] sm:$0xff] }
 0x5db   :  { %v4589_v53 = vmax.f32 %v4321_v1, 0.0  ;;  %v4329_v18 = vadd.f32 %v10457_v51, %v10456_v38  ;;  %v4331_v49 = vadd.f32 %v10459_v39, %v10458_v9  ;;  %v4712_v63 = vmul.f32 %v4584_v4, %v10455_v47  ;;  %v10475_v38 = vld [vmem:[#allocation159_spill] sm:$0xff] }
 0x5dc   :  { %v4822_v22 = vadd.f32 %v4821_v27, %v4707_v21  ;;  %v4890_v56 = vadd.f32 %v4889_v5, %v4706_v37  ;;  %v9528_v2 = vpop.f32.mrf.mxu1  ;;  %v4713_v37 = vmul.f32 %v4585_v46, %v10460_v48  ;;  %v4714_v41 = vmul.f32 %v4586_v43, %v10460_v48  ;;  %v10464_v5 = vld [vmem:[#allocation63_spill] sm:$0xff] }
 0x5dd   :  { %v4590_v8 = vmax.f32 %v4323_v62, 0.0  ;;  %v4591_v20 = vmax.f32 %v4327_v19, 0.0  ;;  %v4333_v55 = vadd.f32 %v10462_v15, %v10461_v10  ;;  %v4715_v27 = vmul.f32 %v4587_v44, %v10463_v50  ;;  %v10467_v46 = vld [vmem:[#allocation87_spill] sm:$0xff]  ;;  %v10471_v19 = vld [vmem:[#allocation58_spill] sm:$0xff]  ;;  %v10472_v44 = vld [vmem:[#allocation65_spill] sm:$0xff] }
 0x5de   :  { %v4823_v3 = vadd.f32 %v4822_v22, %v4709_v28  ;;  %v4891_v0 = vadd.f32 %v4890_v56, %v4708_v29  ;;  %v9536_v36 = vpop.f32.mrf.mxu1  ;;  %v10465_v29 = vld [vmem:[#allocation151_spill] sm:$0xff]  ;;  %v4716_v25 = vmul.f32 %v4588_v54, %v10463_v50  ;;  %v4717_v35 = vmul.f32 %v4589_v53, %v10466_v34  ;;  %v10468_v22 = vld [vmem:[#allocation153_spill] sm:$0xff]  ;;  %v10474_v53 = vld [vmem:[#allocation66_spill] sm:$0xff] }
 0x5df   :  { %v4337_v17 = vadd.f32 %v10465_v29, %v10464_v5  ;;  %v4592_v1 = vmax.f32 %v4329_v18, 0.0  ;;  %v4593_v4 = vmax.f32 %v4331_v49, 0.0  ;;  %v4339_v56 = vadd.f32 %v10468_v22, %v10467_v46  ;;  %v10470_v43 = vld [vmem:[#allocation155_spill] sm:$0xff] }
 0x5e0   :  { %v4824_v42 = vadd.f32 %v4823_v3, %v4711_v24  ;;  %v4892_v21 = vadd.f32 %v4891_v0, %v4710_v31  ;;  %v9544_v23 = vpop.f32.mrf.mxu1  ;;  %v10469_v31 = vld [vmem:[#allocation85_spill] sm:$0xff]  ;;  %v4718_v11 = vmul.f32 %v4590_v8, %v10466_v34  ;;  %v4719_v47 = vmul.f32 %v4591_v20, %v10471_v19  ;;  %v10480_v8 = vld [vmem:[#allocation163_spill] sm:$0xff] }
 0x5e1   :  { %v4341_v6 = vadd.f32 %v10470_v43, %v10469_v31  ;;  %v4594_v24 = vmax.f32 %v4333_v55, 0.0  ;;  %v10473_v3 = vld [vmem:[#allocation157_spill] sm:$0xff]  ;;  %v4595_v54 = vmax.f32 %v4337_v17, 0.0  ;;  %v4347_v51 = vadd.f32 %v10475_v38, %v10474_v53  ;;  %v10481_v17 = vld [vmem:[#allocation71_spill] sm:$0xff] }
 0x5e2   :  { %v4825_v28 = vadd.f32 %v4824_v42, %v4713_v37  ;;  %v4893_v7 = vadd.f32 %v4892_v21, %v4712_v63  ;;  %v9552_v59 = vpop.f32.mrf.mxu1  ;;  %v4343_v0 = vadd.f32 %v10473_v3, %v10472_v44  ;;  %v4720_v49 = vmul.f32 %v4592_v1, %v10471_v19  ;;  %v10476_v63 = vld [vmem:[#allocation61_spill] sm:$0xff]  ;;  %v10477_v37 = vld [vmem:[#allocation68_spill] sm:$0xff]  ;;  %v10484_v34 = vld [vmem:[#allocation167_spill] sm:$0xff] }
 0x5e3   :  { %v4721_v48 = vmul.f32 %v4593_v4, %v10476_v63  ;;  %v10478_v42 = vld [vmem:[#allocation161_spill] sm:$0xff]  ;;  %v4596_v10 = vmax.f32 %v4339_v56, 0.0  ;;  %v4597_v15 = vmax.f32 %v4341_v6, 0.0  ;;  %v4722_v5 = vmul.f32 %v4594_v24, %v10476_v63  ;;  %v10485_v1 = vld [vmem:[#allocation64_spill] sm:$0xff]  ;;  %v10488_v19 = vld [vmem:[#allocation75_spill] sm:$0xff] }
 0x5e4   :  { %v4826_v40 = vadd.f32 %v4825_v28, %v4715_v27  ;;  %v4894_v62 = vadd.f32 %v4893_v7, %v4714_v41  ;;  %v9560_v58 = vpop.f32.mrf.mxu1  ;;  %v4349_v21 = vadd.f32 %v10478_v42, %v10477_v37  ;;  %v10479_v41 = vld [vmem:[#allocation69_spill] sm:$0xff]  ;;  %v4598_v29 = vmax.f32 %v4343_v0, 0.0  ;;  %v10490_v3 = vld [vmem:[#allocation67_spill] sm:$0xff]  ;;  %v10493_v37 = vld [vmem:[#allocation70_spill] sm:$0xff] }
 0x5e5   :  { %v4351_v20 = vadd.f32 %v10480_v8, %v10479_v41  ;;  %v10482_v28 = vld [vmem:[#allocation165_spill] sm:$0xff]  ;;  %v4723_v4 = vmul.f32 %v4595_v54, %v10485_v1  ;;  %v4599_v46 = vmax.f32 %v4347_v51, 0.0  ;;  %v4724_v44 = vmul.f32 %v4596_v10, %v10485_v1  ;;  %v10495_v41 = vld [vmem:[#allocation175_spill] sm:$0xff] }
 0x5e6   :  { %v4827_v18 = vadd.f32 %v4826_v40, %v4717_v35  ;;  %v4895_v9 = vadd.f32 %v4894_v62, %v4716_v25  ;;  %v9568_v39 = vpop.f32.mrf.mxu1  ;;  %v4353_v7 = vadd.f32 %v10482_v28, %v10481_v17  ;;  %v10483_v25 = vld [vmem:[#allocation72_spill] sm:$0xff]  ;;  %v4600_v43 = vmax.f32 %v4349_v21, 0.0  ;;  %v10486_v40 = vld [vmem:[#allocation74_spill] sm:$0xff]  ;;  %v10487_v62 = vld [vmem:[#allocation169_spill] sm:$0xff] }
 0x5e7   :  { %v4357_v35 = vadd.f32 %v10484_v34, %v10483_v25  ;;  %v4601_v6 = vmax.f32 %v4351_v20, 0.0  ;;  %v4725_v0 = vmul.f32 %v4597_v15, %v10490_v3  ;;  %v4726_v51 = vmul.f32 %v4598_v29, %v10490_v3  ;;  %v10492_v63 = vld [vmem:[#allocation173_spill] sm:$0xff]  ;;  %v10494_v21 = vld [vmem:[#allocation2_spill] sm:$0xff]  ;;  %v10499_v34 = vld [vmem:[#allocation4_spill] sm:$0xff] }
 0x5e8   :  { %v4828_v55 = vadd.f32 %v4827_v18, %v4719_v47  ;;  %v4896_v50 = vadd.f32 %v4895_v9, %v4718_v11  ;;  %v9576_v27 = vpop.f32.mrf.mxu1  ;;  %v4359_v11 = vadd.f32 %v10487_v62, %v10486_v40  ;;  %v10489_v47 = vld [vmem:[#allocation171_spill] sm:$0xff]  ;;  %v4602_v18 = vmax.f32 %v4353_v7, 0.0  ;;  %v10497_v28 = vld [vmem:[#allocation78_spill] sm:$0xff]  ;;  %v10498_v7 = vld [vmem:[#allocation177_spill] sm:$0xff] }
 0x5e9   :  { %v4361_v24 = vadd.f32 %v10489_v47, %v10488_v19  ;;  %v4603_v9 = vmax.f32 %v4357_v35, 0.0  ;;  %v4727_v42 = vmul.f32 %v4599_v46, %v10493_v37  ;;  %v4367_v8 = vadd.f32 %v10495_v41, %v10494_v21  ;;  %v10500_v35 = vld [vmem:[#allocation179_spill] sm:$0xff]  ;;  %v10501_v40 = vld [vmem:[#allocation76_spill] sm:$0xff]  ;;  %v10503_v47 = vld [vmem:[#allocation181_spill] sm:$0xff] }
 0x5ea   :  { %v4829_v22 = vadd.f32 %v4828_v55, %v4721_v48  ;;  %v4897_v31 = vadd.f32 %v4896_v50, %v4720_v49  ;;  %v9584_v56 = vpop.f32.mrf.mxu1  ;;  %v10491_v49 = vld [vmem:[#allocation77_spill] sm:$0xff]  ;;  %v4728_v15 = vmul.f32 %v4600_v43, %v10493_v37  ;;  %v4604_v17 = vmax.f32 %v4359_v11, 0.0  ;;  %v10502_v43 = vld [vmem:[#allocation79_spill] sm:$0xff]  ;;  %v10507_v37 = vld [vmem:[#allocation80_spill] sm:$0xff] }
 0x5eb   :  { %v4363_v48 = vadd.f32 %v10492_v63, %v10491_v49  ;;  %v10496_v50 = vld [vmem:[#allocation73_spill] sm:$0xff]  ;;  %v4605_v29 = vmax.f32 %v4361_v24, 0.0  ;;  %v4369_v25 = vadd.f32 %v10498_v7, %v10497_v28  ;;  %v4371_v1 = vadd.f32 %v10500_v35, %v10499_v34  ;;  %v10504_v24 = vld [vmem:[#allocation6_spill] sm:$0xff]  ;;  %v10506_v49 = vld [vmem:[#allocation3_spill] sm:$0xff] }
 0x5ec   :  { %v4830_v53 = vadd.f32 %v4829_v22, %v4723_v4  ;;  %v4898_v38 = vadd.f32 %v4897_v31, %v4722_v5  ;;  %v9592_v54 = vpop.f32.mrf.mxu1  ;;  %v4729_v5 = vmul.f32 %v4601_v6, %v10496_v50  ;;  %v4730_v31 = vmul.f32 %v4602_v18, %v10496_v50  ;;  %v10508_v18 = vld [vmem:[#allocation185_spill] sm:$0xff]  ;;  %v10513_v34 = vld [vmem:[#allocation10_spill] sm:$0xff] }
 0x5ed   :  { %v4731_v62 = vmul.f32 %v4603_v9, %v10501_v40  ;;  %v4606_v19 = vmax.f32 %v4363_v48, 0.0  ;;  %v4373_v6 = vadd.f32 %v10503_v47, %v10502_v43  ;;  %v4607_v11 = vmax.f32 %v4367_v8, 0.0  ;;  %v10509_v9 = vld [vmem:[#allocation8_spill] sm:$0xff]  ;;  %v10510_v48 = vld [vmem:[#allocation187_spill] sm:$0xff]  ;;  %v10511_v28 = vld [vmem:[#allocation81_spill] sm:$0xff] }
 0x5ee   :  { %v4831_v20 = vadd.f32 %v4830_v53, %v4725_v0  ;;  %v4899_v10 = vadd.f32 %v4898_v38, %v4724_v44  ;;  %v9600_v55 = vpop.f32.mrf.mxu1  ;;  %v10505_v44 = vld [vmem:[#allocation183_spill] sm:$0xff]  ;;  %v4733_v63 = vmul.f32 %v4605_v29, %v10506_v49  ;;  %v4381_v21 = vadd.f32 %v10510_v48, %v10509_v9  ;;  %v10512_v7 = vld [vmem:[#allocation189_spill] sm:$0xff] }
 0x5ef   :  { %v4377_v3 = vadd.f32 %v10505_v44, %v10504_v24  ;;  %v4608_v41 = vmax.f32 %v4369_v25, 0.0  ;;  %v10514_v29 = vld [vmem:[#allocation191_spill] sm:$0xff]  ;;  %v10517_v24 = vld [vmem:[#allocation193_spill] sm:$0xff] }
 0x5f0   :  { %v4832_v4 = vadd.f32 %v4831_v20, %v4727_v42  ;;  %v4900_v46 = vadd.f32 %v4899_v10, %v4726_v51  ;;  %v9608_v22 = vpop.f32.mrf.mxu1  ;;  %v4732_v51 = vmul.f32 %v4604_v17, %v10501_v40  ;;  %v4379_v42 = vadd.f32 %v10508_v18, %v10507_v37  ;;  %v10522_v48 = vld [vmem:[#allocation197_spill] sm:$0xff] }
 0x5f1   :  { %v4609_v20 = vmax.f32 %v4371_v1, 0.0  ;;  %v4383_v17 = vadd.f32 %v10512_v7, %v10511_v28  ;;  %v4387_v35 = vadd.f32 %v10514_v29, %v10513_v34  ;;  %v4611_v40 = vmax.f32 %v4377_v3, 0.0  ;;  %v10524_v28 = vld [vmem:[#allocation14_spill] sm:$0xff]  ;;  %v10525_v7 = vld [vmem:[#allocation199_spill] sm:$0xff] }
 0x5f2   :  { %v4833_v0 = vadd.f32 %v4832_v4, %v4729_v5  ;;  %v4901_v53 = vadd.f32 %v4900_v46, %v4728_v15  ;;  %v9616_v38 = vpop.f32.mrf.mxu1  ;;  %v4734_v15 = vmul.f32 %v4606_v19, %v10506_v49  ;;  %v4610_v5 = vmax.f32 %v4373_v6, 0.0  ;;  %v10515_v4 = vld [vmem:[#allocation5_spill] sm:$0xff]  ;;  %v10518_v19 = vld [vmem:[#allocation12_spill] sm:$0xff]  ;;  %v10519_v6 = vld [vmem:[#allocation195_spill] sm:$0xff] }
 0x5f3   :  { %v4735_v46 = vmul.f32 %v4607_v11, %v10515_v4  ;;  %v4612_v1 = vmax.f32 %v4379_v42, 0.0  ;;  %v10520_v49 = vld [vmem:[#allocation7_spill] sm:$0xff]  ;;  %v4397_v34 = vadd.f32 %v10525_v7, %v10524_v28 }
 0x5f4   :  { %v4834_v8 = vadd.f32 %v4833_v0, %v4731_v62  ;;  %v4902_v10 = vadd.f32 %v4901_v53, %v4730_v31  ;;  %v9624_v50 = vpop.f32.mrf.mxu1  ;;  %v4613_v31 = vmax.f32 %v4381_v21, 0.0  ;;  %v10516_v62 = vld [vmem:[#allocation82_spill] sm:$0xff]  ;;  %v4391_v0 = vadd.f32 %v10519_v6, %v10518_v19  ;;  %v10521_v42 = vld [vmem:[#allocation83_spill] sm:$0xff]  ;;  %v10529_v19 = vld [vmem:[#allocation105_spill] sm:$0xff] }
 0x5f5   :  { %v4389_v44 = vadd.f32 %v10517_v24, %v10516_v62  ;;  %v4736_v53 = vmul.f32 %v4608_v41, %v10515_v4  ;;  %v4737_v37 = vmul.f32 %v4609_v20, %v10520_v49  ;;  %v4738_v3 = vmul.f32 %v4610_v5, %v10520_v49 }
 0x5f6   :  { %v4835_v43 = vadd.f32 %v4834_v8, %v4733_v63  ;;  %v4903_v47 = vadd.f32 %v4902_v10, %v4732_v51  ;;  %v9632_v25 = vpop.f32.mrf.mxu1  ;;  %v4614_v51 = vmax.f32 %v4383_v17, 0.0  ;;  %v4615_v63 = vmax.f32 %v4387_v35, 0.0  ;;  %v10523_v8 = vld [vmem:[#allocation9_spill] sm:$0xff]  ;;  %v10527_v35 = vld [vmem:[#allocation84_spill] sm:$0xff] }
 0x5f7   :  { %v4393_v21 = vadd.f32 %v10522_v48, %v10521_v42  ;;  %v4739_v10 = vmul.f32 %v4611_v40, %v10523_v8  ;;  %v4740_v20 = vmul.f32 %v4612_v1, %v10523_v8  ;;  %v4617_v5 = vmax.f32 %v4391_v0, 0.0  ;;  %v10530_v40 = vld [vmem:[#allocation203_spill] sm:$0xff]  ;;  %v10532_v1 = vld [vmem:[#allocation106_spill] sm:$0xff]  ;;  %v10533_v42 = vld [vmem:[#allocation205_spill] sm:$0xff] }
 0x5f8   :  { %v4836_v18 = vadd.f32 %v4835_v43, %v4735_v46  ;;  %v4904_v9 = vadd.f32 %v4903_v47, %v4734_v15  ;;  %v9640_v11 = vpop.f32.mrf.mxu1  ;;  %v10526_v15 = vld [vmem:[#allocation11_spill] sm:$0xff]  ;;  %v4616_v43 = vmax.f32 %v4389_v44, 0.0  ;;  %v10528_v47 = vld [vmem:[#allocation201_spill] sm:$0xff]  ;;  %v4401_v6 = vadd.f32 %v10530_v40, %v10529_v19 }
 0x5f9   :  { %v4741_v46 = vmul.f32 %v4613_v31, %v10526_v15  ;;  %v4399_v62 = vadd.f32 %v10528_v47, %v10527_v35  ;;  %v4403_v31 = vadd.f32 %v10533_v42, %v10532_v1  ;;  %v4619_v44 = vmax.f32 %v4397_v34, 0.0  ;;  %v10534_v8 = vld [vmem:[#allocation107_spill] sm:$0xff]  ;;  %v10537_v35 = vld [vmem:[#allocation108_spill] sm:$0xff]  ;;  %v10541_v1 = vld [vmem:[#allocation110_spill] sm:$0xff] }
 0x5fa   :  { %v4837_v29 = vadd.f32 %v4836_v18, %v4737_v37  ;;  %v4905_v41 = vadd.f32 %v4904_v9, %v4736_v53  ;;  %v9648_v4 = vpop.f32.mrf.mxu1  ;;  %v4742_v53 = vmul.f32 %v4614_v51, %v10526_v15  ;;  %v10531_v37 = vld [vmem:[#allocation13_spill] sm:$0xff]  ;;  %v4618_v9 = vmax.f32 %v4393_v21, 0.0  ;;  %v10538_v51 = vld [vmem:[#allocation208_spill] sm:$0xff]  ;;  %v10542_v42 = vld [vmem:[#allocation210_spill] sm:$0xff] }
 0x5fb   :  { %v4743_v18 = vmul.f32 %v4615_v63, %v10531_v37  ;;  %v4744_v7 = vmul.f32 %v4616_v43, %v10531_v37  ;;  %v4409_v15 = vadd.f32 %v10538_v51, %v10537_v35  ;;  %v10539_v63 = vld [vmem:[#allocation109_spill] sm:$0xff]  ;;  %v4620_v40 = vmax.f32 %v4399_v62, 0.0  ;;  %v10543_v37 = vld [vmem:[#allocation111_spill] sm:$0xff] }
 0x5fc   :  { %v4838_v17 = vadd.f32 %v4837_v29, %v4739_v10  ;;  %v4906_v24 = vadd.f32 %v4905_v41, %v4738_v3  ;;  %v9656_v49 = vpop.f32.mrf.mxu1  ;;  %v10535_v10 = vld [vmem:[#allocation207_spill] sm:$0xff]  ;;  %v10540_v21 = vld [vmem:[#allocation209_spill] sm:$0xff]  ;;  %v4413_v43 = vadd.f32 %v10542_v42, %v10541_v1 }
 0x5fd   :  { %v4407_v28 = vadd.f32 %v10535_v10, %v10534_v8  ;;  %v10536_v29 = vld [vmem:[#allocation15_spill] sm:$0xff]  ;;  %v4411_v47 = vadd.f32 %v10540_v21, %v10539_v63  ;;  %v10544_v8 = vld [vmem:[#allocation18_spill] sm:$0xff]  ;;  %v4624_v62 = vmax.f32 %v4409_v15, 0.0 }
 0x5fe   :  { %v4839_v0 = vadd.f32 %v4838_v17, %v4741_v46  ;;  %v4907_v48 = vadd.f32 %v4906_v24, %v4740_v20  ;;  %v9664_v3 = vpop.f32.mrf.mxu1  ;;  %v4745_v41 = vmul.f32 %v4617_v5, %v10536_v29  ;;  %v4621_v46 = vmax.f32 %v4401_v6, 0.0  ;;  %v10548_v15 = vld [vmem:[#allocation114_spill] sm:$0xff] }
 0x5ff   :  { %v4746_v17 = vmul.f32 %v4618_v9, %v10536_v29  ;;  %v4622_v24 = vmax.f32 %v4403_v31, 0.0  ;;  %v4417_v5 = vadd.f32 %v9423_v60, %v10543_v37  ;;  %v4747_v10 = vmul.f32 %v4619_v44, %v10544_v8  ;;  %v10546_v9 = vld [vmem:[#allocation113_spill] sm:$0xff] }
 0x600   :  { %v4840_v19 = vadd.f32 %v4839_v0, %v4743_v18  ;;  %v4908_v34 = vadd.f32 %v4907_v48, %v4742_v53  ;;  %v9672_v20 = vpop.f32.mrf.mxu1  ;;  %v4623_v63 = vmax.f32 %v4407_v28, 0.0  ;;  %v4625_v6 = vmax.f32 %v4411_v47, 0.0  ;;  %v10545_v53 = vld [vmem:[#allocation112_spill] sm:$0xff]  ;;  %v10547_v60 = vld [vmem:[#allocation25_spill] sm:$0xff] }
 0x601   :  { %v4419_v0 = vadd.f32 %v9431_v16, %v10545_v53  ;;  %v4421_v31 = vadd.f32 %v9440_v32, %v10546_v9  ;;  %v4748_v29 = vmul.f32 %v4620_v40, %v10544_v8  ;;  %v4749_v1 = vmul.f32 %v4621_v46, %v10547_v60  ;;  %v10550_v32 = vld [vmem:[#allocation115_spill] sm:$0xff] }
 0x602   :  { %v4841_v35 = vadd.f32 %v4840_v19, %v4745_v41  ;;  %v4909_v51 = vadd.f32 %v4908_v34, %v4744_v7  ;;  %v9680_v18 = vpop.f32.mrf.mxu1  ;;  %v4750_v28 = vmul.f32 %v4622_v24, %v10547_v60  ;;  %v4626_v7 = vmax.f32 %v4413_v43, 0.0  ;;  %v10549_v34 = vld [vmem:[#allocation97_spill] sm:$0xff]  ;;  %v10554_v9 = vld [vmem:[#allocation99_spill] sm:$0xff] }
 0x603   :  { %v4627_v41 = vmax.f32 %v4417_v5, 0.0  ;;  %v4423_v47 = vadd.f32 %v9448_v57, %v10548_v15  ;;  %v4751_v42 = vmul.f32 %v4623_v63, %v10549_v34  ;;  %v4427_v37 = vadd.f32 %v9456_v13, %v10550_v32  ;;  %v10556_v60 = vld [vmem:[#allocation119_spill] sm:$0xff] }
 0x604   :  { %v4842_v48 = vadd.f32 %v4841_v35, %v4747_v10  ;;  %v4910_v21 = vadd.f32 %v4909_v51, %v4746_v17  ;;  %v9688_v44 = vpop.f32.mrf.mxu1  ;;  %v4752_v46 = vmul.f32 %v4624_v62, %v10549_v34  ;;  %v10551_v17 = vld [vmem:[#allocation98_spill] sm:$0xff]  ;;  %v4628_v10 = vmax.f32 %v4419_v0, 0.0  ;;  %v10552_v35 = vld [vmem:[#allocation116_spill] sm:$0xff]  ;;  %v10553_v51 = vld [vmem:[#allocation117_spill] sm:$0xff] }
 0x605   :  { %v4753_v8 = vmul.f32 %v4625_v6, %v10551_v17  ;;  %v4629_v24 = vmax.f32 %v4421_v31, 0.0  ;;  %v4429_v57 = vadd.f32 %v9464_v26, %v10552_v35  ;;  %v4431_v53 = vadd.f32 %v9472_v12, %v10553_v51  ;;  %v10555_v62 = vld [vmem:[#allocation118_spill] sm:$0xff] }
 0x606   :  { %v4911_v19 = vadd.f32 %v4910_v21, %v4748_v29  ;;  %v4843_v16 = vadd.f32 %v4842_v48, %v4749_v1  ;;  %v9696_v40 = vpop.f32.mrf.mxu1  ;;  %v4754_v13 = vmul.f32 %v4626_v7, %v10551_v17  ;;  %v4755_v48 = vmul.f32 %v4627_v41, %v10554_v9  ;;  %v10559_v41 = vld [vmem:[#allocation121_spill] sm:$0xff] }
 0x607   :  { %v4630_v29 = vmax.f32 %v4423_v47, 0.0  ;;  %v4433_v6 = vadd.f32 %v9480_v30, %v10555_v62  ;;  %v4631_v21 = vmax.f32 %v4427_v37, 0.0  ;;  %v4437_v1 = vadd.f32 %v9488_v61, %v10556_v60 }
 0x608   :  { %v4912_v43 = vadd.f32 %v4911_v19, %v4750_v28  ;;  %v4844_v5 = vadd.f32 %v4843_v16, %v4751_v42  ;;  %v9704_v63 = vpop.f32.mrf.mxu1  ;;  %v4756_v12 = vmul.f32 %v4628_v10, %v10554_v9  ;;  %v10557_v28 = vld [vmem:[#allocation101_spill] sm:$0xff]  ;;  %v10558_v19 = vld [vmem:[#allocation120_spill] sm:$0xff]  ;;  %v4441_v47 = vadd.f32 %v9504_v52, %v10559_v41 }
 0x609   :  { %v4757_v15 = vmul.f32 %v4629_v24, %v10557_v28  ;;  %v4439_v7 = vadd.f32 %v9496_v14, %v10558_v19  ;;  %v4632_v34 = vmax.f32 %v4429_v57, 0.0  ;;  %v4633_v42 = vmax.f32 %v4431_v53, 0.0  ;;  %v10563_v53 = vld [vmem:[#allocation124_spill] sm:$0xff]  ;;  %v10564_v9 = vld [vmem:[#allocation125_spill] sm:$0xff] }
 0x60a   :  { %v4913_v0 = vadd.f32 %v4912_v43, %v4752_v46  ;;  %v4845_v31 = vadd.f32 %v4844_v5, %v4753_v8  ;;  %v9712_v26 = vpop.f32.mrf.mxu1  ;;  %v4758_v61 = vmul.f32 %v4630_v29, %v10557_v28  ;;  %v4634_v37 = vmax.f32 %v4433_v6, 0.0  ;;  %v10560_v46 = vld [vmem:[#allocation122_spill] sm:$0xff]  ;;  %v10561_v8 = vld [vmem:[#allocation123_spill] sm:$0xff] }
 0x60b   :  { %v4443_v17 = vadd.f32 %v9512_v33, %v10560_v46  ;;  %v4447_v10 = vadd.f32 %v9520_v45, %v10561_v8  ;;  %v10562_v43 = vld [vmem:[#allocation102_spill] sm:$0xff]  ;;  %v4635_v52 = vmax.f32 %v4437_v1, 0.0  ;;  %v4636_v57 = vmax.f32 %v4439_v7, 0.0  ;;  %v10565_v45 = vld [vmem:[#allocation103_spill] sm:$0xff] }
 0x60c   :  { %v4914_v16 = vadd.f32 %v4913_v0, %v4754_v13  ;;  %v4846_v30 = vadd.f32 %v4845_v31, %v4755_v48  ;;  %v9720_v32 = vpop.f32.mrf.mxu1  ;;  %v4759_v5 = vmul.f32 %v4631_v21, %v10562_v43  ;;  %v4637_v51 = vmax.f32 %v4441_v47, 0.0  ;;  %v10566_v1 = vld [vmem:[#allocation126_spill] sm:$0xff] }
 0x60d   :  { %v4449_v13 = vadd.f32 %v9528_v2, %v10563_v53  ;;  %v4451_v48 = vadd.f32 %v9536_v36, %v10564_v9  ;;  %v4760_v62 = vmul.f32 %v4632_v34, %v10562_v43  ;;  %v4761_v6 = vmul.f32 %v4633_v42, %v10565_v45  ;;  %v10568_v36 = vld [vmem:[#allocation128_spill] sm:$0xff]  ;;  %v10570_v46 = vld [vmem:[#allocation130_spill] sm:$0xff] }
 0x60e   :  { %v4915_v24 = vadd.f32 %v4914_v16, %v4756_v12  ;;  %v4847_v14 = vadd.f32 %v4846_v30, %v4757_v15  ;;  %v9728_v35 = vpop.f32.mrf.mxu1  ;;  %v4762_v31 = vmul.f32 %v4634_v37, %v10565_v45  ;;  %v4638_v21 = vmax.f32 %v4443_v17, 0.0  ;;  %v10567_v15 = vld [vmem:[#allocation104_spill] sm:$0xff]  ;;  %v10569_v16 = vld [vmem:[#allocation93_spill] sm:$0xff] }
 0x60f   :  { %v4639_v60 = vmax.f32 %v4447_v10, 0.0  ;;  %v4453_v12 = vadd.f32 %v9544_v23, %v10566_v1  ;;  %v4763_v19 = vmul.f32 %v4635_v52, %v10567_v15  ;;  %v4457_v7 = vadd.f32 %v9552_v59, %v10568_v36  ;;  %v10571_v17 = vld [vmem:[#allocation132_spill] sm:$0xff] }
 0x610   :  { %v4916_v29 = vadd.f32 %v4915_v24, %v4758_v61  ;;  %v4848_v33 = vadd.f32 %v4847_v14, %v4759_v5  ;;  %v9736_v0 = vpop.f32.mrf.mxu1  ;;  %v4764_v47 = vmul.f32 %v4636_v57, %v10567_v15  ;;  %v4765_v30 = vmul.f32 %v4637_v51, %v10569_v16  ;;  %v10572_v24 = vld [vmem:[#allocation94_spill] sm:$0xff]  ;;  %v10577_v45 = vld [vmem:[#allocation140_spill] sm:$0xff] }
 0x611   :  { %v4640_v34 = vmax.f32 %v4449_v13, 0.0  ;;  %v4641_v42 = vmax.f32 %v4451_v48, 0.0  ;;  %v4459_v23 = vadd.f32 %v9560_v58, %v10570_v46  ;;  %v4461_v8 = vadd.f32 %v9568_v39, %v10571_v17  ;;  %v10573_v5 = vld [vmem:[#allocation134_spill] sm:$0xff]  ;;  %v10574_v13 = vld [vmem:[#allocation136_spill] sm:$0xff]  ;;  %v10575_v48 = vld [vmem:[#allocation35_spill] sm:$0xff] }
 0x612   :  { %v4917_v28 = vadd.f32 %v4916_v29, %v4760_v62  ;;  %v4849_v2 = vadd.f32 %v4848_v33, %v4761_v6  ;;  %v9744_v41 = vpop.f32.mrf.mxu1  ;;  %v4766_v59 = vmul.f32 %v4638_v21, %v10569_v16  ;;  %v4767_v14 = vmul.f32 %v4639_v60, %v10572_v24  ;;  %v10576_v33 = vld [vmem:[#allocation138_spill] sm:$0xff]  ;;  %v10579_v15 = vld [vmem:[#allocation144_spill] sm:$0xff] }
 0x613   :  { %v4642_v43 = vmax.f32 %v4453_v12, 0.0  ;;  %v4463_v52 = vadd.f32 %v9576_v27, %v10573_v5  ;;  %v4643_v53 = vmax.f32 %v4457_v7, 0.0  ;;  %v4467_v9 = vadd.f32 %v9584_v56, %v10574_v13  ;;  %v10580_v7 = vld [vmem:[#allocation16_spill] sm:$0xff]  ;;  %v10584_v5 = vld [vmem:[#allocation150_spill] sm:$0xff] }
 0x614   :  { %v4918_v61 = vadd.f32 %v4917_v28, %v4762_v31  ;;  %v4850_v37 = vadd.f32 %v4849_v2, %v4763_v19  ;;  %v9752_v10 = vpop.f32.mrf.mxu1  ;;  %v4768_v39 = vmul.f32 %v4640_v34, %v10572_v24  ;;  %v4769_v29 = vmul.f32 %v4641_v42, %v10575_v48  ;;  %v10578_v28 = vld [vmem:[#allocation142_spill] sm:$0xff] }
 0x615   :  { %v4469_v62 = vadd.f32 %v9592_v54, %v10576_v33  ;;  %v4471_v6 = vadd.f32 %v9600_v55, %v10577_v45  ;;  %v4644_v21 = vmax.f32 %v4459_v23, 0.0  ;;  %v4645_v60 = vmax.f32 %v4461_v8, 0.0  ;;  %v10581_v42 = vld [vmem:[#allocation146_spill] sm:$0xff] }
 0x616   :  { %v4919_v57 = vadd.f32 %v4918_v61, %v4764_v47  ;;  %v4851_v51 = vadd.f32 %v4850_v37, %v4765_v30  ;;  %v9760_v58 = vpop.f32.mrf.mxu1  ;;  %v4770_v56 = vmul.f32 %v4642_v43, %v10575_v48  ;;  %v4646_v12 = vmax.f32 %v4463_v52, 0.0  ;;  %v10582_v37 = vld [vmem:[#allocation148_spill] sm:$0xff]  ;;  %v10587_v48 = vld [vmem:[#allocation95_spill] sm:$0xff] }
 0x617   :  { %v4473_v2 = vadd.f32 %v9608_v22, %v10578_v28  ;;  %v4477_v19 = vadd.f32 %v9616_v38, %v10579_v15  ;;  %v4771_v47 = vmul.f32 %v4643_v53, %v10580_v7  ;;  %v4647_v55 = vmax.f32 %v4467_v9, 0.0  ;;  %v10583_v38 = vld [vmem:[#allocation36_spill] sm:$0xff] }
 0x618   :  { %v4920_v31 = vadd.f32 %v4919_v57, %v4766_v59  ;;  %v4852_v27 = vadd.f32 %v4851_v51, %v4767_v14  ;;  %v9768_v1 = vpop.f32.mrf.mxu1  ;;  %v4648_v30 = vmax.f32 %v4469_v62, 0.0  ;;  %v4649_v34 = vmax.f32 %v4471_v6, 0.0  ;;  %v10585_v51 = vld [vmem:[#allocation19_spill] sm:$0xff] }
 0x619   :  { %v4479_v61 = vadd.f32 %v9624_v50, %v10581_v42  ;;  %v4481_v46 = vadd.f32 %v9632_v25, %v10582_v37  ;;  %v4772_v17 = vmul.f32 %v4644_v21, %v10580_v7  ;;  %v4773_v8 = vmul.f32 %v4645_v60, %v10583_v38  ;;  %v10586_v25 = vld [vmem:[#allocation152_spill] sm:$0xff] }
 0x61a   :  { %v4921_v36 = vadd.f32 %v4920_v31, %v4768_v39  ;;  %v4853_v54 = vadd.f32 %v4852_v27, %v4769_v29  ;;  %v9776_v16 = vpop.f32.mrf.mxu1  ;;  %v4774_v24 = vmul.f32 %v4646_v12, %v10583_v38  ;;  %v4650_v14 = vmax.f32 %v4473_v2, 0.0  ;;  %v10588_v31 = vld [vmem:[#allocation154_spill] sm:$0xff]  ;;  %v10589_v27 = vld [vmem:[#allocation156_spill] sm:$0xff] }
 0x61b   :  { %v4651_v43 = vmax.f32 %v4477_v19, 0.0  ;;  %v4483_v52 = vadd.f32 %v9640_v11, %v10584_v5  ;;  %v4775_v53 = vmul.f32 %v4647_v55, %v10585_v51  ;;  %v4487_v13 = vadd.f32 %v9648_v4, %v10586_v25  ;;  %v10591_v2 = vld [vmem:[#allocation158_spill] sm:$0xff]  ;;  %v10592_v7 = vld [vmem:[#allocation160_spill] sm:$0xff] }
 0x61c   :  { %v4922_v23 = vadd.f32 %v4921_v36, %v4770_v56  ;;  %v4854_v22 = vadd.f32 %v4853_v54, %v4771_v47  ;;  %v9784_v59 = vpop.f32.mrf.mxu1  ;;  %v4776_v39 = vmul.f32 %v4648_v30, %v10585_v51  ;;  %v4777_v29 = vmul.f32 %v4649_v34, %v10587_v48  ;;  %v10590_v56 = vld [vmem:[#allocation96_spill] sm:$0xff]  ;;  %v10593_v55 = vld [vmem:[#allocation38_spill] sm:$0xff] }
 0x61d   :  { %v4652_v33 = vmax.f32 %v4479_v61, 0.0  ;;  %v4653_v62 = vmax.f32 %v4481_v46, 0.0  ;;  %v4489_v11 = vadd.f32 %v9656_v49, %v10588_v31  ;;  %v4491_v21 = vadd.f32 %v9664_v3, %v10589_v27  ;;  %v10594_v34 = vld [vmem:[#allocation162_spill] sm:$0xff]  ;;  %v10595_v61 = vld [vmem:[#allocation164_spill] sm:$0xff] }
 0x61e   :  { %v4923_v57 = vadd.f32 %v4922_v23, %v4772_v17  ;;  %v4855_v50 = vadd.f32 %v4854_v22, %v4773_v8  ;;  %v9792_v9 = vpop.f32.mrf.mxu1  ;;  %v4778_v4 = vmul.f32 %v4650_v14, %v10587_v48  ;;  %v4779_v12 = vmul.f32 %v4651_v43, %v10590_v56  ;;  %v10596_v8 = vld [vmem:[#allocation166_spill] sm:$0xff]  ;;  %v10597_v14 = vld [vmem:[#allocation168_spill] sm:$0xff] }
 0x61f   :  { %v4654_v28 = vmax.f32 %v4483_v52, 0.0  ;;  %v4493_v15 = vadd.f32 %v9672_v20, %v10591_v2  ;;  %v4655_v54 = vmax.f32 %v4487_v13, 0.0  ;;  %v4497_v47 = vadd.f32 %v9680_v18, %v10592_v7  ;;  %v10598_v52 = vld [vmem:[#allocation20_spill] sm:$0xff]  ;;  %v10599_v25 = vld [vmem:[#allocation170_spill] sm:$0xff] }
 0x620   :  { %v4924_v45 = vadd.f32 %v4923_v57, %v4774_v24  ;;  %v4856_v6 = vadd.f32 %v4855_v50, %v4775_v53  ;;  %v9800_v60 = vpop.f32.mrf.mxu1  ;;  %v4780_v3 = vmul.f32 %v4652_v33, %v10590_v56  ;;  %v4781_v30 = vmul.f32 %v4653_v62, %v10593_v55  ;;  %v10601_v62 = vld [vmem:[#allocation39_spill] sm:$0xff]  ;;  %v10602_v27 = vld [vmem:[#allocation174_spill] sm:$0xff] }
 0x621   :  { %v4499_v42 = vadd.f32 %v9688_v44, %v10594_v34  ;;  %v4501_v37 = vadd.f32 %v9696_v40, %v10595_v61  ;;  %v4656_v23 = vmax.f32 %v4489_v11, 0.0  ;;  %v4657_v22 = vmax.f32 %v4491_v21, 0.0  ;;  %v10608_v61 = vld [vmem:[#allocation24_spill] sm:$0xff] }
 0x622   :  { %v4925_v19 = vadd.f32 %v4924_v45, %v4776_v39  ;;  %v4857_v36 = vadd.f32 %v4856_v6, %v4777_v29  ;;  %v9808_v49 = vpop.f32.mrf.mxu1  ;;  %v4782_v18 = vmul.f32 %v4654_v28, %v10593_v55  ;;  %v4658_v38 = vmax.f32 %v4493_v15, 0.0  ;;  %v10600_v39 = vld [vmem:[#allocation172_spill] sm:$0xff]  ;;  %v10605_v15 = vld [vmem:[#allocation41_spill] sm:$0xff]  ;;  %v10606_v55 = vld [vmem:[#allocation178_spill] sm:$0xff] }
 0x623   :  { %v4503_v24 = vadd.f32 %v9704_v63, %v10596_v8  ;;  %v4507_v43 = vadd.f32 %v9712_v26, %v10597_v14  ;;  %v4783_v57 = vmul.f32 %v4655_v54, %v10598_v52  ;;  %v4659_v40 = vmax.f32 %v4497_v47, 0.0  ;;  %v10604_v28 = vld [vmem:[#allocation176_spill] sm:$0xff] }
 0x624   :  { %v4926_v46 = vadd.f32 %v4925_v19, %v4778_v4  ;;  %v4858_v20 = vadd.f32 %v4857_v36, %v4779_v12  ;;  %v9816_v17 = vpop.f32.mrf.mxu1  ;;  %v4660_v51 = vmax.f32 %v4499_v42, 0.0  ;;  %v4661_v53 = vmax.f32 %v4501_v37, 0.0 }
 0x625   :  { %v4509_v13 = vadd.f32 %v9720_v32, %v10599_v25  ;;  %v4511_v48 = vadd.f32 %v9728_v35, %v10600_v39  ;;  %v4784_v63 = vmul.f32 %v4656_v23, %v10598_v52  ;;  %v4785_v26 = vmul.f32 %v4657_v22, %v10601_v62  ;;  %v10603_v32 = vld [vmem:[#allocation22_spill] sm:$0xff]  ;;  %v10615_v39 = vld [vmem:[#allocation192_spill] sm:$0xff] }
 0x626   :  { %v4927_v5 = vadd.f32 %v4926_v46, %v4780_v3  ;;  %v4859_v44 = vadd.f32 %v4858_v20, %v4781_v30  ;;  %v4540_v50 = vpop.f32.mrf.mxu1  ;;  %v4786_v6 = vmul.f32 %v4658_v38, %v10601_v62  ;;  %v4662_v31 = vmax.f32 %v4503_v24, 0.0  ;;  %v10609_v46 = vld [vmem:[#allocation182_spill] sm:$0xff]  ;;  %v10610_v38 = vld [vmem:[#allocation184_spill] sm:$0xff] }
 0x627   :  { %v4663_v11 = vmax.f32 %v4507_v43, 0.0  ;;  %v4513_v21 = vadd.f32 %v9736_v0, %v10602_v27  ;;  %v4787_v12 = vmul.f32 %v4659_v40, %v10603_v32  ;;  %v4517_v35 = vadd.f32 %v9744_v41, %v10604_v28  ;;  %v10607_v0 = vld [vmem:[#allocation180_spill] sm:$0xff]  ;;  %v10612_v43 = vld [vmem:[#allocation186_spill] sm:$0xff] }
 0x628   :  { %v4928_v29 = vadd.f32 %v4927_v5, %v4782_v18  ;;  %v4860_v33 = vadd.f32 %v4859_v44, %v4783_v57  ;;  %v4542_v45 = vpop.f32.mrf.mxu1  ;;  %v4788_v2 = vmul.f32 %v4660_v51, %v10603_v32  ;;  %v4789_v19 = vmul.f32 %v4661_v53, %v10605_v15  ;;  %v10613_v5 = vld [vmem:[#allocation188_spill] sm:$0xff] }
 0x629   :  { %v4664_v36 = vmax.f32 %v4509_v13, 0.0  ;;  %v4665_v54 = vmax.f32 %v4511_v48, 0.0  ;;  %v4519_v30 = vadd.f32 %v9752_v10, %v10606_v55  ;;  %v4521_v34 = vadd.f32 %v9760_v58, %v10607_v0  ;;  %v10611_v10 = vld [vmem:[#allocation42_spill] sm:$0xff]  ;;  %v10619_v32 = vld [vmem:[#allocation44_spill] sm:$0xff]  ;;  %v10623_v55 = vld [vmem:[#allocation47_spill] sm:$0xff] }
 0x62a   :  { %v4929_v4 = vadd.f32 %v4928_v29, %v4784_v63  ;;  %v4861_v56 = vadd.f32 %v4860_v33, %v4785_v26  ;;  %v4546_v7 = vpop.f32.mrf.mxu1  ;;  %v4790_v42 = vmul.f32 %v4662_v31, %v10605_v15  ;;  %v4791_v37 = vmul.f32 %v4663_v11, %v10608_v61  ;;  %v10614_v13 = vld [vmem:[#allocation190_spill] sm:$0xff]  ;;  %v10618_v11 = vld [vmem:[#allocation196_spill] sm:$0xff] }
 0x62b   :  { %v4666_v41 = vmax.f32 %v4513_v21, 0.0  ;;  %v4523_v20 = vadd.f32 %v9768_v1, %v10609_v46  ;;  %v4667_v18 = vmax.f32 %v4517_v35, 0.0  ;;  %v4527_v8 = vadd.f32 %v9776_v16, %v10610_v38 }
 0x62c   :  { %v4930_v47 = vadd.f32 %v4929_v4, %v4786_v6  ;;  %v4862_v3 = vadd.f32 %v4861_v56, %v4787_v12  ;;  %v4792_v24 = vmul.f32 %v4664_v36, %v10608_v61  ;;  %v4793_v14 = vmul.f32 %v4665_v54, %v10611_v10  ;;  %v4548_v52 = vpop.f32.mrf.mxu1  ;;  %v10617_v6 = vld [vmem:[#allocation194_spill] sm:$0xff]  ;;  %v10621_v54 = vld [vmem:[#allocation45_spill] sm:$0xff] }
 0x62d   :  { %v4529_v58 = vadd.f32 %v9784_v59, %v10612_v43  ;;  %v4531_v44 = vadd.f32 %v9792_v9, %v10613_v5  ;;  %v4668_v1 = vmax.f32 %v4519_v30, 0.0  ;;  %v4669_v51 = vmax.f32 %v4521_v34, 0.0  ;;  %v10616_v59 = vld [vmem:[#allocation27_spill] sm:$0xff] }
 0x62e   :  { %v4931_v23 = vadd.f32 %v4930_v47, %v4788_v2  ;;  %v4863_v22 = vadd.f32 %v4862_v3, %v4789_v19  ;;  %v4794_v53 = vmul.f32 %v4666_v41, %v10611_v10  ;;  %v4670_v25 = vmax.f32 %v4523_v20, 0.0  ;;  %v4550_v21 = vpop.f32.mrf.mxu1  ;;  %v10620_v2 = vld [vmem:[#allocation198_spill] sm:$0xff]  ;;  %v10625_v20 = vld [vmem:[#allocation204_spill] sm:$0xff] }
 0x62f   :  { %v4533_v16 = vadd.f32 %v9800_v60, %v10614_v13  ;;  %v4537_v48 = vadd.f32 %v9808_v49, %v10615_v39  ;;  %v4795_v63 = vmul.f32 %v4667_v18, %v10616_v59  ;;  %v4671_v62 = vmax.f32 %v4527_v8, 0.0  ;;  %v10624_v41 = vld [vmem:[#allocation202_spill] sm:$0xff] }
 0x630   :  { %v4932_v57 = vadd.f32 %v4931_v23, %v4790_v42  ;;  %v4864_v40 = vadd.f32 %v4863_v22, %v4791_v37  ;;  %v4672_v9 = vmax.f32 %v4529_v58, 0.0  ;;  %v4673_v26 = vmax.f32 %v4531_v44, 0.0  ;;  %v4552_v42 = vpop.f32.mrf.mxu1  ;;  %v10626_v22 = vld [vmem:[#allocation100_spill] sm:$0xff]  ;;  %v10627_v10 = vld [vmem:[#allocation206_spill] sm:$0xff] }
 0x631   :  { %v4539_v31 = vadd.f32 %v9816_v17, %v10617_v6  ;;  %v4541_v27 = vadd.f32 %v4540_v50, %v10618_v11  ;;  %v4796_v60 = vmul.f32 %v4668_v1, %v10616_v59  ;;  %v4797_v12 = vmul.f32 %v4669_v51, %v10619_v32  ;;  %v10622_v17 = vld [vmem:[#allocation200_spill] sm:$0xff] }
 0x632   :  { %v4933_v29 = vadd.f32 %v4932_v57, %v4792_v24  ;;  %v4865_v33 = vadd.f32 %v4864_v40, %v4793_v14  ;;  %v4798_v49 = vmul.f32 %v4670_v25, %v10619_v32  ;;  %v4674_v28 = vmax.f32 %v4533_v16, 0.0  ;;  %v10628_v58 = vld [vmem:[#allocation48_spill] sm:$0xff]  ;;  %v10629_v25 = vld [vmem:[#allocation50_spill] sm:$0xff] }
 0x633   :  { %v4675_v35 = vmax.f32 %v4537_v48, 0.0  ;;  %v4543_v15 = vadd.f32 %v4542_v45, %v10620_v2  ;;  %v4799_v47 = vmul.f32 %v4671_v62, %v10621_v54  ;;  %v4547_v3 = vadd.f32 %v4546_v7, %v10622_v17  ;;  %v10631_v2 = vld [vmem:[#allocation53_spill] sm:$0xff] }
 0x634   :  { %v4934_v4 = vadd.f32 %v4933_v29, %v4794_v53  ;;  %v4866_v56 = vadd.f32 %v4865_v33, %v4795_v63  ;;  %v4800_v50 = vmul.f32 %v4672_v9, %v10621_v54  ;;  %v4801_v30 = vmul.f32 %v4673_v26, %v10623_v55  ;;  %v10630_v33 = vld [vmem:[#allocation51_spill] sm:$0xff] }
 0x635   :  { %v4676_v0 = vmax.f32 %v4539_v31, 0.0  ;;  %v4677_v34 = vmax.f32 %v4541_v27, 0.0  ;;  %v4549_v46 = vadd.f32 %v4548_v52, %v10624_v41  ;;  %v4551_v23 = vadd.f32 %v4550_v21, %v10625_v20 }
 0x636   :  { %v4935_v19 = vadd.f32 %v4934_v4, %v4796_v60  ;;  %v4867_v36 = vadd.f32 %v4866_v56, %v4797_v12  ;;  %v4802_v45 = vmul.f32 %v4674_v28, %v10623_v55  ;;  %v4803_v18 = vmul.f32 %v4675_v35, %v10626_v22 }
 0x637   :  { %v4678_v38 = vmax.f32 %v4543_v15, 0.0  ;;  %v4679_v24 = vmax.f32 %v4547_v3, 0.0  ;;  %v4553_v14 = vadd.f32 %v4552_v42, %v10627_v10  ;;  %v4804_v43 = vmul.f32 %v4676_v0, %v10626_v22 }
 0x638   :  { %v4936_v61 = vadd.f32 %v4935_v19, %v4798_v49  ;;  %v4868_v37 = vadd.f32 %v4867_v36, %v4799_v47  ;;  %v4805_v5 = vmul.f32 %v4677_v34, %v10628_v58  ;;  %v4680_v40 = vmax.f32 %v4549_v46, 0.0 }
 0x639   :  { %v4681_v52 = vmax.f32 %v4551_v23, 0.0  ;;  %v4806_v1 = vmul.f32 %v4678_v38, %v10628_v58  ;;  %v4807_v13 = vmul.f32 %v4679_v24, %v10629_v25  ;;  %v4682_v16 = vmax.f32 %v4553_v14, 0.0 }
 0x63a   :  { %v4937_v8 = vadd.f32 %v4936_v61, %v4800_v50  ;;  %v4869_v7 = vadd.f32 %v4868_v37, %v4801_v30  ;;  %v4808_v29 = vmul.f32 %v4680_v40, %v10629_v25 }
 0x63b   :  { %v4809_v59 = vmul.f32 %v4681_v52, %v10630_v33  ;;  %v4810_v9 = vmul.f32 %v4682_v16, %v10630_v33 }
 0x63c   :  { %v4938_v44 = vadd.f32 %v4937_v8, %v4802_v45  ;;  %v4870_v57 = vadd.f32 %v4869_v7, %v4803_v18 }
 0x63e   :  { %v4939_v51 = vadd.f32 %v4938_v44, %v4804_v43  ;;  %v4871_v53 = vadd.f32 %v4870_v57, %v4805_v5 }
 0x640   :  { %v4940_v39 = vadd.f32 %v4939_v51, %v4806_v1  ;;  %v4872_v48 = vadd.f32 %v4871_v53, %v4807_v13 }
 0x642   :  { %v4941_v63 = vadd.f32 %v4940_v39, %v4808_v29  ;;  %v4873_v62 = vadd.f32 %v4872_v48, %v4809_v59 }
 0x644   :  { %v4874_v26 = vrot.slane %v4873_v62, 4  ;;  %v4942_v6 = vadd.f32 %v4941_v63, %v4810_v9 }
 0x646   :  { %v4875_v31 = vadd.f32 %v4874_v26, %v4873_v62  ;;  %v4943_v11 = vrot.slane %v4942_v6, 4 }
 0x648   :  { %v4876_v27 = vrot.slane %v4875_v31, 2  ;;  %v4944_v21 = vadd.f32 %v4943_v11, %v4942_v6 }
 0x64a   :  { %v4877_v4 = vadd.f32 %v4876_v27, %v4875_v31  ;;  %v4945_v56 = vrot.slane %v4944_v21, 2 }
 0x64c   :  { %v4878_v60 = vrot.slane %v4877_v4, 1  ;;  %v4946_v32 = vadd.f32 %v4945_v56, %v4944_v21 }
 0x64e   :  { %v4947_v12 = vrot.slane %v4946_v32, 1  ;;  %v4879_v49 = vadd.f32 %v4878_v60, %v4877_v4 }
 0x650   :  { %v4948_v28 = vadd.f32 %v4947_v12, %v4946_v32 }
 0x652   :  { %v4951_v35 = vcombine.low %v4879_v49, %v4948_v28 }
 0x654   :  { %v4958_v15 = vrot.slane %v4951_v35, %v10631_v2 }
 0x656   :  { %v4965_v19 = vrot.slane %v4958_v15, %v10631_v2 }
 0x658   :  { %5277 = vst.msk [vmem:[%s9894_s4 + $0x2] sm:$0x3] %vm8484_vm1, %v4965_v19 }

</bundles_post_ra>
